<compile_context>
chip_gen: v5e
topology: v5e:2x2
jax: 0.10.0
libtpu: 0.0.40
codegen_flags: <defaults>
</compile_context>

<pallas_src>
import functools

import jax
import jax.numpy as jnp
from jax.experimental import pallas as pl
from jax.experimental.pallas import tpu as pltpu

OUT_PAD = 128  # lane-dense output width (output_ch=2 is zero-padded to this)


def _round_up(v, m):
    return ((v + m - 1) // m) * m


def mlp_kernel(x_ref, w0_ref, b0_ref, w1_ref, b1_ref, w2_ref, b2_ref,
               wo_ref, bo_ref, out_ref):
    x = x_ref[...]                         # (tb, input_ch) f32
    w0 = w0_ref[...]                       # (input_ch, W)  f32

    # Layer 0: contraction depth K=input_ch (=2) is degenerate for the MXU.
    # Do it as broadcast multiply-adds on the VPU (VALU slot has slack).
    h = x[:, 0:1] * w0[0:1, :]             # (tb, 1) * (1, W) -> (tb, W)
    for c in range(1, x.shape[1]):         # static, tiny loop (input_ch=2)
        h = h + x[:, c:c + 1] * w0[c:c + 1, :]
    h = jnp.maximum(h + b0_ref[...], 0.0)  # (tb, W)

    # Layers 1-2: bf16 operands on the MXU, f32 accumulation.
    h = jnp.dot(h.astype(jnp.bfloat16), w1_ref[...],
                preferred_element_type=jnp.float32)
    h = jnp.maximum(h + b1_ref[...], 0.0)

    h = jnp.dot(h.astype(jnp.bfloat16), w2_ref[...],
                preferred_element_type=jnp.float32)
    h = jnp.maximum(h + b2_ref[...], 0.0)

    # Output head (lane-dense: padded to OUT_PAD=128 columns).
    out = jnp.dot(h.astype(jnp.bfloat16), wo_ref[...],
                  preferred_element_type=jnp.float32)
    out_ref[...] = (out + bo_ref[...]).astype(out_ref.dtype)


@functools.partial(jax.jit, static_argnames=("block_b",))
def mlp_forward(x, params, block_b=512):
    """x: [B, >=input_ch] float32. params: transposed f32 weights/biases."""
    input_ch = params["w0"].shape[0]
    W = params["w0"].shape[1]
    output_ch = params["wo"].shape[1]

    # torch.split(x, [input_ch], dim=-1)[0]  ->  take the first input_ch feats
    x = x[..., :input_ch].astype(jnp.float32)
    B = x.shape[0]

    # ---- batch tile selection ----------------------------------------------
    tb = _round_up(min(block_b, _round_up(B, 8)), 8)
    # v7x has 2 TensorCores: ensure the parallel grid has >= 2 steps when
    # there's enough work (harmless on single-core v5e/v6e).
    if -(-B // tb) < 2 and B >= 128:
        tb = _round_up(-(-B // 2), 8)
    grid_b = -(-B // tb)
    B_pad = grid_b * tb
    if B_pad != B:                          # ragged batch: zero-pad, slice later
        x = jnp.pad(x, ((0, B_pad - B), (0, 0)))

    # ---- kernel-side parameter prep ----------------------------------------
    w0 = params["w0"].astype(jnp.float32)   # K=2 layer runs on the VPU in f32
    b0 = params["b0"].astype(jnp.float32)
    w1 = params["w1"].astype(jnp.bfloat16)
    b1 = params["b1"].astype(jnp.float32)
    w2 = params["w2"].astype(jnp.bfloat16)
    b2 = params["b2"].astype(jnp.float32)
    wo = jnp.pad(params["wo"], ((0, 0), (0, OUT_PAD - output_ch))).astype(jnp.bfloat16)
    bo = jnp.pad(params["bo"], ((0, 0), (0, OUT_PAD - output_ch))).astype(jnp.float32)

    full = lambda i: (0, 0)  # weights/biases: one full-array block, resident

    flops = 2 * B_pad * (input_ch * W + 2 * W * W + W * OUT_PAD)
    bytes_accessed = (x.size * 4 + w0.size * 4 + b0.size * 4
                      + w1.size * 2 + b1.size * 4 + w2.size * 2 + b2.size * 4
                      + wo.size * 2 + bo.size * 4 + B_pad * OUT_PAD * 4)

    out = pl.pallas_call(
        mlp_kernel,
        out_shape=jax.ShapeDtypeStruct((B_pad, OUT_PAD), jnp.float32),
        grid_spec=pltpu.PrefetchScalarGridSpec(
            num_scalar_prefetch=0,
            grid=(grid_b,),
            in_specs=[
                pl.BlockSpec((tb, input_ch), lambda i: (i, 0)),   # x tile
                pl.BlockSpec((input_ch, W), full),                # w0 (f32, VPU)
                pl.BlockSpec((1, W), full),                       # b0
                pl.BlockSpec((W, W), full),                       # w1 (bf16)
                pl.BlockSpec((1, W), full),                       # b1
                pl.BlockSpec((W, W), full),                       # w2 (bf16)
                pl.BlockSpec((1, W), full),                       # b2
                pl.BlockSpec((W, OUT_PAD), full),                 # wo (bf16, padded)
                pl.BlockSpec((1, OUT_PAD), full),                 # bo (padded)
            ],
            out_specs=pl.BlockSpec((tb, OUT_PAD), lambda i: (i, 0)),
        ),
        compiler_params=pltpu.CompilerParams(
            dimension_semantics=("parallel",),
            vmem_limit_bytes=32 * 1024 * 1024),
        cost_estimate=pl.CostEstimate(flops=flops, transcendentals=0,
                                      bytes_accessed=bytes_accessed),
    )(x, w0, b0, w1, b1, w2, b2, wo, bo)

    return out[:B, :output_ch]


def init_params(key, input_ch=2, W=512, output_ch=2):
    """Deterministic init mimicking nn.Linear default (U(-1/sqrt(fan_in), +))."""
    def linear(k, fan_in, fan_out):
        kw, kb = jax.random.split(k)
        bound = 1.0 / jnp.sqrt(fan_in)
        # stored already transposed: [in, out]
        w = jax.random.uniform(kw, (fan_in, fan_out), jnp.float32, -bound, bound)
        b = jax.random.uniform(kb, (1, fan_out), jnp.float32, -bound, bound)
        return w, b

    k0, k1, k2, ko = jax.random.split(key, 4)
    w0, b0 = linear(k0, input_ch, W)
    w1, b1 = linear(k1, W, W)
    w2, b2 = linear(k2, W, W)
    wo, bo = linear(ko, W, output_ch)
    return dict(w0=w0, b0=b0, w1=w1, b1=b1, w2=w2, b2=b2, wo=wo, bo=bo)


def mlp_reference_f32(x, p):
    """Pure-JAX f32 reference of the PyTorch forward."""
    input_ch = p["w0"].shape[0]
    h = x[..., :input_ch]
    h = jax.nn.relu(h @ p["w0"] + p["b0"])
    h = jax.nn.relu(h @ p["w1"] + p["b1"])
    h = jax.nn.relu(h @ p["w2"] + p["b2"])
    return h @ p["wo"] + p["bo"]


def mlp_reference_mixed(x, p):
    """Reference mimicking the kernel's mixed-precision (bf16 MXU, f32 acc) math."""
    input_ch = p["w0"].shape[0]
    xin = x[..., :input_ch].astype(jnp.float32)
    w0 = p["w0"].astype(jnp.float32)
    h = xin[:, 0:1] * w0[0:1, :]
    for c in range(1, input_ch):
        h = h + xin[:, c:c + 1] * w0[c:c + 1, :]
    h = jnp.maximum(h + p["b0"], 0.0)
    h = jnp.maximum(jnp.dot(h.astype(jnp.bfloat16), p["w1"].astype(jnp.bfloat16),
                            preferred_element_type=jnp.float32) + p["b1"], 0.0)
    h = jnp.maximum(jnp.dot(h.astype(jnp.bfloat16), p["w2"].astype(jnp.bfloat16),
                            preferred_element_type=jnp.float32) + p["b2"], 0.0)
    return jnp.dot(h.astype(jnp.bfloat16), p["wo"].astype(jnp.bfloat16),
                   preferred_element_type=jnp.float32) + p["bo"]


if __name__ == "__main__":
    key = jax.random.PRNGKey(0)
    kx, kx2, kp = jax.random.split(key, 3)

    B, input_ch, W, output_ch = 256, 2, 512, 2
    x = jax.random.normal(kx, (B, input_ch), jnp.float32)
    params = init_params(kp, input_ch=input_ch, W=W, output_ch=output_ch)

    out = jax.block_until_ready(mlp_forward(x, params))
    assert out.shape == (B, output_ch), out.shape

    # Tight check against a reference that matches the kernel's bf16/f32 math.
    ref_mixed = mlp_reference_mixed(x, params)
    assert jnp.allclose(out, ref_mixed, atol=2e-3, rtol=2e-3), \
        float(jnp.max(jnp.abs(out - ref_mixed)))

    # Loose check against the true f32 PyTorch-equivalent forward.
    ref_f32 = mlp_reference_f32(x, params)
    assert jnp.allclose(out, ref_f32, atol=5e-2, rtol=5e-2), \
        float(jnp.max(jnp.abs(out - ref_f32)))

    # Ragged batch (not a multiple of the tile) exercises the padding path.
    B2 = 100
    x2 = jax.random.normal(kx2, (B2, input_ch), jnp.float32)
    out2 = jax.block_until_ready(mlp_forward(x2, params))
    assert out2.shape == (B2, output_ch), out2.shape
    ref2 = mlp_reference_f32(x2, params)
    assert jnp.allclose(out2, ref2, atol=5e-2, rtol=5e-2), \
        float(jnp.max(jnp.abs(out2 - ref2)))

    print("KERNEL_OK")
</pallas_src>

<mosaic_0001>
module attributes {stable_mosaic.version = 11 : i64} {
  func.func @mlp_kernel(%arg0: i32, %arg1: memref<128x2xf32, #tpu.memory_space<vmem>>, %arg2: memref<2x512xf32, #tpu.memory_space<vmem>>, %arg3: memref<1x512xf32, #tpu.memory_space<vmem>>, %arg4: memref<512x512xbf16, #tpu.memory_space<vmem>>, %arg5: memref<1x512xf32, #tpu.memory_space<vmem>>, %arg6: memref<512x512xbf16, #tpu.memory_space<vmem>>, %arg7: memref<1x512xf32, #tpu.memory_space<vmem>>, %arg8: memref<512x128xbf16, #tpu.memory_space<vmem>>, %arg9: memref<1x128xf32, #tpu.memory_space<vmem>>, %arg10: memref<128x128xf32, #tpu.memory_space<vmem>>) attributes {dimension_semantics = [#tpu.dimension_semantics<parallel>], iteration_bounds = array<i64: 2>, scalar_prefetch = 0 : i64, scratch_operands = 0 : i64, tpu.core_type = #tpu.core_type<tc>, window_params = [{transform_indices = @transform_0, window_bounds = array<i64: 128, 2>}, {pipeline_mode = #tpu.pipeline_mode<synchronous>, transform_indices = @transform_1, window_bounds = array<i64: 2, 512>}, {pipeline_mode = #tpu.pipeline_mode<synchronous>, transform_indices = @transform_2, window_bounds = array<i64: 1, 512>}, {pipeline_mode = #tpu.pipeline_mode<synchronous>, transform_indices = @transform_3, window_bounds = array<i64: 512, 512>}, {pipeline_mode = #tpu.pipeline_mode<synchronous>, transform_indices = @transform_4, window_bounds = array<i64: 1, 512>}, {pipeline_mode = #tpu.pipeline_mode<synchronous>, transform_indices = @transform_5, window_bounds = array<i64: 512, 512>}, {pipeline_mode = #tpu.pipeline_mode<synchronous>, transform_indices = @transform_6, window_bounds = array<i64: 1, 512>}, {pipeline_mode = #tpu.pipeline_mode<synchronous>, transform_indices = @transform_7, window_bounds = array<i64: 512, 128>}, {pipeline_mode = #tpu.pipeline_mode<synchronous>, transform_indices = @transform_8, window_bounds = array<i64: 1, 128>}, {transform_indices = @transform_9, window_bounds = array<i64: 128, 128>}]} {
    %c0 = arith.constant 0 : index
    %c0_0 = arith.constant 0 : index
    %0 = vector.load %arg1[%c0, %c0_0] : memref<128x2xf32, #tpu.memory_space<vmem>>, vector<128x2xf32>
    %c0_1 = arith.constant 0 : index
    %c0_2 = arith.constant 0 : index
    %1 = vector.load %arg2[%c0_1, %c0_2] : memref<2x512xf32, #tpu.memory_space<vmem>>, vector<2x512xf32>
    %2 = vector.extract_strided_slice %0 {offsets = [0, 0], sizes = [128, 1], strides = [1, 1]} : vector<128x2xf32> to vector<128x1xf32>
    %3 = vector.extract_strided_slice %1 {offsets = [0, 0], sizes = [1, 512], strides = [1, 1]} : vector<2x512xf32> to vector<1x512xf32>
    %4 = vector.broadcast %2 : vector<128x1xf32> to vector<128x512xf32>
    %5 = vector.broadcast %3 : vector<1x512xf32> to vector<128x512xf32>
    %6 = arith.mulf %4, %5 : vector<128x512xf32>
    %7 = vector.extract_strided_slice %0 {offsets = [0, 1], sizes = [128, 1], strides = [1, 1]} : vector<128x2xf32> to vector<128x1xf32>
    %8 = vector.extract_strided_slice %1 {offsets = [1, 0], sizes = [1, 512], strides = [1, 1]} : vector<2x512xf32> to vector<1x512xf32>
    %9 = vector.broadcast %7 : vector<128x1xf32> to vector<128x512xf32>
    %10 = vector.broadcast %8 : vector<1x512xf32> to vector<128x512xf32>
    %11 = arith.mulf %9, %10 : vector<128x512xf32>
    %12 = arith.addf %6, %11 : vector<128x512xf32>
    %c0_3 = arith.constant 0 : index
    %c0_4 = arith.constant 0 : index
    %13 = vector.load %arg3[%c0_3, %c0_4] : memref<1x512xf32, #tpu.memory_space<vmem>>, vector<1x512xf32>
    %14 = vector.broadcast %13 : vector<1x512xf32> to vector<128x512xf32>
    %15 = arith.addf %12, %14 : vector<128x512xf32>
    %cst = arith.constant 0.000000e+00 : f32
    %16 = vector.broadcast %cst : f32 to vector<128x512xf32>
    %17 = arith.maximumf %15, %16 : vector<128x512xf32>
    %18 = arith.truncf %17 : vector<128x512xf32> to vector<128x512xbf16>
    %c0_5 = arith.constant 0 : index
    %c0_6 = arith.constant 0 : index
    %19 = vector.load %arg4[%c0_5, %c0_6] : memref<512x512xbf16, #tpu.memory_space<vmem>>, vector<512x512xbf16>
    %cst_7 = arith.constant dense<0.000000e+00> : vector<128x512xf32>
    %20 = tpu.matmul %18, %19, %cst_7 {dimension_numbers = #tpu.dot_dimension_numbers<[1], [0], [0], [1], [0, 0, 1, 1], [], []>} : vector<128x512xbf16>, vector<512x512xbf16>, vector<128x512xf32> -> vector<128x512xf32>
    %c0_8 = arith.constant 0 : index
    %c0_9 = arith.constant 0 : index
    %21 = vector.load %arg5[%c0_8, %c0_9] : memref<1x512xf32, #tpu.memory_space<vmem>>, vector<1x512xf32>
    %22 = vector.broadcast %21 : vector<1x512xf32> to vector<128x512xf32>
    %23 = arith.addf %20, %22 : vector<128x512xf32>
    %cst_10 = arith.constant 0.000000e+00 : f32
    %24 = vector.broadcast %cst_10 : f32 to vector<128x512xf32>
    %25 = arith.maximumf %23, %24 : vector<128x512xf32>
    %26 = arith.truncf %25 : vector<128x512xf32> to vector<128x512xbf16>
    %c0_11 = arith.constant 0 : index
    %c0_12 = arith.constant 0 : index
    %27 = vector.load %arg6[%c0_11, %c0_12] : memref<512x512xbf16, #tpu.memory_space<vmem>>, vector<512x512xbf16>
    %cst_13 = arith.constant dense<0.000000e+00> : vector<128x512xf32>
    %28 = tpu.matmul %26, %27, %cst_13 {dimension_numbers = #tpu.dot_dimension_numbers<[1], [0], [0], [1], [0, 0, 1, 1], [], []>} : vector<128x512xbf16>, vector<512x512xbf16>, vector<128x512xf32> -> vector<128x512xf32>
    %c0_14 = arith.constant 0 : index
    %c0_15 = arith.constant 0 : index
    %29 = vector.load %arg7[%c0_14, %c0_15] : memref<1x512xf32, #tpu.memory_space<vmem>>, vector<1x512xf32>
    %30 = vector.broadcast %29 : vector<1x512xf32> to vector<128x512xf32>
    %31 = arith.addf %28, %30 : vector<128x512xf32>
    %cst_16 = arith.constant 0.000000e+00 : f32
    %32 = vector.broadcast %cst_16 : f32 to vector<128x512xf32>
    %33 = arith.maximumf %31, %32 : vector<128x512xf32>
    %34 = arith.truncf %33 : vector<128x512xf32> to vector<128x512xbf16>
    %c0_17 = arith.constant 0 : index
    %c0_18 = arith.constant 0 : index
    %35 = vector.load %arg8[%c0_17, %c0_18] : memref<512x128xbf16, #tpu.memory_space<vmem>>, vector<512x128xbf16>
    %cst_19 = arith.constant dense<0.000000e+00> : vector<128x128xf32>
    %36 = tpu.matmul %34, %35, %cst_19 {dimension_numbers = #tpu.dot_dimension_numbers<[1], [0], [0], [1], [0, 0, 1, 1], [], []>} : vector<128x512xbf16>, vector<512x128xbf16>, vector<128x128xf32> -> vector<128x128xf32>
    %c0_20 = arith.constant 0 : index
    %c0_21 = arith.constant 0 : index
    %37 = vector.load %arg9[%c0_20, %c0_21] : memref<1x128xf32, #tpu.memory_space<vmem>>, vector<1x128xf32>
    %38 = vector.broadcast %37 : vector<1x128xf32> to vector<128x128xf32>
    %39 = arith.addf %36, %38 : vector<128x128xf32>
    %c0_22 = arith.constant 0 : index
    %c0_23 = arith.constant 0 : index
    %40 = vector.load %arg10[%c0_22, %c0_23] : memref<128x128xf32, #tpu.memory_space<vmem>>, vector<128x128xf32>
    tpu.vector_store %arg10[%c0_22, %c0_23], %39 {strides = array<i32>} : memref<128x128xf32, #tpu.memory_space<vmem>>, vector<128x128xf32>,
    return
  }
  func.func @transform_0(%arg0: i32) -> (i32, i32) {
    %c0_i32 = arith.constant 0 : i32
    %c0_i32_0 = arith.constant 0 : i32
    return %arg0, %c0_i32 : i32, i32
  }
  func.func @transform_1(%arg0: i32) -> (i32, i32) {
    %c0_i32 = arith.constant 0 : i32
    %c0_i32_0 = arith.constant 0 : i32
    %c0_i32_1 = arith.constant 0 : i32
    return %c0_i32, %c0_i32_0 : i32, i32
  }
  func.func @transform_2(%arg0: i32) -> (i32, i32) {
    %c0_i32 = arith.constant 0 : i32
    %c0_i32_0 = arith.constant 0 : i32
    %c0_i32_1 = arith.constant 0 : i32
    return %c0_i32, %c0_i32_0 : i32, i32
  }
  func.func @transform_3(%arg0: i32) -> (i32, i32) {
    %c0_i32 = arith.constant 0 : i32
    %c0_i32_0 = arith.constant 0 : i32
    %c0_i32_1 = arith.constant 0 : i32
    return %c0_i32, %c0_i32_0 : i32, i32
  }
  func.func @transform_4(%arg0: i32) -> (i32, i32) {
    %c0_i32 = arith.constant 0 : i32
    %c0_i32_0 = arith.constant 0 : i32
    %c0_i32_1 = arith.constant 0 : i32
    return %c0_i32, %c0_i32_0 : i32, i32
  }
  func.func @transform_5(%arg0: i32) -> (i32, i32) {
    %c0_i32 = arith.constant 0 : i32
    %c0_i32_0 = arith.constant 0 : i32
    %c0_i32_1 = arith.constant 0 : i32
    return %c0_i32, %c0_i32_0 : i32, i32
  }
  func.func @transform_6(%arg0: i32) -> (i32, i32) {
    %c0_i32 = arith.constant 0 : i32
    %c0_i32_0 = arith.constant 0 : i32
    %c0_i32_1 = arith.constant 0 : i32
    return %c0_i32, %c0_i32_0 : i32, i32
  }
  func.func @transform_7(%arg0: i32) -> (i32, i32) {
    %c0_i32 = arith.constant 0 : i32
    %c0_i32_0 = arith.constant 0 : i32
    %c0_i32_1 = arith.constant 0 : i32
    return %c0_i32, %c0_i32_0 : i32, i32
  }
  func.func @transform_8(%arg0: i32) -> (i32, i32) {
    %c0_i32 = arith.constant 0 : i32
    %c0_i32_0 = arith.constant 0 : i32
    %c0_i32_1 = arith.constant 0 : i32
    return %c0_i32, %c0_i32_0 : i32, i32
  }
  func.func @transform_9(%arg0: i32) -> (i32, i32) {
    %c0_i32 = arith.constant 0 : i32
    %c0_i32_0 = arith.constant 0 : i32
    return %arg0, %c0_i32 : i32, i32
  }
}

</mosaic_0001>

<bundles_post_ra>
// kernel: mlp_forward.1
= control target key start
LH: loop header
LB: loop body
LE: loop exit
PB: predicated region body
PF: predicated region fallthrough
CT: control target
= control target key end

     0   :  { %s6270_s30 = smov 0   ;;  %s8879_s0 = inlined_call_operand.vmem [shape: f32[256,2], index: 0, kind: input, shape index: {}]   ;;  %s8880_s1 = inlined_call_operand.vmem [shape: f32[2,512], index: 1, kind: input, shape index: {}]   ;;  %s8881_s2 = inlined_call_operand.vmem [shape: f32[1,512], index: 2, kind: input, shape index: {}]   ;;  %s8882_s3 = inlined_call_operand.vmem [shape: bf16[512,512], index: 3, kind: input, shape index: {}]   ;;  %s8883_s4 = inlined_call_operand.vmem [shape: f32[1,512], index: 4, kind: input, shape index: {}]   ;;  %s8884_s5 = inlined_call_operand.vmem [shape: bf16[512,512], index: 5, kind: input, shape index: {}]   ;;  %s8885_s6 = inlined_call_operand.vmem [shape: f32[1,512], index: 6, kind: input, shape index: {}]   ;;  %s8886_s7 = inlined_call_operand.vmem [shape: bf16[512,128], index: 7, kind: input, shape index: {}]   ;;  %s8887_s8 = inlined_call_operand.vmem [shape: f32[1,128], index: 8, kind: input, shape index: {}]   ;;  %s8888_s9 = inlined_call_operand.vmem [shape: f32[256,128], index: 9, kind: output, shape index: {}]  }
   0x1 LB: > { %s4728_s10 = sadd.s32 4294967295, %s6216_s30   ;;  %p4732_p0 = scmp.ge.s32.totalorder %s6216_s30, 1  ;;  %s6216_s30 = sphi %s6270_s30, %s19_s30  }
   0x2   : > { %p288_p1 = scmp.lt.s32.totalorder %s6216_s30, 3 }
   0x4   : > { %p289_p2 = pnand %p4732_p0, %p288_p1 }
   0x6   : > { %292 = sbr.rel (%p289_p2) target bundleno = 1470 (0x5be), region = 56 }
   0xb   : > { %s4733_s11 = sshll.u32 %s4728_s10, 4  ;;  %v6218_v0 = vmov 1   ;;  %v6219_v1 = vmov 0   ;;  %v4851_v15 = vld [vmem:[%s8882_s3 + $0xe0] sm:$0xf] }
   0xc   : > { %6190 = vset.pattern.permute.xlu1 %v6218_v0  ;;  %6189 = vset.pattern.permute.xlu0 %v6219_v1  ;;  %p325_p3 = scmp.lt.s32.totalorder %s4733_s11, 31  ;;  %v5921_v16 = vld [vmem:[%s8882_s3 + $0xec] sm:$0xf0]  ;;  %v4979_v18 = vld [vmem:[%s8882_s3 + $0x1e0] sm:$0xf] }
   0xd   : > { %6191 = vset.pattern.permute.xlu2 %v6219_v1  ;;  %v4852_v17 = vor.u32 %v5921_v16, %v4851_v15  ;;  %v5953_v19 = vld [vmem:[%s8882_s3 + $0x1ec] sm:$0xf0]  ;;  %v5107_v20 = vld [vmem:[%s8882_s3 + $0x2e0] sm:$0xf] }
   0xe   : > { %s8906_s11 = smov (!%p325_p3, %s4733_s11), 31  ;;  %v4980_v21 = vor.u32 %v5953_v19, %v4979_v18  ;;  %v5985_v22 = vld [vmem:[%s8882_s3 + $0x2ec] sm:$0xf0]  ;;  %v5235_v23 = vld [vmem:[%s8882_s3 + $0x3e0] sm:$0xf] }
   0xf   : > { %s4734_s12 = sshll.u32 %s8906_s11, 3  ;;  %v6017_v24 = vld [vmem:[%s8882_s3 + $0x3ec] sm:$0xf0]  ;;  %1662 = vmatpush.bf16.msra.mxu0 %v4852_v17  ;;  %v5108_v25 = vor.u32 %v5985_v22, %v5107_v20  ;;  %v4835_v27 = vld [vmem:[%s8882_s3 + $0xc0] sm:$0xf] }
  0x10   : > { %s6289_s15 = scalar_lea.vmem %s8879_s0, %s4734_s12  ;;  %v5236_v26 = vor.u32 %v6017_v24, %v5235_v23  ;;  %v5917_v28 = vld [vmem:[%s8882_s3 + $0xcc] sm:$0xf0]  ;;  %1711 = vmatpush.bf16.msra.mxu1 %v4980_v21  ;;  %v4963_v31 = vld [vmem:[%s8882_s3 + $0x1c0] sm:$0xf]  ;;  %s8843_s26 = scalar_lea.vmem %s8888_s9, %s4734_s12 }
  0x11   : > { %v336_v2 = vld [vmem:[%s6289_s15] sm:$0xff]  ;;  %v338_v3 = vld [vmem:[%s6289_s15 + $0x10] sm:$0xff]  ;;  %v337_v4 = vld [vmem:[%s6289_s15 + $0x8] sm:$0xff]  ;;  %v4836_v32 = vor.u32 %v5917_v28, %v4835_v27  ;;  %1760 = vmatpush.bf16.msra.mxu2 %v5108_v25 }
  0x12   : > { %511 = vperm.xlu1 %6190, %v336_v2   ;;  %355 = vperm.xlu0 %6189, %v336_v2   ;;  %v339_v5 = vld [vmem:[%s6289_s15 + $0x18] sm:$0xff]  ;;  %v340_v6 = vld [vmem:[%s6289_s15 + $0x20] sm:$0xff]  ;;  %v341_v7 = vld [vmem:[%s6289_s15 + $0x28] sm:$0xff] }
  0x13   : > { %365 = vperm.xlu2 %6191, %v338_v3   ;;  %v342_v8 = vld [vmem:[%s6289_s15 + $0x30] sm:$0xff]  ;;  %v343_v9 = vld [vmem:[%s6289_s15 + $0x38] sm:$0xff]  ;;  %v345_v10 = vld [vmem:[%s6289_s15 + $0x48] sm:$0xff]  ;;  %1809 = vmatpush.bf16.msra.mxu3 %v5236_v26 }
  0x14   : > { %v344_v11 = vld [vmem:[%s6289_s15 + $0x40] sm:$0xff]  ;;  %v346_v12 = vld [vmem:[%s6289_s15 + $0x50] sm:$0xff]  ;;  %v6312_v13 = vld [vmem:[%s6289_s15 + $0x68] sm:$0xff]  ;;  %1663 = vmatpush.bf16.msra.mxu0 %v4836_v32 }
  0x15   : > { %v347_v14 = vld [vmem:[%s6289_s15 + $0x58] sm:$0xff]  ;;  %v350_v29 = vld [vmem:[%s6289_s15 + $0x70] sm:$0xff]  ;;  %v348_v30 = vld [vmem:[%s6289_s15 + $0x60] sm:$0xff] }
  0x16   : > { %v5949_v33 = vld [vmem:[%s8882_s3 + $0x1cc] sm:$0xf0]  ;;  %v5091_v34 = vld [vmem:[%s8882_s3 + $0x2c0] sm:$0xf] }
  0x17   : > { %v5981_v35 = vld [vmem:[%s8882_s3 + $0x2cc] sm:$0xf0]  ;;  %v5219_v36 = vld [vmem:[%s8882_s3 + $0x3c0] sm:$0xf]  ;;  %v4964_v37 = vor.u32 %v5949_v33, %v4963_v31 }
  0x18   : > { %v5092_v38 = vor.u32 %v5981_v35, %v5091_v34  ;;  %v6013_v39 = vld [vmem:[%s8882_s3 + $0x3cc] sm:$0xf0]  ;;  %v4819_v40 = vld [vmem:[%s8882_s3 + $0xa0] sm:$0xf] }
  0x19   : > { %v5913_v41 = vld [vmem:[%s8882_s3 + $0xac] sm:$0xf0]  ;;  %v5220_v42 = vor.u32 %v6013_v39, %v5219_v36  ;;  %v4947_v44 = vld [vmem:[%s8882_s3 + $0x1a0] sm:$0xf]  ;;  %1712 = vmatpush.bf16.msra.mxu1 %v4964_v37 }
  0x1a   : > { %515 = vperm.xlu1 %6190, %v337_v4   ;;  %360 = vperm.xlu0 %6189, %v337_v4   ;;  %v4820_v43 = vor.u32 %v5913_v41, %v4819_v40  ;;  %v5945_v45 = vld [vmem:[%s8882_s3 + $0x1ac] sm:$0xf0]  ;;  %v5075_v46 = vld [vmem:[%s8882_s3 + $0x2a0] sm:$0xf] }
  0x1b   : > { %370 = vperm.xlu2 %6191, %v339_v5   ;;  %v4948_v47 = vor.u32 %v5945_v45, %v4947_v44  ;;  %v5977_v48 = vld [vmem:[%s8882_s3 + $0x2ac] sm:$0xf0]  ;;  %v5203_v49 = vld [vmem:[%s8882_s3 + $0x3a0] sm:$0xf]  ;;  %1761 = vmatpush.bf16.msra.mxu2 %v5092_v38 }
  0x1c   : > { %v6009_v50 = vld [vmem:[%s8882_s3 + $0x3ac] sm:$0xf0]  ;;  %v5076_v51 = vor.u32 %v5977_v48, %v5075_v46  ;;  %v4803_v52 = vld [vmem:[%s8882_s3 + $0x80] sm:$0xf]  ;;  %1810 = vmatpush.bf16.msra.mxu3 %v5220_v42  ;;  %1664 = vmatpush.bf16.msra.mxu0 %v4820_v43 }
  0x1d   : > { %v5909_v53 = vld [vmem:[%s8882_s3 + $0x8c] sm:$0xf0]  ;;  %v4931_v54 = vld [vmem:[%s8882_s3 + $0x180] sm:$0xf]  ;;  %v5204_v55 = vor.u32 %v6009_v50, %v5203_v49  ;;  %1713 = vmatpush.bf16.msra.mxu1 %v4948_v47 }
  0x1e   : > { %v5941_v56 = vld [vmem:[%s8882_s3 + $0x18c] sm:$0xf0]  ;;  %v5059_v57 = vld [vmem:[%s8882_s3 + $0x280] sm:$0xf]  ;;  %v4804_v59 = vor.u32 %v5909_v53, %v4803_v52  ;;  %v5109_v52 = vld [vmem:[%s8882_s3 + $0x2f0] sm:$0xf0] }
  0x1f   : > { %v5973_v58 = vld [vmem:[%s8882_s3 + $0x28c] sm:$0xf0]  ;;  %v5187_v60 = vld [vmem:[%s8882_s3 + $0x380] sm:$0xf]  ;;  %v4932_v62 = vor.u32 %v5941_v56, %v4931_v54  ;;  %1762 = vmatpush.bf16.msra.mxu2 %v5076_v51  ;;  %v5983_v51 = vld [vmem:[%s8882_s3 + $0x2e4] sm:$0xf] }
  0x20   : > { %v6005_v61 = vld [vmem:[%s8882_s3 + $0x38c] sm:$0xf0]  ;;  %v5060_v63 = vor.u32 %v5973_v58, %v5059_v57  ;;  %1811 = vmatpush.bf16.msra.mxu3 %v5204_v55  ;;  %1665 = vmatpush.bf16.msra.mxu0 %v4804_v59  ;;  %v4771_v16 = vld [vmem:[%s8882_s3 + $0x40] sm:$0xf]  ;;  %v5919_v53 = vld [vmem:[%s8882_s3 + $0xe4] sm:$0xf]  ;;  %v5112_v54 = vor.u32 %v5983_v51, %v5109_v52 }
  0x21   : > { %v5188_v2 = vor.u32 %v6005_v61, %v5187_v60  ;;  %1714 = vmatpush.bf16.msra.mxu1 %v4932_v62  ;;  %v5905_v4 = vld [vmem:[%s8882_s3 + $0x6c] sm:$0xf0]  ;;  %v5027_v20 = vld [vmem:[%s8882_s3 + $0x240] sm:$0xf]  ;;  %v4853_v55 = vld [vmem:[%s8882_s3 + $0xf0] sm:$0xf0] }
  0x22   : > { %523 = vperm.xlu1 %6190, %v339_v5   ;;  %6192 = vset.pattern.permute.xlu0 %v6218_v0  ;;  %v4915_v5 = vld [vmem:[%s8882_s3 + $0x160] sm:$0xf]  ;;  %v5901_v17 = vld [vmem:[%s8882_s3 + $0x4c] sm:$0xf0]  ;;  %v6015_v56 = vld [vmem:[%s8882_s3 + $0x3e4] sm:$0xf]  ;;  %v4856_v58 = vor.u32 %v5919_v53, %v4853_v55 }
  0x23   : > { %519 = vperm.xlu0 %6192, %v338_v3   ;;  %375 = vperm.xlu2 %6191, %v340_v6   ;;  %v4787_v3 = vld [vmem:[%s8882_s3 + $0x60] sm:$0xf]  ;;  %v4772_v18 = vor.u32 %v5901_v17, %v4771_v16  ;;  %v5933_v19 = vld [vmem:[%s8882_s3 + $0x14c] sm:$0xf0]  ;;  %v5237_v57 = vld [vmem:[%s8882_s3 + $0x3f0] sm:$0xf0] }
  0x24   : > { %1763 = vmatpush.bf16.msra.mxu2 %v5060_v63  ;;  %1812 = vmatpush.bf16.msra.mxu3 %v5188_v2  ;;  %v5965_v21 = vld [vmem:[%s8882_s3 + $0x24c] sm:$0xf0]  ;;  %v5155_v24 = vld [vmem:[%s8882_s3 + $0x340] sm:$0xf]  ;;  %v5240_v59 = vor.u32 %v6015_v56, %v5237_v57  ;;  %v5951_v60 = vld [vmem:[%s8882_s3 + $0x1e4] sm:$0xf] }
  0x25   : > { %v5028_v23 = vor.u32 %v5965_v21, %v5027_v20  ;;  %v5997_v25 = vld [vmem:[%s8882_s3 + $0x34c] sm:$0xf0]  ;;  %v4755_v27 = vld [vmem:[%s8882_s3 + $0x20] sm:$0xf]  ;;  %v4981_v61 = vld [vmem:[%s8882_s3 + $0x1f0] sm:$0xf0] }
  0x26   : > { %v5156_v26 = vor.u32 %v5997_v25, %v5155_v24  ;;  %v5897_v28 = vld [vmem:[%s8882_s3 + $0x2c] sm:$0xf0]  ;;  %v5011_v32 = vld [vmem:[%s8882_s3 + $0x220] sm:$0xf]  ;;  %v4984_v62 = vor.u32 %v5951_v60, %v4981_v61  ;;  %v5947_v56 = vld [vmem:[%s8882_s3 + $0x1c4] sm:$0xf] }
  0x27   : > { %v5929_v31 = vld [vmem:[%s8882_s3 + $0x12c] sm:$0xf0]  ;;  %v4739_v38 = vld [vmem:[%s8882_s3] sm:$0xf]  ;;  %v4965_v57 = vld [vmem:[%s8882_s3 + $0x1d0] sm:$0xf0] }
  0x28   : > { %v5961_v33 = vld [vmem:[%s8882_s3 + $0x22c] sm:$0xf0]  ;;  %v4867_v40 = vld [vmem:[%s8882_s3 + $0x100] sm:$0xf]  ;;  %v4968_v61 = vor.u32 %v5947_v56, %v4965_v57 }
  0x29   : > { %v5012_v35 = vor.u32 %v5961_v33, %v5011_v32  ;;  %v5993_v36 = vld [vmem:[%s8882_s3 + $0x32c] sm:$0xf0]  ;;  %v4995_v43 = vld [vmem:[%s8882_s3 + $0x200] sm:$0xf] }
  0x2a   : > { %6193 = vset.pattern.permute.xlu1 %v6219_v1  ;;  %v5893_v39 = vld [vmem:[%s8882_s3 + $0xc] sm:$0xf0]  ;;  %v5123_v47 = vld [vmem:[%s8882_s3 + $0x300] sm:$0xf] }
  0x2b   : > { %380 = vperm.xlu1 %6193, %v341_v7   ;;  %531 = vperm.xlu0 %6192, %v341_v7   ;;  %v4788_v7 = vor.u32 %v5905_v4, %v4787_v3  ;;  %v4740_v41 = vor.u32 %v5893_v39, %v4739_v38  ;;  %v5925_v42 = vld [vmem:[%s8882_s3 + $0x10c] sm:$0xf0]  ;;  %v352_v50 = vld [vmem:[%s8880_s1] sm:$0xff] }
  0x2c   : > { %6194 = vset.pattern.permute.xlu2 %v6218_v0  ;;  %v5957_v44 = vld [vmem:[%s8882_s3 + $0x20c] sm:$0xf0]  ;;  %v4868_v45 = vor.u32 %v5925_v42, %v4867_v40  ;;  %v574_v63 = vperm.slane %v352_v50, 1  ;;  %v575_v2 = vperm.slane %v352_v50, 3  ;;  %v576_v3 = vperm.slane %v352_v50, 5 }
  0x2d   : > { %527 = vperm.xlu2 %6194, %v340_v6   ;;  %v5937_v6 = vld [vmem:[%s8882_s3 + $0x16c] sm:$0xf0]  ;;  %1666 = vmatpush.bf16.msra.mxu0 %v4788_v7  ;;  %v4996_v46 = vor.u32 %v5957_v44, %v4995_v43  ;;  %v577_v4 = vperm.slane %v352_v50, 7  ;;  %v436_v7 = vperm.slane %v352_v50, 4  ;;  %v5093_v42 = vld [vmem:[%s8882_s3 + $0x2d0] sm:$0xf0] }
  0x2e   : > { %v5989_v48 = vld [vmem:[%s8882_s3 + $0x30c] sm:$0xf0]  ;;  %v5915_v43 = vld [vmem:[%s8882_s3 + $0xc4] sm:$0xf] }
  0x2f   : > { %v5124_v49 = vor.u32 %v5989_v48, %v5123_v47  ;;  %v4837_v48 = vld [vmem:[%s8882_s3 + $0xd0] sm:$0xf0] }
  0x31   : > { %1667 = vmatpush.bf16.msra.mxu0 %v4772_v18 }
  0x33   : > { %385 = vperm.xlu1 %6193, %v342_v8   ;;  %535 = vperm.xlu0 %6192, %v342_v8   ;;  %v4916_v8 = vor.u32 %v5937_v6, %v4915_v5  ;;  %v434_v5 = vperm.slane %v352_v50, 0  ;;  %v435_v6 = vperm.slane %v352_v50, 2 }
  0x35   : > { %6195 = vset.pattern.permute.xlu2 %v6219_v1  ;;  %1715 = vmatpush.bf16.msra.mxu1 %v4916_v8  ;;  %v437_v8 = vperm.slane %v352_v50, 6  ;;  %v6555_v16 = vperm.slane %v434_v5, 0  ;;  %v6557_v17 = vperm.slane %v435_v6, 0  ;;  %v5221_v50 = vld [vmem:[%s8882_s3 + $0x3d0] sm:$0xf0] }
  0x36   : > { %390 = vperm.xlu2 %6195, %v343_v9  }
  0x37   : > { %v6561_v18 = vperm.slane %v437_v8, 0 }
  0x3b   : > { %6196 = vset.pattern.permute.xlu1 %v6218_v0  ;;  %6197 = vset.pattern.permute.xlu0 %v6219_v1 }
  0x3c   : > { %539 = vperm.xlu1 %6196, %v343_v9   ;;  %400 = vperm.xlu0 %6197, %v345_v10   ;;  %v5043_v9 = vld [vmem:[%s8882_s3 + $0x260] sm:$0xf] }
  0x3e   : > { %395 = vperm.xlu2 %6195, %v344_v11  }
  0x44   : > { %543 = vperm.xlu1 %6196, %v344_v11   ;;  %6201 = vset.pattern.permute.xlu0 %v6218_v0  ;;  %v5171_v11 = vld [vmem:[%s8882_s3 + $0x360] sm:$0xf] }
  0x45   : > { %551 = vperm.xlu0 %6201, %v346_v12  }
  0x46   : > { %6198 = vset.pattern.permute.xlu2 %v6218_v0 }
  0x47   : > { %547 = vperm.xlu2 %6198, %v345_v10   ;;  %v5969_v10 = vld [vmem:[%s8882_s3 + $0x26c] sm:$0xf0] }
  0x4c   : > { %6199 = vset.pattern.permute.xlu1 %v6219_v1 }
  0x4d   : > { %405 = vperm.xlu1 %6199, %v346_v12   ;;  %563 = vperm.xlu0 %6201, %v6312_v13   ;;  %v351_v12 = vld [vmem:[%s6289_s15 + $0x78] sm:$0xff] }
  0x4f   : > { %6200 = vset.pattern.permute.xlu2 %v6219_v1 }
  0x50   : > { %410 = vperm.xlu2 %6200, %v347_v14  }
  0x55   : > { %6202 = vset.pattern.permute.xlu1 %v6218_v0  ;;  %567 = vperm.xlu0 %6201, %v350_v29  }
  0x56   : > { %555 = vperm.xlu1 %6202, %v347_v14   ;;  %v6001_v14 = vld [vmem:[%s8882_s3 + $0x36c] sm:$0xf0] }
  0x57   : > { %v5172_v15 = vor.u32 %v6001_v14, %v5171_v11  ;;  %v6551_v14 = vperm.slane %v576_v3, 1 }
  0x58   : > { %415 = vperm.xlu2 %6200, %v348_v30  }
  0x59   : > { %1813 = vmatpush.bf16.msra.mxu3 %v5172_v15  ;;  %v6553_v15 = vperm.slane %v577_v4, 1 }
  0x5d   : > { %1814 = vmatpush.bf16.msra.mxu3 %v5156_v26 }
  0x5e   : > { %6203 = vset.pattern.permute.xlu1 %v6219_v1 }
  0x5f   : > { %420 = vperm.xlu1 %6203, %v6312_v13   ;;  %v5044_v13 = vor.u32 %v5969_v10, %v5043_v9 }
  0x60   : > { %6204 = vset.pattern.permute.xlu2 %v6218_v0 }
  0x61   : > { %559 = vperm.xlu2 %6204, %v348_v30   ;;  %1764 = vmatpush.bf16.msra.mxu2 %v5044_v13  ;;  %v4756_v30 = vor.u32 %v5897_v28, %v4755_v27  ;;  %v6549_v13 = vperm.slane %v575_v2, 1 }
  0x63   : > { %1668 = vmatpush.bf16.msra.mxu0 %v4756_v30 }
  0x65   : > { %1765 = vmatpush.bf16.msra.mxu2 %v5028_v23 }
  0x67   : > { %425 = vperm.xlu1 %6203, %v350_v29   ;;  %v4883_v29 = vld [vmem:[%s8882_s3 + $0x120] sm:$0xf]  ;;  %1669 = vmatpush.bf16.msra.mxu0 %v4740_v41  ;;  %v5979_v41 = vld [vmem:[%s8882_s3 + $0x2c4] sm:$0xf] }
  0x68   : > { %v4884_v34 = vor.u32 %v5929_v31, %v4883_v29 }
  0x69   : > { %6205 = vset.pattern.permute.xlu2 %v6219_v1  ;;  %v4899_v1 = vld [vmem:[%s8882_s3 + $0x140] sm:$0xf]  ;;  %1766 = vmatpush.bf16.msra.mxu2 %v5012_v35 }
  0x6a   : > { %430 = vperm.xlu2 %6205, %v351_v12   ;;  %v4900_v22 = vor.u32 %v5933_v19, %v4899_v1  ;;  %v6559_v1 = vperm.slane %v436_v7, 0  ;;  %v714_v19 = vld [vmem:[%s8881_s2] sm:$0xf] }
  0x6b   : > { %1858 = vmatpush.bf16.msrb.mxu0 %v4856_v58  ;;  %v6574_v28 = vperm.slane %v714_v19, 0  ;;  %v6576_v29 = vperm.slane %v714_v19, 1  ;;  %v6578_v30 = vperm.slane %v714_v19, 2  ;;  %v6580_v31 = vperm.slane %v714_v19, 3 }
  0x6c   : > { %1716 = vmatpush.bf16.msra.mxu1 %v4900_v22  ;;  %v5096_v58 = vor.u32 %v5979_v41, %v5093_v42 }
  0x6d   : > { %1767 = vmatpush.bf16.msra.mxu2 %v4996_v46  ;;  %v6545_v11 = vpop.permute.xlu2 %365 }
  0x6e   : > { %v454_v8 = vmul.f32 %v6555_v16, %v6545_v11 }
  0x6f   : > { %6206 = vset.pattern.permute.xlu1 %v6218_v0  ;;  %v5139_v0 = vld [vmem:[%s8882_s3 + $0x320] sm:$0xf] }
  0x70   : > { %571 = vperm.xlu1 %6206, %v351_v12   ;;  %v5140_v37 = vor.u32 %v5993_v36, %v5139_v0  ;;  %1717 = vmatpush.bf16.msra.mxu1 %v4884_v34  ;;  %v6547_v12 = vperm.slane %v574_v63, 1 }
  0x71   : > { %1956 = vmatpush.bf16.msrb.mxu2 %v5112_v54 }
  0x72   : > { %1815 = vmatpush.bf16.msra.mxu3 %v5140_v37 }
  0x74   : > { %1718 = vmatpush.bf16.msra.mxu1 %v4868_v45 }
  0x75   : > { %v371_v51 = vpop.permute.xlu2 %370  ;;  %1957 = vmatpush.bf16.msrb.mxu2 %v5096_v58 }
  0x76   : > { %1816 = vmatpush.bf16.msra.mxu3 %v5124_v49  ;;  %v6011_v49 = vld [vmem:[%s8882_s3 + $0x3c4] sm:$0xf]  ;;  %v458_v19 = vmul.f32 %v6555_v16, %v371_v51 }
  0x77   : > { %v5224_v60 = vor.u32 %v6011_v49, %v5221_v50 }
  0x78   : > { %1907 = vmatpush.bf16.msrb.mxu1 %v4984_v62 }
  0x7a   : > { %2005 = vmatpush.bf16.msrb.mxu3 %v5240_v59  ;;  %v4840_v59 = vor.u32 %v5915_v43, %v4837_v48 }
  0x7c   : > { %1859 = vmatpush.bf16.msrb.mxu0 %v4840_v59  ;;  %1908 = vmatpush.bf16.msrb.mxu1 %v4968_v61 }
  0x7e   : > { %2006 = vmatpush.bf16.msrb.mxu3 %v5224_v60 }
  0x84   : > { %v512_v9 = vpop.permute.xlu1 %511  ;;  %v356_v10 = vpop.permute.xlu0 %355 }
  0x85   : > { %v586_v20 = vmul.f32 %v6547_v12, %v512_v9  ;;  %v587_v21 = vmul.f32 %v6549_v13, %v512_v9  ;;  %v588_v22 = vmul.f32 %v6551_v14, %v512_v9  ;;  %v589_v23 = vmul.f32 %v6553_v15, %v512_v9 }
  0x86   : > { %v446_v24 = vmul.f32 %v6555_v16, %v356_v10  ;;  %v447_v25 = vmul.f32 %v6557_v17, %v356_v10  ;;  %v448_v26 = vmul.f32 %v6559_v1, %v356_v10  ;;  %v449_v27 = vmul.f32 %v6561_v18, %v356_v10 }
  0x87   : > { %v455_v9 = vmul.f32 %v6557_v17, %v6545_v11  ;;  %v456_v10 = vmul.f32 %v6559_v1, %v6545_v11 }
  0x88   : > { %v650_v44 = vadd.f32 %v586_v20, %v446_v24  ;;  %v651_v45 = vadd.f32 %v587_v21, %v447_v25  ;;  %v652_v46 = vadd.f32 %v588_v22, %v448_v26  ;;  %v653_v47 = vadd.f32 %v589_v23, %v449_v27 }
  0x89   : > { %v459_v26 = vmul.f32 %v6557_v17, %v371_v51 }
  0x8a   : > { %v724_v4 = vadd.f32 %v6574_v28, %v650_v44  ;;  %v725_v5 = vadd.f32 %v6576_v29, %v651_v45  ;;  %v726_v6 = vadd.f32 %v6578_v30, %v652_v46  ;;  %v727_v7 = vadd.f32 %v6580_v31, %v653_v47 }
  0x8b   : > { %v457_v46 = vmul.f32 %v6561_v18, %v6545_v11  ;;  %v461_v47 = vmul.f32 %v6561_v18, %v371_v51 }
  0x8c   : > { %v516_v32 = vpop.permute.xlu1 %515  ;;  %v361_v33 = vpop.permute.xlu0 %360  ;;  %v788_v27 = vmax.f32 %v724_v4, 0.0 }
  0x8d   : > { %v590_v34 = vmul.f32 %v6547_v12, %v516_v32  ;;  %v591_v35 = vmul.f32 %v6549_v13, %v516_v32  ;;  %v592_v0 = vmul.f32 %v6551_v14, %v516_v32  ;;  %v593_v36 = vmul.f32 %v6553_v15, %v516_v32 }
  0x8e   : > { %v450_v37 = vmul.f32 %v6555_v16, %v361_v33  ;;  %v451_v38 = vmul.f32 %v6557_v17, %v361_v33  ;;  %v452_v39 = vmul.f32 %v6559_v1, %v361_v33  ;;  %v453_v40 = vmul.f32 %v6561_v18, %v361_v33 }
  0x8f   : > { %v789_v32 = vmax.f32 %v725_v5, 0.0  ;;  %v790_v33 = vmax.f32 %v726_v6, 0.0 }
  0x90   : > { %v654_v52 = vadd.f32 %v590_v34, %v450_v37  ;;  %v655_v53 = vadd.f32 %v591_v35, %v451_v38  ;;  %v656_v54 = vadd.f32 %v592_v0, %v452_v39  ;;  %v657_v55 = vadd.f32 %v593_v36, %v453_v40  ;;  %v6634_v38 = vpop.permute.xlu2 %375 }
  0x91   : > { %v791_v36 = vmax.f32 %v727_v7, 0.0  ;;  %v460_v37 = vmul.f32 %v6559_v1, %v371_v51 }
  0x92   : > { %v728_v62 = vadd.f32 %v6574_v28, %v654_v52  ;;  %v729_v63 = vadd.f32 %v6576_v29, %v655_v53  ;;  %v730_v2 = vadd.f32 %v6578_v30, %v656_v54  ;;  %v731_v3 = vadd.f32 %v6580_v31, %v657_v55 }
  0x94   : > { %v524_v20 = vpop.permute.xlu1 %523  ;;  %v792_v22 = vmax.f32 %v728_v62, 0.0  ;;  %v793_v23 = vmax.f32 %v729_v63, 0.0  ;;  %v794_v24 = vmax.f32 %v730_v2, 0.0  ;;  %v795_v25 = vmax.f32 %v731_v3, 0.0  ;;  %v5975_v63 = vld [vmem:[%s8882_s3 + $0x2a4] sm:$0xf] }
  0x95   : > { %v520_v21 = vpop.permute.xlu0 %519  ;;  %v598_v34 = vmul.f32 %v6547_v12, %v524_v20  ;;  %v599_v35 = vmul.f32 %v6549_v13, %v524_v20  ;;  %v600_v39 = vmul.f32 %v6551_v14, %v524_v20  ;;  %v601_v48 = vmul.f32 %v6553_v15, %v524_v20  ;;  %v5077_v2 = vld [vmem:[%s8882_s3 + $0x2b0] sm:$0xf0] }
  0x96   : > { %v594_v0 = vmul.f32 %v6547_v12, %v520_v21  ;;  %v595_v40 = vmul.f32 %v6549_v13, %v520_v21  ;;  %v596_v41 = vmul.f32 %v6551_v14, %v520_v21  ;;  %v6639_v42 = vpack.c.bf16 %v792_v22, %v788_v27  ;;  %v5911_v22 = vld [vmem:[%s8882_s3 + $0xa4] sm:$0xf] }
  0x97   : > { %v6641_v43 = vpack.c.bf16 %v793_v23, %v789_v32  ;;  %v6643_v44 = vpack.c.bf16 %v794_v24, %v790_v33  ;;  %v6645_v45 = vpack.c.bf16 %v795_v25, %v791_v36  ;;  %v597_v49 = vmul.f32 %v6553_v15, %v520_v21  ;;  %v4821_v32 = vld [vmem:[%s8882_s3 + $0xb0] sm:$0xf0]  ;;  %v6007_v33 = vld [vmem:[%s8882_s3 + $0x3a4] sm:$0xf] }
  0x98   : > { %v662_v50 = vadd.f32 %v598_v34, %v458_v19  ;;  %v663_v52 = vadd.f32 %v599_v35, %v459_v26  ;;  %v658_v53 = vadd.f32 %v594_v0, %v454_v8  ;;  %1670 = vmatmul.bf16.vlgmr.msra.gmra.mxu0 %v6639_v42  ;;  %v664_v54 = vadd.f32 %v600_v39, %v460_v37  ;;  %v528_v3 = vpop.permute.xlu2 %527  ;;  %v5205_v34 = vld [vmem:[%s8882_s3 + $0x3b0] sm:$0xf0]  ;;  %v5943_v39 = vld [vmem:[%s8882_s3 + $0x1a4] sm:$0xf] }
  0x99   : > { %1719 = vmatmul.bf16.vlgmr.msra.gmra.mxu1 %v6641_v43  ;;  %v659_v55 = vadd.f32 %v595_v40, %v455_v9  ;;  %v660_v56 = vadd.f32 %v596_v41, %v456_v10  ;;  %1768 = vmatmul.bf16.vlgmr.msra.gmra.mxu2 %v6643_v44  ;;  %v665_v11 = vadd.f32 %v601_v48, %v461_v47  ;;  %v4949_v40 = vld [vmem:[%s8882_s3 + $0x1b0] sm:$0xf0] }
  0x9a   : > { %1817 = vmatmul.bf16.vlgmr.msra.gmra.mxu3 %v6645_v45  ;;  %v661_v51 = vadd.f32 %v597_v49, %v457_v46  ;;  %v736_v57 = vadd.f32 %v6574_v28, %v662_v50  ;;  %v732_v58 = vadd.f32 %v6574_v28, %v658_v53  ;;  %v737_v59 = vadd.f32 %v6576_v29, %v663_v52 }
  0x9b   : > { %v738_v60 = vadd.f32 %v6578_v30, %v664_v54  ;;  %v733_v61 = vadd.f32 %v6576_v29, %v659_v55  ;;  %v734_v62 = vadd.f32 %v6578_v30, %v660_v56  ;;  %v739_v4 = vadd.f32 %v6580_v31, %v665_v11 }
  0x9c   : > { %v735_v5 = vadd.f32 %v6580_v31, %v661_v51  ;;  %v796_v7 = vmax.f32 %v732_v58, 0.0  ;;  %v800_v8 = vmax.f32 %v736_v57, 0.0  ;;  %v5080_v9 = vor.u32 %v5975_v63, %v5077_v2 }
  0x9d   : > { %v381_v6 = vpop.permute.xlu1 %380  ;;  %v797_v10 = vmax.f32 %v733_v61, 0.0  ;;  %v801_v19 = vmax.f32 %v737_v59, 0.0  ;;  %v798_v20 = vmax.f32 %v734_v62, 0.0  ;;  %v802_v21 = vmax.f32 %v738_v60, 0.0  ;;  %v532_v27 = vpop.permute.xlu0 %531 }
  0x9e   : > { %v462_v23 = vmul.f32 %v6555_v16, %v6634_v38  ;;  %v463_v24 = vmul.f32 %v6557_v17, %v6634_v38  ;;  %v464_v25 = vmul.f32 %v6559_v1, %v6634_v38  ;;  %v602_v26 = vmul.f32 %v6547_v12, %v528_v3  ;;  %1958 = vmatpush.bf16.msrb.mxu2 %v5080_v9 }
  0x9f   : > { %v603_v35 = vmul.f32 %v6549_v13, %v528_v3  ;;  %v604_v0 = vmul.f32 %v6551_v14, %v528_v3  ;;  %v799_v36 = vmax.f32 %v735_v5, 0.0  ;;  %v803_v37 = vmax.f32 %v739_v4, 0.0 }
  0xa0   : > { %v466_v41 = vmul.f32 %v6555_v16, %v381_v6  ;;  %v467_v46 = vmul.f32 %v6557_v17, %v381_v6  ;;  %v468_v47 = vmul.f32 %v6559_v1, %v381_v6  ;;  %v469_v48 = vmul.f32 %v6561_v18, %v381_v6 }
  0xa1   : > { %v606_v49 = vmul.f32 %v6547_v12, %v532_v27  ;;  %v607_v50 = vmul.f32 %v6549_v13, %v532_v27  ;;  %v4824_v52 = vor.u32 %v5911_v22, %v4821_v32  ;;  %v5208_v53 = vor.u32 %v6007_v33, %v5205_v34 }
  0xa2   : > { %v608_v54 = vmul.f32 %v6551_v14, %v532_v27  ;;  %v6704_v55 = vpack.c.bf16 %v800_v8, %v796_v7  ;;  %v6706_v56 = vpack.c.bf16 %v801_v19, %v797_v10  ;;  %v4952_v11 = vor.u32 %v5943_v39, %v4949_v40  ;;  %v391_v7 = vpop.permute.xlu2 %390  ;;  %v5971_v10 = vld [vmem:[%s8882_s3 + $0x284] sm:$0xf]  ;;  %v5061_v19 = vld [vmem:[%s8882_s3 + $0x290] sm:$0xf0] }
  0xa3   : > { %v609_v51 = vmul.f32 %v6553_v15, %v532_v27  ;;  %v6709_v57 = vpack.c.bf16 %v802_v21, %v798_v20  ;;  %v6711_v58 = vpack.c.bf16 %v803_v37, %v799_v36  ;;  %1860 = vmatpush.bf16.msrb.mxu0 %v4824_v52  ;;  %2007 = vmatpush.bf16.msrb.mxu3 %v5208_v53  ;;  %v5907_v20 = vld [vmem:[%s8882_s3 + $0x84] sm:$0xf] }
  0xa4   : > { %v465_v59 = vmul.f32 %v6561_v18, %v6634_v38  ;;  %v605_v60 = vmul.f32 %v6553_v15, %v528_v3  ;;  %v666_v61 = vadd.f32 %v602_v26, %v462_v23  ;;  %v667_v62 = vadd.f32 %v603_v35, %v463_v24  ;;  %1909 = vmatpush.bf16.msrb.mxu1 %v4952_v11  ;;  %v4805_v23 = vld [vmem:[%s8882_s3 + $0x90] sm:$0xf0]  ;;  %v6003_v24 = vld [vmem:[%s8882_s3 + $0x384] sm:$0xf] }
  0xa5   : > { %v6718_v63 = vpop.permute.xlu1 %385  ;;  %v670_v2 = vadd.f32 %v606_v49, %v466_v41  ;;  %v671_v4 = vadd.f32 %v607_v50, %v467_v46  ;;  %v668_v5 = vadd.f32 %v604_v0, %v464_v25  ;;  %v672_v6 = vadd.f32 %v608_v54, %v468_v47  ;;  %v5189_v25 = vld [vmem:[%s8882_s3 + $0x390] sm:$0xf0]  ;;  %v536_v40 = vpop.permute.xlu0 %535  ;;  %v5939_v49 = vld [vmem:[%s8882_s3 + $0x184] sm:$0xf] }
  0xa6   : > { %v673_v38 = vadd.f32 %v609_v51, %v469_v48  ;;  %v669_v3 = vadd.f32 %v605_v60, %v465_v59  ;;  %v740_v8 = vadd.f32 %v6574_v28, %v666_v61  ;;  %v741_v9 = vadd.f32 %v6576_v29, %v667_v62  ;;  %v4933_v50 = vld [vmem:[%s8882_s3 + $0x190] sm:$0xf0] }
  0xa7   : > { %v744_v21 = vadd.f32 %v6574_v28, %v670_v2  ;;  %v745_v22 = vadd.f32 %v6576_v29, %v671_v4  ;;  %v742_v26 = vadd.f32 %v6578_v30, %v668_v5  ;;  %v746_v27 = vadd.f32 %v6578_v30, %v672_v6 }
  0xa8   : > { %1675 = vmatmul.bf16.gmra.mxu0 %v6704_v55  ;;  %v747_v32 = vadd.f32 %v6580_v31, %v673_v38  ;;  %v743_v33 = vadd.f32 %v6580_v31, %v669_v3  ;;  %v474_v34 = vmul.f32 %v6555_v16, %v391_v7  ;;  %v804_v35 = vmax.f32 %v740_v8, 0.0 }
  0xa9   : > { %1724 = vmatmul.bf16.gmra.mxu1 %v6706_v56  ;;  %1773 = vmatmul.bf16.gmra.mxu2 %v6709_v57  ;;  %v805_v0 = vmax.f32 %v741_v9, 0.0  ;;  %v5064_v36 = vor.u32 %v5971_v10, %v5061_v19  ;;  %v4808_v37 = vor.u32 %v5907_v20, %v4805_v23  ;;  %v5192_v39 = vor.u32 %v6003_v24, %v5189_v25 }
  0xaa   : > { %1822 = vmatmul.bf16.gmra.mxu3 %v6711_v58  ;;  %v475_v41 = vmul.f32 %v6557_v17, %v391_v7  ;;  %v476_v46 = vmul.f32 %v6559_v1, %v391_v7  ;;  %v808_v47 = vmax.f32 %v744_v21, 0.0  ;;  %v809_v48 = vmax.f32 %v745_v22, 0.0  ;;  %v396_v6 = vpop.permute.xlu2 %395 }
  0xab   : > { %v477_v52 = vmul.f32 %v6561_v18, %v391_v7  ;;  %v806_v54 = vmax.f32 %v742_v26, 0.0  ;;  %v810_v11 = vmax.f32 %v746_v27, 0.0  ;;  %v811_v51 = vmax.f32 %v747_v32, 0.0  ;;  %1959 = vmatpush.bf16.msrb.mxu2 %v5064_v36  ;;  %1861 = vmatpush.bf16.msrb.mxu0 %v4808_v37  ;;  %v5045_v36 = vld [vmem:[%s8882_s3 + $0x270] sm:$0xf0] }
  0xac   : > { %v470_v59 = vmul.f32 %v6555_v16, %v6718_v63  ;;  %v471_v60 = vmul.f32 %v6557_v17, %v6718_v63  ;;  %v472_v61 = vmul.f32 %v6559_v1, %v6718_v63  ;;  %v807_v62 = vmax.f32 %v743_v33, 0.0  ;;  %2008 = vmatpush.bf16.msrb.mxu3 %v5192_v39  ;;  %v5903_v37 = vld [vmem:[%s8882_s3 + $0x64] sm:$0xf] }
  0xad   : > { %v610_v2 = vmul.f32 %v6547_v12, %v536_v40  ;;  %v611_v4 = vmul.f32 %v6549_v13, %v536_v40  ;;  %v612_v5 = vmul.f32 %v6551_v14, %v536_v40  ;;  %v4936_v38 = vor.u32 %v5939_v49, %v4933_v50  ;;  %v5999_v39 = vld [vmem:[%s8882_s3 + $0x364] sm:$0xf]  ;;  %v4917_v50 = vld [vmem:[%s8882_s3 + $0x170] sm:$0xf0] }
  0xae   : > { %v540_v53 = vpop.permute.xlu1 %539  ;;  %v6769_v8 = vpack.c.bf16 %v808_v47, %v804_v35  ;;  %v6771_v9 = vpack.c.bf16 %v809_v48, %v805_v0  ;;  %v6775_v20 = vpack.c.bf16 %v810_v11, %v806_v54  ;;  %v6777_v21 = vpack.c.bf16 %v811_v51, %v807_v62  ;;  %v5935_v49 = vld [vmem:[%s8882_s3 + $0x164] sm:$0xf] }
  0xaf   : > { %v614_v7 = vmul.f32 %v6547_v12, %v540_v53  ;;  %v615_v3 = vmul.f32 %v6549_v13, %v540_v53  ;;  %v616_v10 = vmul.f32 %v6551_v14, %v540_v53  ;;  %v617_v19 = vmul.f32 %v6553_v15, %v540_v53  ;;  %1910 = vmatpush.bf16.msrb.mxu1 %v4936_v38 }
  0xb0   : > { %v473_v22 = vmul.f32 %v6561_v18, %v6718_v63  ;;  %v613_v23 = vmul.f32 %v6553_v15, %v536_v40  ;;  %v674_v24 = vadd.f32 %v610_v2, %v470_v59  ;;  %v675_v27 = vadd.f32 %v611_v4, %v471_v60  ;;  %v5967_v63 = vld [vmem:[%s8882_s3 + $0x264] sm:$0xf]  ;;  %v5173_v40 = vld [vmem:[%s8882_s3 + $0x370] sm:$0xf0] }
  0xb1   : > { %v678_v25 = vadd.f32 %v614_v7, %v474_v34  ;;  %v679_v26 = vadd.f32 %v615_v3, %v475_v41  ;;  %v676_v32 = vadd.f32 %v612_v5, %v472_v61  ;;  %v680_v33 = vadd.f32 %v616_v10, %v476_v46  ;;  %v4789_v34 = vld [vmem:[%s8882_s3 + $0x70] sm:$0xf0] }
  0xb2   : > { %v681_v35 = vadd.f32 %v617_v19, %v477_v52  ;;  %v677_v0 = vadd.f32 %v613_v23, %v473_v22  ;;  %v748_v41 = vadd.f32 %v6574_v28, %v674_v24  ;;  %v478_v48 = vmul.f32 %v6555_v16, %v396_v6  ;;  %v548_v51 = vpop.permute.xlu2 %547  ;;  %v401_v19 = vpop.permute.xlu0 %400 }
  0xb3   : > { %v752_v46 = vadd.f32 %v6574_v28, %v678_v25  ;;  %v753_v47 = vadd.f32 %v6576_v29, %v679_v26  ;;  %v749_v52 = vadd.f32 %v6576_v29, %v675_v27  ;;  %v750_v53 = vadd.f32 %v6578_v30, %v676_v32 }
  0xb4   : > { %v754_v54 = vadd.f32 %v6578_v30, %v680_v33  ;;  %v755_v11 = vadd.f32 %v6580_v31, %v681_v35  ;;  %v751_v59 = vadd.f32 %v6580_v31, %v677_v0  ;;  %v5048_v60 = vor.u32 %v5967_v63, %v5045_v36 }
  0xb5   : > { %v4792_v61 = vor.u32 %v5903_v37, %v4789_v34  ;;  %v5176_v62 = vor.u32 %v5999_v39, %v5173_v40  ;;  %v479_v2 = vmul.f32 %v6557_v17, %v396_v6  ;;  %v480_v4 = vmul.f32 %v6559_v1, %v396_v6 }
  0xb6   : > { %v481_v5 = vmul.f32 %v6561_v18, %v396_v6  ;;  %v544_v38 = vpop.permute.xlu1 %543  ;;  %v4920_v7 = vor.u32 %v5935_v49, %v4917_v50  ;;  %v622_v3 = vmul.f32 %v6547_v12, %v548_v51  ;;  %v623_v10 = vmul.f32 %v6549_v13, %v548_v51  ;;  %1960 = vmatpush.bf16.msrb.mxu2 %v5048_v60 }
  0xb7   : > { %v816_v22 = vmax.f32 %v752_v46, 0.0  ;;  %v817_v23 = vmax.f32 %v753_v47, 0.0  ;;  %1862 = vmatpush.bf16.msrb.mxu0 %v4792_v61  ;;  %v624_v24 = vmul.f32 %v6551_v14, %v548_v51  ;;  %v625_v25 = vmul.f32 %v6553_v15, %v548_v51  ;;  %2009 = vmatpush.bf16.msrb.mxu3 %v5176_v62  ;;  %v5899_v51 = vld [vmem:[%s8882_s3 + $0x44] sm:$0xf] }
  0xb8   : > { %1680 = vmatmul.bf16.gmra.mxu0 %v6769_v8  ;;  %v818_v26 = vmax.f32 %v754_v54, 0.0  ;;  %v819_v27 = vmax.f32 %v755_v11, 0.0  ;;  %1911 = vmatpush.bf16.msrb.mxu1 %v4920_v7  ;;  %v812_v6 = vmax.f32 %v748_v41, 0.0  ;;  %v813_v32 = vmax.f32 %v749_v52, 0.0  ;;  %v5963_v54 = vld [vmem:[%s8882_s3 + $0x244] sm:$0xf] }
  0xb9   : > { %1729 = vmatmul.bf16.gmra.mxu1 %v6771_v9  ;;  %1778 = vmatmul.bf16.gmra.mxu2 %v6775_v20  ;;  %v814_v33 = vmax.f32 %v750_v53, 0.0  ;;  %v815_v35 = vmax.f32 %v751_v59, 0.0  ;;  %v482_v0 = vmul.f32 %v6555_v16, %v401_v19  ;;  %v483_v63 = vmul.f32 %v6557_v17, %v401_v19  ;;  %v5029_v11 = vld [vmem:[%s8882_s3 + $0x250] sm:$0xf0]  ;;  %v5995_v7 = vld [vmem:[%s8882_s3 + $0x344] sm:$0xf] }
  0xba   : > { %1827 = vmatmul.bf16.gmra.mxu3 %v6777_v21  ;;  %v484_v36 = vmul.f32 %v6559_v1, %v401_v19  ;;  %v485_v37 = vmul.f32 %v6561_v18, %v401_v19  ;;  %v618_v34 = vmul.f32 %v6547_v12, %v544_v38  ;;  %v619_v39 = vmul.f32 %v6549_v13, %v544_v38 }
  0xbb   : > { %v6832_v40 = vpack.c.bf16 %v816_v22, %v812_v6  ;;  %v6834_v46 = vpack.c.bf16 %v817_v23, %v813_v32  ;;  %v620_v41 = vmul.f32 %v6551_v14, %v544_v38  ;;  %v621_v47 = vmul.f32 %v6553_v15, %v544_v38  ;;  %v4773_v38 = vld [vmem:[%s8882_s3 + $0x50] sm:$0xf0]  ;;  %v411_v6 = vpop.permute.xlu2 %410 }
  0xbc   : > { %v6838_v49 = vpack.c.bf16 %v818_v26, %v814_v33  ;;  %v6840_v50 = vpack.c.bf16 %v819_v27, %v815_v35  ;;  %v686_v52 = vadd.f32 %v622_v3, %v482_v0  ;;  %v687_v53 = vadd.f32 %v623_v10, %v483_v63 }
  0xbd   : > { %v682_v59 = vadd.f32 %v618_v34, %v478_v48  ;;  %v683_v60 = vadd.f32 %v619_v39, %v479_v2  ;;  %v688_v61 = vadd.f32 %v624_v24, %v484_v36  ;;  %v689_v62 = vadd.f32 %v625_v25, %v485_v37  ;;  %v5157_v48 = vld [vmem:[%s8882_s3 + $0x350] sm:$0xf0]  ;;  %v5931_v2 = vld [vmem:[%s8882_s3 + $0x144] sm:$0xf] }
  0xbe   : > { %v684_v3 = vadd.f32 %v620_v41, %v480_v4  ;;  %v685_v10 = vadd.f32 %v621_v47, %v481_v5  ;;  %v5032_v22 = vor.u32 %v5963_v54, %v5029_v11  ;;  %v4776_v23 = vor.u32 %v5899_v51, %v4773_v38  ;;  %v4901_v25 = vld [vmem:[%s8882_s3 + $0x150] sm:$0xf0]  ;;  %v552_v54 = vpop.permute.xlu0 %551 }
  0xbf   : > { %v406_v19 = vpop.permute.xlu1 %405  ;;  %v5160_v24 = vor.u32 %v5995_v7, %v5157_v48  ;;  %v760_v26 = vadd.f32 %v6574_v28, %v686_v52  ;;  %v761_v4 = vadd.f32 %v6576_v29, %v687_v53  ;;  %v756_v5 = vadd.f32 %v6574_v28, %v682_v59 }
  0xc0   : > { %1961 = vmatpush.bf16.msrb.mxu2 %v5032_v22  ;;  %v757_v27 = vadd.f32 %v6576_v29, %v683_v60  ;;  %1863 = vmatpush.bf16.msrb.mxu0 %v4776_v23  ;;  %v4904_v32 = vor.u32 %v5931_v2, %v4901_v25  ;;  %v758_v33 = vadd.f32 %v6578_v30, %v684_v3 }
  0xc1   : > { %2010 = vmatpush.bf16.msrb.mxu3 %v5160_v24  ;;  %v759_v35 = vadd.f32 %v6580_v31, %v685_v10  ;;  %v762_v0 = vadd.f32 %v6578_v30, %v688_v61  ;;  %v763_v63 = vadd.f32 %v6580_v31, %v689_v62  ;;  %v490_v36 = vmul.f32 %v6555_v16, %v411_v6 }
  0xc2   : > { %1912 = vmatpush.bf16.msrb.mxu1 %v4904_v32  ;;  %v491_v37 = vmul.f32 %v6557_v17, %v411_v6  ;;  %v492_v34 = vmul.f32 %v6559_v1, %v411_v6  ;;  %v493_v39 = vmul.f32 %v6561_v18, %v411_v6  ;;  %v820_v41 = vmax.f32 %v756_v5, 0.0 }
  0xc3   : > { %v824_v47 = vmax.f32 %v760_v26, 0.0  ;;  %v821_v52 = vmax.f32 %v757_v27, 0.0  ;;  %v825_v53 = vmax.f32 %v761_v4, 0.0  ;;  %v822_v11 = vmax.f32 %v758_v33, 0.0  ;;  %v416_v32 = vpop.permute.xlu2 %415 }
  0xc4   : > { %v826_v51 = vmax.f32 %v762_v0, 0.0  ;;  %v823_v59 = vmax.f32 %v759_v35, 0.0  ;;  %v827_v60 = vmax.f32 %v763_v63, 0.0  ;;  %v626_v61 = vmul.f32 %v6547_v12, %v552_v54  ;;  %v5959_v35 = vld [vmem:[%s8882_s3 + $0x224] sm:$0xf] }
  0xc5   : > { %v627_v62 = vmul.f32 %v6549_v13, %v552_v54  ;;  %v628_v38 = vmul.f32 %v6551_v14, %v552_v54  ;;  %v629_v7 = vmul.f32 %v6553_v15, %v552_v54  ;;  %v486_v3 = vmul.f32 %v6555_v16, %v406_v19  ;;  %v5013_v0 = vld [vmem:[%s8882_s3 + $0x230] sm:$0xf0]  ;;  %v5895_v63 = vld [vmem:[%s8882_s3 + $0x24] sm:$0xf] }
  0xc6   : > { %v487_v10 = vmul.f32 %v6557_v17, %v406_v19  ;;  %v488_v22 = vmul.f32 %v6559_v1, %v406_v19  ;;  %v489_v23 = vmul.f32 %v6561_v18, %v406_v19  ;;  %v6892_v25 = vpack.c.bf16 %v824_v47, %v820_v41  ;;  %v4757_v54 = vld [vmem:[%s8882_s3 + $0x30] sm:$0xf0] }
  0xc7   : > { %v6894_v26 = vpack.c.bf16 %v825_v53, %v821_v52  ;;  %v6898_v27 = vpack.c.bf16 %v826_v51, %v822_v11  ;;  %v6900_v6 = vpack.c.bf16 %v827_v60, %v823_v59  ;;  %v690_v19 = vadd.f32 %v626_v61, %v486_v3  ;;  %v5991_v11 = vld [vmem:[%s8882_s3 + $0x324] sm:$0xf]  ;;  %v5141_v51 = vld [vmem:[%s8882_s3 + $0x330] sm:$0xf0] }
  0xc8   : > { %1685 = vmatmul.bf16.gmra.mxu0 %v6832_v40  ;;  %v556_v48 = vpop.permute.xlu1 %555  ;;  %v691_v33 = vadd.f32 %v627_v62, %v487_v10  ;;  %v692_v52 = vadd.f32 %v628_v38, %v488_v22  ;;  %v5016_v53 = vor.u32 %v5959_v35, %v5013_v0  ;;  %v693_v61 = vadd.f32 %v629_v7, %v489_v23  ;;  %v4885_v38 = vld [vmem:[%s8882_s3 + $0x130] sm:$0xf0] }
  0xc9   : > { %1734 = vmatmul.bf16.gmra.mxu1 %v6834_v46  ;;  %1783 = vmatmul.bf16.gmra.mxu2 %v6838_v49  ;;  %v630_v2 = vmul.f32 %v6547_v12, %v556_v48  ;;  %v631_v24 = vmul.f32 %v6549_v13, %v556_v48  ;;  %v632_v4 = vmul.f32 %v6551_v14, %v556_v48 }
  0xca   : > { %1832 = vmatmul.bf16.gmra.mxu3 %v6840_v50  ;;  %v633_v5 = vmul.f32 %v6553_v15, %v556_v48  ;;  %8893 = vst [vmem:[#allocation2_spill] sm:$0xff] %v6900_v6  ;;  %v4760_v62 = vor.u32 %v5895_v63, %v4757_v54  ;;  %1962 = vmatpush.bf16.msrb.mxu2 %v5016_v53  ;;  %v564_v53 = vpop.permute.xlu0 %563 }
  0xcb   : > { %v694_v41 = vadd.f32 %v630_v2, %v490_v36  ;;  %v695_v47 = vadd.f32 %v631_v24, %v491_v37  ;;  %v696_v59 = vadd.f32 %v632_v4, %v492_v34  ;;  %v5927_v36 = vld [vmem:[%s8882_s3 + $0x124] sm:$0xf]  ;;  %v5144_v37 = vor.u32 %v5991_v11, %v5141_v51 }
  0xcc   : > { %v697_v60 = vadd.f32 %v633_v5, %v493_v39  ;;  %1864 = vmatpush.bf16.msrb.mxu0 %v4760_v62  ;;  %v4888_v3 = vor.u32 %v5927_v36, %v4885_v38  ;;  %v764_v34 = vadd.f32 %v6574_v28, %v690_v19  ;;  %v765_v39 = vadd.f32 %v6576_v29, %v691_v33  ;;  %v560_v33 = vpop.permute.xlu2 %559 }
  0xcd   : > { %v768_v10 = vadd.f32 %v6574_v28, %v694_v41  ;;  %v769_v22 = vadd.f32 %v6576_v29, %v695_v47  ;;  %2011 = vmatpush.bf16.msrb.mxu3 %v5144_v37  ;;  %v770_v7 = vadd.f32 %v6578_v30, %v696_v59  ;;  %v766_v48 = vadd.f32 %v6578_v30, %v692_v52 }
  0xce   : > { %v771_v23 = vadd.f32 %v6580_v31, %v697_v60  ;;  %v767_v2 = vadd.f32 %v6580_v31, %v693_v61  ;;  %1913 = vmatpush.bf16.msrb.mxu1 %v4888_v3  ;;  %v494_v4 = vmul.f32 %v6555_v16, %v416_v32  ;;  %v495_v5 = vmul.f32 %v6557_v17, %v416_v32 }
  0xcf   : > { %v496_v35 = vmul.f32 %v6559_v1, %v416_v32  ;;  %v497_v19 = vmul.f32 %v6561_v18, %v416_v32  ;;  %v828_v0 = vmax.f32 %v764_v34, 0.0  ;;  %v832_v63 = vmax.f32 %v768_v10, 0.0 }
  0xd0   : > { %v829_v41 = vmax.f32 %v765_v39, 0.0  ;;  %v833_v47 = vmax.f32 %v769_v22, 0.0  ;;  %v830_v54 = vmax.f32 %v766_v48, 0.0  ;;  %v834_v52 = vmax.f32 %v770_v7, 0.0 }
  0xd1   : > { %v421_v24 = vpop.permute.xlu1 %420  ;;  %v831_v11 = vmax.f32 %v767_v2, 0.0  ;;  %v835_v51 = vmax.f32 %v771_v23, 0.0  ;;  %v638_v59 = vmul.f32 %v6547_v12, %v564_v53  ;;  %v639_v60 = vmul.f32 %v6549_v13, %v564_v53 }
  0xd2   : > { %v640_v61 = vmul.f32 %v6551_v14, %v564_v53  ;;  %v641_v62 = vmul.f32 %v6553_v15, %v564_v53  ;;  %v634_v32 = vmul.f32 %v6547_v12, %v560_v33  ;;  %v635_v36 = vmul.f32 %v6549_v13, %v560_v33 }
  0xd3   : > { %v636_v37 = vmul.f32 %v6551_v14, %v560_v33  ;;  %v637_v38 = vmul.f32 %v6553_v15, %v560_v33  ;;  %v498_v3 = vmul.f32 %v6555_v16, %v421_v24  ;;  %v499_v10 = vmul.f32 %v6557_v17, %v421_v24 }
  0xd4   : > { %v6952_v22 = vpack.c.bf16 %v832_v63, %v828_v0  ;;  %v6954_v34 = vpack.c.bf16 %v833_v47, %v829_v41  ;;  %v500_v39 = vmul.f32 %v6559_v1, %v421_v24  ;;  %v501_v7 = vmul.f32 %v6561_v18, %v421_v24  ;;  %v5955_v24 = vld [vmem:[%s8882_s3 + $0x204] sm:$0xf]  ;;  %v4997_v0 = vld [vmem:[%s8882_s3 + $0x210] sm:$0xf0] }
  0xd5   : > { %v6958_v23 = vpack.c.bf16 %v834_v52, %v830_v54  ;;  %v6960_v48 = vpack.c.bf16 %v835_v51, %v831_v11  ;;  %v698_v2 = vadd.f32 %v634_v32, %v494_v4  ;;  %v699_v33 = vadd.f32 %v635_v36, %v495_v5  ;;  %v5891_v4 = vld [vmem:[%s8882_s3 + $0x4] sm:$0xf]  ;;  %v4741_v47 = vld [vmem:[%s8882_s3 + $0x10] sm:$0xf0] }
  0xd6   : > { %v700_v53 = vadd.f32 %v636_v37, %v496_v35  ;;  %v702_v5 = vadd.f32 %v638_v59, %v498_v3  ;;  %v703_v35 = vadd.f32 %v639_v60, %v499_v10  ;;  %v701_v63 = vadd.f32 %v637_v38, %v497_v19  ;;  %v5987_v54 = vld [vmem:[%s8882_s3 + $0x304] sm:$0xf]  ;;  %v5125_v52 = vld [vmem:[%s8882_s3 + $0x310] sm:$0xf0] }
  0xd7   : > { %v5000_v41 = vor.u32 %v5955_v24, %v4997_v0  ;;  %v704_v11 = vadd.f32 %v640_v61, %v500_v39  ;;  %v705_v51 = vadd.f32 %v641_v62, %v501_v7  ;;  %v4744_v32 = vor.u32 %v5891_v4, %v4741_v47  ;;  %v5923_v19 = vld [vmem:[%s8882_s3 + $0x104] sm:$0xf]  ;;  %v4869_v59 = vld [vmem:[%s8882_s3 + $0x110] sm:$0xf0]  ;;  %v568_v24 = vpop.permute.xlu0 %567  ;;  %v431_v0 = vpop.permute.xlu2 %430 }
  0xd8   : > { %1690 = vmatmul.bf16.gmra.mxu0 %v6892_v25  ;;  %v5128_v36 = vor.u32 %v5987_v54, %v5125_v52  ;;  %v4872_v60 = vor.u32 %v5923_v19, %v4869_v59  ;;  %v776_v37 = vadd.f32 %v6574_v28, %v702_v5  ;;  %v777_v38 = vadd.f32 %v6576_v29, %v703_v35 }
  0xd9   : > { %1739 = vmatmul.bf16.gmra.mxu1 %v6894_v26  ;;  %1788 = vmatmul.bf16.gmra.mxu2 %v6898_v27  ;;  %v772_v61 = vadd.f32 %v6574_v28, %v698_v2  ;;  %v773_v62 = vadd.f32 %v6576_v29, %v699_v33  ;;  %v778_v3 = vadd.f32 %v6578_v30, %v704_v11 }
  0xda   : > { %1837 = vmatmul.bf16.gmra.mxu3 %v6900_v6  ;;  %v6964_v6 = vpop.permute.xlu1 %425  ;;  %1963 = vmatpush.bf16.msrb.mxu2 %v5000_v41  ;;  %v779_v10 = vadd.f32 %v6580_v31, %v705_v51  ;;  %v774_v39 = vadd.f32 %v6578_v30, %v700_v53  ;;  %v775_v7 = vadd.f32 %v6580_v31, %v701_v63  ;;  %v840_v41 = vmax.f32 %v776_v37, 0.0 }
  0xdb   : > { %1865 = vmatpush.bf16.msrb.mxu0 %v4744_v32  ;;  %2012 = vmatpush.bf16.msrb.mxu3 %v5128_v36  ;;  %v836_v4 = vmax.f32 %v772_v61, 0.0  ;;  %v837_v5 = vmax.f32 %v773_v62, 0.0  ;;  %v841_v47 = vmax.f32 %v777_v38, 0.0  ;;  %v842_v2 = vmax.f32 %v778_v3, 0.0 }
  0xdc   : > { %1914 = vmatpush.bf16.msrb.mxu1 %v4872_v60  ;;  %v838_v54 = vmax.f32 %v774_v39, 0.0  ;;  %v839_v52 = vmax.f32 %v775_v7, 0.0  ;;  %v843_v33 = vmax.f32 %v779_v10, 0.0  ;;  %v642_v32 = vmul.f32 %v6547_v12, %v568_v24 }
  0xdd   : > { %v643_v11 = vmul.f32 %v6549_v13, %v568_v24  ;;  %v506_v51 = vmul.f32 %v6555_v16, %v431_v0  ;;  %v507_v53 = vmul.f32 %v6557_v17, %v431_v0  ;;  %v508_v63 = vmul.f32 %v6559_v1, %v431_v0 }
  0xde   : > { %v509_v36 = vmul.f32 %v6561_v18, %v431_v0  ;;  %v7008_v60 = vpack.c.bf16 %v840_v41, %v836_v4  ;;  %v7010_v37 = vpack.c.bf16 %v841_v47, %v837_v5  ;;  %v7014_v62 = vpack.c.bf16 %v842_v2, %v838_v54  ;;  %v6018_v4 = vld [vmem:[%s8882_s3 + $0x3f4] sm:$0xf0] }
  0xdf   : > { %v7016_v3 = vpack.c.bf16 %v843_v33, %v839_v52  ;;  %v502_v10 = vmul.f32 %v6555_v16, %v6964_v6  ;;  %v504_v39 = vmul.f32 %v6559_v1, %v6964_v6  ;;  %v505_v7 = vmul.f32 %v6561_v18, %v6964_v6  ;;  %v5986_v16 = vld [vmem:[%s8882_s3 + $0x2f4] sm:$0xf0] }
  0xe0   : > { %v645_v0 = vmul.f32 %v6553_v15, %v568_v24 }
  0xe1   : > { %v706_v54 = vadd.f32 %v642_v32, %v502_v10 }
  0xe2   : > { %v572_v35 = vpop.permute.xlu1 %571  ;;  %v709_v33 = vadd.f32 %v645_v0, %v505_v7 }
  0xe3   : > { %v646_v19 = vmul.f32 %v6547_v12, %v572_v35  ;;  %v647_v59 = vmul.f32 %v6549_v13, %v572_v35  ;;  %v648_v38 = vmul.f32 %v6551_v14, %v572_v35  ;;  %v649_v61 = vmul.f32 %v6553_v15, %v572_v35  ;;  %v5922_v15 = vld [vmem:[%s8882_s3 + $0xf4] sm:$0xf0] }
  0xe4   : > { %v503_v12 = vmul.f32 %v6557_v17, %v6964_v6  ;;  %v644_v13 = vmul.f32 %v6551_v14, %v568_v24  ;;  %v5115_v14 = vld [vmem:[%s8882_s3 + $0x2e8] sm:$0xf] }
  0xe5   : > { %v4859_v17 = vld [vmem:[%s8882_s3 + $0xe8] sm:$0xf]  ;;  %v710_v1 = vadd.f32 %v646_v19, %v506_v51  ;;  %v711_v18 = vadd.f32 %v647_v59, %v507_v53  ;;  %v5116_v6 = vor.u32 %v5986_v16, %v5115_v14  ;;  %v712_v41 = vadd.f32 %v648_v38, %v508_v63 }
  0xe6   : > { %v5243_v24 = vld [vmem:[%s8882_s3 + $0x3e8] sm:$0xf]  ;;  %v713_v5 = vadd.f32 %v649_v61, %v509_v36  ;;  %v4860_v47 = vor.u32 %v5922_v15, %v4859_v17  ;;  %v707_v2 = vadd.f32 %v643_v11, %v503_v12  ;;  %v708_v52 = vadd.f32 %v644_v13, %v504_v39  ;;  %v5954_v61 = vld [vmem:[%s8882_s3 + $0x1f4] sm:$0xf0] }
  0xe7   : > { %v5244_v35 = vor.u32 %v6018_v4, %v5243_v24  ;;  %2152 = vmatpush.bf16.msra.mxu2 %v5116_v6  ;;  %v784_v51 = vadd.f32 %v6574_v28, %v710_v1  ;;  %v785_v53 = vadd.f32 %v6576_v29, %v711_v18  ;;  %v786_v19 = vadd.f32 %v6578_v30, %v712_v41  ;;  %v4987_v38 = vld [vmem:[%s8882_s3 + $0x1e8] sm:$0xf]  ;;  %v5982_v18 = vld [vmem:[%s8882_s3 + $0x2d4] sm:$0xf0] }
  0xe8   : > { %1695 = vmatmul.bf16.gmra.mxu0 %v6952_v22  ;;  %v787_v59 = vadd.f32 %v6580_v31, %v713_v5  ;;  %v780_v63 = vadd.f32 %v6574_v28, %v706_v54  ;;  %v781_v36 = vadd.f32 %v6576_v29, %v707_v2  ;;  %v782_v32 = vadd.f32 %v6578_v30, %v708_v52  ;;  %v5099_v1 = vld [vmem:[%s8882_s3 + $0x2c8] sm:$0xf]  ;;  %v5918_v24 = vld [vmem:[%s8882_s3 + $0xd4] sm:$0xf0] }
  0xe9   : > { %1744 = vmatmul.bf16.gmra.mxu1 %v6954_v34  ;;  %1793 = vmatmul.bf16.gmra.mxu2 %v6958_v23  ;;  %v783_v11 = vadd.f32 %v6580_v31, %v709_v33  ;;  %v848_v10 = vmax.f32 %v784_v51, 0.0  ;;  %v849_v12 = vmax.f32 %v785_v53, 0.0  ;;  %v4988_v13 = vor.u32 %v5954_v61, %v4987_v38  ;;  %v4843_v6 = vld [vmem:[%s8882_s3 + $0xc8] sm:$0xf]  ;;  %v6014_v41 = vld [vmem:[%s8882_s3 + $0x3d4] sm:$0xf0] }
  0xea   : > { %1842 = vmatmul.bf16.gmra.mxu3 %v6960_v48  ;;  %2054 = vmatpush.bf16.msra.mxu0 %v4860_v47  ;;  %v850_v39 = vmax.f32 %v786_v19, 0.0  ;;  %v851_v7 = vmax.f32 %v787_v59, 0.0  ;;  %v844_v28 = vmax.f32 %v780_v63, 0.0  ;;  %v845_v0 = vmax.f32 %v781_v36, 0.0  ;;  %v5227_v4 = vld [vmem:[%s8882_s3 + $0x3c8] sm:$0xf] }
  0xeb   : > { %2201 = vmatpush.bf16.msra.mxu3 %v5244_v35  ;;  %2103 = vmatpush.bf16.msra.mxu1 %v4988_v13  ;;  %v846_v29 = vmax.f32 %v782_v32, 0.0  ;;  %v847_v30 = vmax.f32 %v783_v11, 0.0  ;;  %v5100_v15 = vor.u32 %v5982_v18, %v5099_v1  ;;  %v4844_v5 = vor.u32 %v5918_v24, %v4843_v6  ;;  %v7097_v35 = vld [vmem:[%s8883_s4] sm:$0xf]  ;;  %v4971_v54 = vld [vmem:[%s8882_s3 + $0x1c8] sm:$0xf] }
  0xec   : > { %v7064_v14 = vpack.c.bf16 %v848_v10, %v844_v28  ;;  %v7066_v31 = vpack.c.bf16 %v849_v12, %v845_v0  ;;  %v5228_v47 = vor.u32 %v6014_v41, %v5227_v4  ;;  %v5950_v2 = vld [vmem:[%s8882_s3 + $0x1d4] sm:$0xf0]  ;;  %v7106_v52 = vperm.slane %v7097_v35, 0  ;;  %v5083_v63 = vld [vmem:[%s8882_s3 + $0x2a8] sm:$0xf] }
  0xed   : > { %v7068_v16 = vpack.c.bf16 %v850_v39, %v846_v29  ;;  %v7070_v17 = vpack.c.bf16 %v851_v7, %v847_v30  ;;  %2153 = vmatpush.bf16.msra.mxu2 %v5100_v15  ;;  %v4972_v33 = vor.u32 %v5950_v2, %v4971_v54  ;;  %v5978_v36 = vld [vmem:[%s8882_s3 + $0x2b4] sm:$0xf0]  ;;  %v4827_v32 = vld [vmem:[%s8882_s3 + $0xa8] sm:$0xf] }
  0xee   : > { %2055 = vmatpush.bf16.msra.mxu0 %v4844_v5  ;;  %v5084_v61 = vor.u32 %v5978_v36, %v5083_v63  ;;  %v5914_v10 = vld [vmem:[%s8882_s3 + $0xb4] sm:$0xf0]  ;;  %v5211_v12 = vld [vmem:[%s8882_s3 + $0x3a8] sm:$0xf] }
  0xef   : > { %2202 = vmatpush.bf16.msra.mxu3 %v5228_v47  ;;  %2104 = vmatpush.bf16.msra.mxu1 %v4972_v33  ;;  %v6010_v13 = vld [vmem:[%s8882_s3 + $0x3b4] sm:$0xf0]  ;;  %v4828_v0 = vor.u32 %v5914_v10, %v4827_v32  ;;  %v4955_v6 = vld [vmem:[%s8882_s3 + $0x1a8] sm:$0xf] }
  0xf0   : > { %v5212_v29 = vor.u32 %v6010_v13, %v5211_v12  ;;  %v5946_v15 = vld [vmem:[%s8882_s3 + $0x1b4] sm:$0xf0]  ;;  %v5067_v63 = vld [vmem:[%s8882_s3 + $0x288] sm:$0xf] }
  0xf1   : > { %2154 = vmatpush.bf16.msra.mxu2 %v5084_v61  ;;  %v4956_v24 = vor.u32 %v5946_v15, %v4955_v6  ;;  %v5974_v36 = vld [vmem:[%s8882_s3 + $0x294] sm:$0xf0]  ;;  %v4811_v32 = vld [vmem:[%s8882_s3 + $0x88] sm:$0xf] }
  0xf2   : > { %2056 = vmatpush.bf16.msra.mxu0 %v4828_v0  ;;  %v5068_v61 = vor.u32 %v5974_v36, %v5067_v63  ;;  %v5910_v10 = vld [vmem:[%s8882_s3 + $0x94] sm:$0xf0]  ;;  %v5195_v12 = vld [vmem:[%s8882_s3 + $0x388] sm:$0xf] }
  0xf3   : > { %2203 = vmatpush.bf16.msra.mxu3 %v5212_v29  ;;  %2105 = vmatpush.bf16.msra.mxu1 %v4956_v24  ;;  %v6006_v13 = vld [vmem:[%s8882_s3 + $0x394] sm:$0xf0]  ;;  %v4812_v0 = vor.u32 %v5910_v10, %v4811_v32  ;;  %v4939_v6 = vld [vmem:[%s8882_s3 + $0x188] sm:$0xf] }
  0xf4   : > { %v5196_v29 = vor.u32 %v6006_v13, %v5195_v12  ;;  %v5942_v15 = vld [vmem:[%s8882_s3 + $0x194] sm:$0xf0]  ;;  %v5051_v36 = vld [vmem:[%s8882_s3 + $0x268] sm:$0xf] }
  0xf5   : > { %2155 = vmatpush.bf16.msra.mxu2 %v5068_v61  ;;  %v4940_v24 = vor.u32 %v5942_v15, %v4939_v6  ;;  %v5970_v32 = vld [vmem:[%s8882_s3 + $0x274] sm:$0xf0]  ;;  %v5179_v13 = vld [vmem:[%s8882_s3 + $0x368] sm:$0xf] }
  0xf6   : > { %2057 = vmatpush.bf16.msra.mxu0 %v4812_v0  ;;  %v5052_v10 = vor.u32 %v5970_v32, %v5051_v36  ;;  %v5906_v12 = vld [vmem:[%s8882_s3 + $0x74] sm:$0xf0]  ;;  %v4923_v15 = vld [vmem:[%s8882_s3 + $0x168] sm:$0xf] }
  0xf7   : > { %2204 = vmatpush.bf16.msra.mxu3 %v5196_v29  ;;  %2106 = vmatpush.bf16.msra.mxu1 %v4940_v24  ;;  %v5938_v24 = vld [vmem:[%s8882_s3 + $0x174] sm:$0xf0] }
  0xf8   : > { %1700 = vmatmul.bf16.gmra.mxu0 %v7008_v60 }
  0xf9   : > { %1749 = vmatmul.bf16.gmra.mxu1 %v7010_v37  ;;  %1798 = vmatmul.bf16.gmra.mxu2 %v7014_v62 }
  0xfa   : > { %1847 = vmatmul.bf16.gmra.mxu3 %v7016_v3  ;;  %2156 = vmatpush.bf16.msra.mxu2 %v5052_v10 }
 0x108   : > { %1705 = vmatmul.bf16.gmra.mxu0 %v7064_v14 }
 0x109   : > { %1754 = vmatmul.bf16.gmra.mxu1 %v7066_v31  ;;  %1803 = vmatmul.bf16.gmra.mxu2 %v7068_v16 }
 0x10a   : > { %1852 = vmatmul.bf16.gmra.mxu3 %v7070_v17 }
 0x115   : > { %v1671_v51 = vpop.f32.mrf.mxu0 }
 0x116   : > { %v1720_v53 = vpop.f32.mrf.mxu1  ;;  %v1672_v19 = vadd.f32 %v1671_v51, %v7106_v52 }
 0x118   : > { %v1721_v59 = vadd.f32 %v1720_v53, %v1672_v19  ;;  %1866 = vmatmul.bf16.vlgmr.msrb.gmra.mxu0 %v6639_v42 }
 0x119   : > { %1915 = vmatmul.bf16.vlgmr.msrb.gmra.mxu1 %v6641_v43  ;;  %1964 = vmatmul.bf16.vlgmr.msrb.gmra.mxu2 %v6643_v44 }
 0x11a   : > { %2013 = vmatmul.bf16.vlgmr.msrb.gmra.mxu3 %v6645_v45 }
 0x11c   : > { %v1769_v11 = vpop.f32.mrf.mxu2 }
 0x11d   : > { %v1818_v38 = vpop.f32.mrf.mxu3  ;;  %v1770_v39 = vadd.f32 %v1769_v11, %v1721_v59  ;;  %v1673_v7 = vpop.f32.mrf.mxu0 }
 0x11e   : > { %v1722_v28 = vpop.f32.mrf.mxu1  ;;  %v1674_v30 = vadd.f32 %v1673_v7, %v7106_v52 }
 0x11f   : > { %v1819_v1 = vadd.f32 %v1818_v38, %v1770_v39 }
 0x120   : > { %v1723_v18 = vadd.f32 %v1722_v28, %v1674_v30 }
 0x121   : > { %v2446_v53 = vmax.f32 %v1819_v1, 0.0 }
 0x124   : > { %v1771_v4 = vpop.f32.mrf.mxu2 }
 0x125   : > { %v1820_v41 = vpop.f32.mrf.mxu3  ;;  %v1772_v5 = vadd.f32 %v1771_v4, %v1723_v18  ;;  %v1676_v47 = vpop.f32.mrf.mxu0 }
 0x126   : > { %v1725_v54 = vpop.f32.mrf.mxu1  ;;  %v1677_v2 = vadd.f32 %v1676_v47, %v7106_v52 }
 0x127   : > { %v1821_v33 = vadd.f32 %v1820_v41, %v1772_v5 }
 0x128   : > { %v1726_v51 = vadd.f32 %v1725_v54, %v1677_v2  ;;  %1871 = vmatmul.bf16.gmra.mxu0 %v6704_v55 }
 0x129   : > { %1920 = vmatmul.bf16.gmra.mxu1 %v6706_v56  ;;  %v2450_v19 = vmax.f32 %v1821_v33, 0.0  ;;  %1969 = vmatmul.bf16.gmra.mxu2 %v6709_v57 }
 0x12a   : > { %2018 = vmatmul.bf16.gmra.mxu3 %v6711_v58 }
 0x12b   : > { %v7143_v59 = vpack.c.bf16 %v2450_v19, %v2446_v53 }
 0x12c   : > { %v1774_v11 = vpop.f32.mrf.mxu2 }
 0x12d   : > { %v1823_v38 = vpop.f32.mrf.mxu3  ;;  %v1775_v39 = vadd.f32 %v1774_v11, %v1726_v51  ;;  %v1678_v7 = vpop.f32.mrf.mxu0  ;;  %v4795_v11 = vld [vmem:[%s8882_s3 + $0x68] sm:$0xf] }
 0x12e   : > { %v1727_v28 = vpop.f32.mrf.mxu1  ;;  %v1679_v30 = vadd.f32 %v1678_v7, %v7106_v52  ;;  %v4796_v29 = vor.u32 %v5906_v12, %v4795_v11  ;;  %v5035_v11 = vld [vmem:[%s8882_s3 + $0x248] sm:$0xf] }
 0x12f   : > { %v1824_v1 = vadd.f32 %v1823_v38, %v1775_v39  ;;  %v6002_v39 = vld [vmem:[%s8882_s3 + $0x374] sm:$0xf0] }
 0x130   : > { %v1728_v18 = vadd.f32 %v1727_v28, %v1679_v30  ;;  %v5180_v30 = vor.u32 %v6002_v39, %v5179_v13  ;;  %2058 = vmatpush.bf16.msra.mxu0 %v4796_v29  ;;  %v5902_v39 = vld [vmem:[%s8882_s3 + $0x54] sm:$0xf0] }
 0x131   : > { %v2454_v53 = vmax.f32 %v1824_v1, 0.0 }
 0x132   : > { %2205 = vmatpush.bf16.msra.mxu3 %v5180_v30 }
 0x134   : > { %v1776_v4 = vpop.f32.mrf.mxu2 }
 0x135   : > { %v1825_v41 = vpop.f32.mrf.mxu3  ;;  %v1777_v5 = vadd.f32 %v1776_v4, %v1728_v18  ;;  %v1681_v47 = vpop.f32.mrf.mxu0  ;;  %v4924_v4 = vor.u32 %v5938_v24, %v4923_v15 }
 0x136   : > { %v1730_v54 = vpop.f32.mrf.mxu1  ;;  %v1682_v2 = vadd.f32 %v1681_v47, %v7106_v52 }
 0x137   : > { %v1826_v33 = vadd.f32 %v1825_v41, %v1777_v5  ;;  %2107 = vmatpush.bf16.msra.mxu1 %v4924_v4  ;;  %v4907_v4 = vld [vmem:[%s8882_s3 + $0x148] sm:$0xf] }
 0x138   : > { %v1731_v51 = vadd.f32 %v1730_v54, %v1682_v2  ;;  %1876 = vmatmul.bf16.gmra.mxu0 %v6769_v8 }
 0x139   : > { %1925 = vmatmul.bf16.gmra.mxu1 %v6771_v9  ;;  %v2458_v19 = vmax.f32 %v1826_v33, 0.0  ;;  %1974 = vmatmul.bf16.gmra.mxu2 %v6775_v20 }
 0x13a   : > { %2023 = vmatmul.bf16.gmra.mxu3 %v6777_v21 }
 0x13b   : > { %v7175_v63 = vpack.c.bf16 %v2458_v19, %v2454_v53 }
 0x13c   : > { %v1779_v38 = vpop.f32.mrf.mxu2 }
 0x13d   : > { %v1828_v61 = vpop.f32.mrf.mxu3  ;;  %v1780_v7 = vadd.f32 %v1779_v38, %v1731_v51  ;;  %v1683_v28 = vpop.f32.mrf.mxu0  ;;  %v5966_v38 = vld [vmem:[%s8882_s3 + $0x254] sm:$0xf0] }
 0x13e   : > { %v1732_v0 = vpop.f32.mrf.mxu1  ;;  %v1684_v1 = vadd.f32 %v1683_v28, %v7106_v52  ;;  %v5036_v13 = vor.u32 %v5966_v38, %v5035_v11  ;;  %v5998_v28 = vld [vmem:[%s8882_s3 + $0x354] sm:$0xf0] }
 0x13f   : > { %v1829_v18 = vadd.f32 %v1828_v61, %v1780_v7  ;;  %v4779_v61 = vld [vmem:[%s8882_s3 + $0x48] sm:$0xf] }
 0x140   : > { %v1733_v6 = vadd.f32 %v1732_v0, %v1684_v1  ;;  %v5163_v7 = vld [vmem:[%s8882_s3 + $0x348] sm:$0xf]  ;;  %v4780_v1 = vor.u32 %v5902_v39, %v4779_v61  ;;  %2157 = vmatpush.bf16.msra.mxu2 %v5036_v13  ;;  %v8894_v61 = vld [vmem:[#allocation2_spill] sm:$0xff]  ;;  %v5962_v13 = vld [vmem:[%s8882_s3 + $0x234] sm:$0xf0] }
 0x141   : > { %v2462_v19 = vmax.f32 %v1829_v18, 0.0  ;;  %v5164_v18 = vor.u32 %v5998_v28, %v5163_v7  ;;  %v4763_v39 = vld [vmem:[%s8882_s3 + $0x28] sm:$0xf] }
 0x142   : > { %2059 = vmatpush.bf16.msra.mxu0 %v4780_v1  ;;  %v5994_v1 = vld [vmem:[%s8882_s3 + $0x334] sm:$0xf0] }
 0x143   : > { %2206 = vmatpush.bf16.msra.mxu3 %v5164_v18 }
 0x144   : > { %v1781_v41 = vpop.f32.mrf.mxu2 }
 0x145   : > { %v1830_v5 = vpop.f32.mrf.mxu3  ;;  %v1782_v47 = vadd.f32 %v1781_v41, %v1733_v6  ;;  %v1686_v54 = vpop.f32.mrf.mxu0  ;;  %v5934_v41 = vld [vmem:[%s8882_s3 + $0x154] sm:$0xf0] }
 0x146   : > { %v1735_v2 = vpop.f32.mrf.mxu1  ;;  %v1687_v33 = vadd.f32 %v1686_v54, %v7106_v52 }
 0x147   : > { %v1831_v51 = vadd.f32 %v1830_v5, %v1782_v47  ;;  %v4908_v5 = vor.u32 %v5934_v41, %v4907_v4 }
 0x148   : > { %v1736_v53 = vadd.f32 %v1735_v2, %v1687_v33  ;;  %1881 = vmatmul.bf16.gmra.mxu0 %v6832_v40 }
 0x149   : > { %1930 = vmatmul.bf16.gmra.mxu1 %v6834_v46  ;;  %v2466_v36 = vmax.f32 %v1831_v51, 0.0  ;;  %1979 = vmatmul.bf16.gmra.mxu2 %v6838_v49 }
 0x14a   : > { %2028 = vmatmul.bf16.gmra.mxu3 %v6840_v50  ;;  %2108 = vmatpush.bf16.msra.mxu1 %v4908_v5 }
 0x14b   : > { %v7207_v32 = vpack.c.bf16 %v2466_v36, %v2462_v19 }
 0x14c   : > { %v1784_v10 = vpop.f32.mrf.mxu2 }
 0x14d   : > { %v1833_v12 = vpop.f32.mrf.mxu3  ;;  %v1785_v0 = vadd.f32 %v1784_v10, %v1736_v53  ;;  %v1688_v29 = vpop.f32.mrf.mxu0 }
 0x14e   : > { %v1737_v30 = vpop.f32.mrf.mxu1  ;;  %v1689_v6 = vadd.f32 %v1688_v29, %v7106_v52  ;;  %v5898_v29 = vld [vmem:[%s8882_s3 + $0x34] sm:$0xf0] }
 0x14f   : > { %v1834_v15 = vadd.f32 %v1833_v12, %v1785_v0  ;;  %v5019_v12 = vld [vmem:[%s8882_s3 + $0x228] sm:$0xf] }
 0x150   : > { %v1738_v24 = vadd.f32 %v1737_v30, %v1689_v6  ;;  %v5020_v0 = vor.u32 %v5962_v13, %v5019_v12  ;;  %v5147_v30 = vld [vmem:[%s8882_s3 + $0x328] sm:$0xf] }
 0x151   : > { %v2470_v11 = vmax.f32 %v1834_v15, 0.0  ;;  %v5148_v4 = vor.u32 %v5994_v1, %v5147_v30  ;;  %v4747_v30 = vld [vmem:[%s8882_s3 + $0x8] sm:$0xf] }
 0x152   : > { %2158 = vmatpush.bf16.msra.mxu2 %v5020_v0  ;;  %v5003_v0 = vld [vmem:[%s8882_s3 + $0x208] sm:$0xf] }
 0x153   : > { %2207 = vmatpush.bf16.msra.mxu3 %v5148_v4  ;;  %v5990_v4 = vld [vmem:[%s8882_s3 + $0x314] sm:$0xf0] }
 0x154   : > { %v1786_v47 = vpop.f32.mrf.mxu2 }
 0x155   : > { %v1835_v54 = vpop.f32.mrf.mxu3  ;;  %v1787_v2 = vadd.f32 %v1786_v47, %v1738_v24  ;;  %v1691_v33 = vpop.f32.mrf.mxu0  ;;  %v4764_v24 = vor.u32 %v5898_v29, %v4763_v39  ;;  %v5958_v29 = vld [vmem:[%s8882_s3 + $0x214] sm:$0xf0] }
 0x156   : > { %v1740_v51 = vpop.f32.mrf.mxu1  ;;  %v1692_v53 = vadd.f32 %v1691_v33, %v7106_v52 }
 0x157   : > { %v1836_v19 = vadd.f32 %v1835_v54, %v1787_v2  ;;  %2060 = vmatpush.bf16.msra.mxu0 %v4764_v24  ;;  %v4891_v54 = vld [vmem:[%s8882_s3 + $0x128] sm:$0xf]  ;;  %v5930_v2 = vld [vmem:[%s8882_s3 + $0x134] sm:$0xf0] }
 0x158   : > { %v1741_v36 = vadd.f32 %v1740_v51, %v1692_v53  ;;  %1886 = vmatmul.bf16.gmra.mxu0 %v6892_v25  ;;  %v4892_v33 = vor.u32 %v5930_v2, %v4891_v54  ;;  %v5131_v24 = vld [vmem:[%s8882_s3 + $0x308] sm:$0xf] }
 0x159   : > { %1935 = vmatmul.bf16.gmra.mxu1 %v6894_v26  ;;  %v2474_v38 = vmax.f32 %v1836_v19, 0.0  ;;  %1984 = vmatmul.bf16.gmra.mxu2 %v6898_v27  ;;  %v5132_v2 = vor.u32 %v5990_v4, %v5131_v24  ;;  %v5117_v24 = vld [vmem:[%s8882_s3 + $0x2f8] sm:$0xf0]  ;;  %v5920_v4 = vld [vmem:[%s8882_s3 + $0xec] sm:$0xf] }
 0x15a   : > { %2033 = vmatmul.bf16.gmra.mxu3 %v8894_v61  ;;  %2109 = vmatpush.bf16.msra.mxu1 %v4892_v33 }
 0x15b   : > { %v7239_v10 = vpack.c.bf16 %v2474_v38, %v2470_v11  ;;  %2208 = vmatpush.bf16.msra.mxu3 %v5132_v2  ;;  %v6016_v2 = vld [vmem:[%s8882_s3 + $0x3ec] sm:$0xf] }
 0x15c   : > { %v1789_v7 = vpop.f32.mrf.mxu2 }
 0x15d   : > { %v1838_v28 = vpop.f32.mrf.mxu3  ;;  %v1790_v18 = vadd.f32 %v1789_v7, %v1741_v36  ;;  %v1693_v6 = vpop.f32.mrf.mxu0 }
 0x15e   : > { %v1742_v15 = vpop.f32.mrf.mxu1  ;;  %v1694_v41 = vadd.f32 %v1693_v6, %v7106_v52  ;;  %v5004_v6 = vor.u32 %v5958_v29, %v5003_v0 }
 0x15f   : > { %v1839_v5 = vadd.f32 %v1838_v28, %v1790_v18 }
 0x160   : > { %v1743_v47 = vadd.f32 %v1742_v15, %v1694_v41  ;;  %v5894_v15 = vld [vmem:[%s8882_s3 + $0x14] sm:$0xf0]  ;;  %2159 = vmatpush.bf16.msra.mxu2 %v5004_v6 }
 0x161   : > { %v2478_v39 = vmax.f32 %v1839_v5, 0.0  ;;  %v4748_v54 = vor.u32 %v5894_v15, %v4747_v30  ;;  %v5984_v15 = vld [vmem:[%s8882_s3 + $0x2ec] sm:$0xf] }
 0x163   : > { %2061 = vmatpush.bf16.msra.mxu0 %v4748_v54  ;;  %v4861_v54 = vld [vmem:[%s8882_s3 + $0xf8] sm:$0xf0] }
 0x164   : > { %v1791_v51 = vpop.f32.mrf.mxu2 }
 0x165   : > { %v1840_v53 = vpop.f32.mrf.mxu3  ;;  %v1792_v19 = vadd.f32 %v1791_v51, %v1743_v47  ;;  %v1696_v36 = vpop.f32.mrf.mxu0 }
 0x166   : > { %v1745_v11 = vpop.f32.mrf.mxu1  ;;  %v1697_v38 = vadd.f32 %v1696_v36, %v7106_v52  ;;  %v5926_v36 = vld [vmem:[%s8882_s3 + $0x114] sm:$0xf0] }
 0x167   : > { %v1841_v12 = vadd.f32 %v1840_v53, %v1792_v19  ;;  %v4875_v19 = vld [vmem:[%s8882_s3 + $0x108] sm:$0xf] }
 0x168   : > { %v1746_v13 = vadd.f32 %v1745_v11, %v1697_v38  ;;  %1891 = vmatmul.bf16.gmra.mxu0 %v6952_v22  ;;  %v4876_v11 = vor.u32 %v5926_v36, %v4875_v19  ;;  %v4864_v36 = vor.u32 %v5920_v4, %v4861_v54 }
 0x169   : > { %1940 = vmatmul.bf16.gmra.mxu1 %v6954_v34  ;;  %v2482_v7 = vmax.f32 %v1841_v12, 0.0  ;;  %1989 = vmatmul.bf16.gmra.mxu2 %v6958_v23 }
 0x16a   : > { %2038 = vmatmul.bf16.gmra.mxu3 %v6960_v48  ;;  %2110 = vmatpush.bf16.msra.mxu1 %v4876_v11 }
 0x16b   : > { %v7271_v28 = vpack.c.bf16 %v2482_v7, %v2478_v39  ;;  %2250 = vmatpush.bf16.msrb.mxu0 %v4864_v36 }
 0x16c   : > { %v1794_v1 = vpop.f32.mrf.mxu2 }
 0x16d   : > { %v1843_v18 = vpop.f32.mrf.mxu3  ;;  %v1795_v41 = vadd.f32 %v1794_v1, %v1746_v13  ;;  %v1698_v5 = vpop.f32.mrf.mxu0 }
 0x16e   : > { %v1747_v47 = vpop.f32.mrf.mxu1  ;;  %v1699_v33 = vadd.f32 %v1698_v5, %v7106_v52 }
 0x16f   : > { %v1844_v51 = vadd.f32 %v1843_v18, %v1795_v41 }
 0x170   : > { %v1748_v53 = vadd.f32 %v1747_v47, %v1699_v33  ;;  %v5120_v47 = vor.u32 %v5984_v15, %v5117_v24  ;;  %v5245_v33 = vld [vmem:[%s8882_s3 + $0x3f8] sm:$0xf0] }
 0x171   : > { %v2486_v1 = vmax.f32 %v1844_v51, 0.0  ;;  %v5248_v11 = vor.u32 %v6016_v2, %v5245_v33  ;;  %v5980_v2 = vld [vmem:[%s8882_s3 + $0x2cc] sm:$0xf]  ;;  %v5101_v33 = vld [vmem:[%s8882_s3 + $0x2d8] sm:$0xf0] }
 0x172   : > { %2348 = vmatpush.bf16.msrb.mxu2 %v5120_v47  ;;  %v5104_v36 = vor.u32 %v5980_v2, %v5101_v33 }
 0x173   : > { %2397 = vmatpush.bf16.msrb.mxu3 %v5248_v11  ;;  %v4845_v11 = vld [vmem:[%s8882_s3 + $0xd8] sm:$0xf0] }
 0x174   : > { %v1796_v38 = vpop.f32.mrf.mxu2 }
 0x175   : > { %v1845_v12 = vpop.f32.mrf.mxu3  ;;  %v1797_v13 = vadd.f32 %v1796_v38, %v1748_v53  ;;  %v1701_v39 = vpop.f32.mrf.mxu0 }
 0x176   : > { %v1750_v7 = vpop.f32.mrf.mxu1  ;;  %v1702_v0 = vadd.f32 %v1701_v39, %v7106_v52  ;;  %v5952_v39 = vld [vmem:[%s8882_s3 + $0x1ec] sm:$0xf]  ;;  %2349 = vmatpush.bf16.msrb.mxu2 %v5104_v36 }
 0x177   : > { %v1846_v29 = vadd.f32 %v1845_v12, %v1797_v13 }
 0x178   : > { %v1751_v30 = vadd.f32 %v1750_v7, %v1702_v0  ;;  %1896 = vmatmul.bf16.gmra.mxu0 %v7008_v60  ;;  %v4989_v7 = vld [vmem:[%s8882_s3 + $0x1f8] sm:$0xf0] }
 0x179   : > { %1945 = vmatmul.bf16.gmra.mxu1 %v7010_v37  ;;  %v2490_v18 = vmax.f32 %v1846_v29, 0.0  ;;  %1994 = vmatmul.bf16.gmra.mxu2 %v7014_v62  ;;  %v4992_v0 = vor.u32 %v5952_v39, %v4989_v7 }
 0x17a   : > { %2043 = vmatmul.bf16.gmra.mxu3 %v7016_v3 }
 0x17b   : > { %v7303_v6 = vpack.c.bf16 %v2490_v18, %v2486_v1  ;;  %2299 = vmatpush.bf16.msrb.mxu1 %v4992_v0 }
 0x17c   : > { %v1799_v41 = vpop.f32.mrf.mxu2 }
 0x17d   : > { %v1848_v5 = vpop.f32.mrf.mxu3  ;;  %v1800_v51 = vadd.f32 %v1799_v41, %v1751_v30  ;;  %v1703_v53 = vpop.f32.mrf.mxu0 }
 0x17e   : > { %v1752_v19 = vpop.f32.mrf.mxu1  ;;  %v1704_v38 = vadd.f32 %v1703_v53, %v7106_v52 }
 0x17f   : > { %v1849_v12 = vadd.f32 %v1848_v5, %v1800_v51  ;;  %v5916_v51 = vld [vmem:[%s8882_s3 + $0xcc] sm:$0xf] }
 0x180   : > { %v1753_v13 = vadd.f32 %v1752_v19, %v1704_v38  ;;  %v6012_v38 = vld [vmem:[%s8882_s3 + $0x3cc] sm:$0xf]  ;;  %v4848_v0 = vor.u32 %v5916_v51, %v4845_v11 }
 0x181   : > { %v2494_v5 = vmax.f32 %v1849_v12, 0.0  ;;  %v5229_v12 = vld [vmem:[%s8882_s3 + $0x3d8] sm:$0xf0] }
 0x182   : > { %2251 = vmatpush.bf16.msrb.mxu0 %v4848_v0 }
 0x184   : > { %v1801_v29 = vpop.f32.mrf.mxu2 }
 0x185   : > { %v1850_v30 = vpop.f32.mrf.mxu3  ;;  %v1802_v1 = vadd.f32 %v1801_v29, %v1753_v13  ;;  %v1706_v18 = vpop.f32.mrf.mxu0  ;;  %v5232_v29 = vor.u32 %v6012_v38, %v5229_v12  ;;  %v5976_v38 = vld [vmem:[%s8882_s3 + $0x2ac] sm:$0xf]  ;;  %v5085_v12 = vld [vmem:[%s8882_s3 + $0x2b8] sm:$0xf0] }
 0x186   : > { %v1755_v15 = vpop.f32.mrf.mxu1  ;;  %v1707_v24 = vadd.f32 %v1706_v18, %v7106_v52  ;;  %v5088_v0 = vor.u32 %v5976_v38, %v5085_v12 }
 0x187   : > { %v1851_v4 = vadd.f32 %v1850_v30, %v1802_v1  ;;  %2398 = vmatpush.bf16.msrb.mxu3 %v5232_v29  ;;  %v4829_v29 = vld [vmem:[%s8882_s3 + $0xb8] sm:$0xf0] }
 0x188   : > { %v1756_v41 = vadd.f32 %v1755_v15, %v1707_v24  ;;  %1901 = vmatmul.bf16.gmra.mxu0 %v7064_v14  ;;  %v5948_v15 = vld [vmem:[%s8882_s3 + $0x1cc] sm:$0xf]  ;;  %v4973_v24 = vld [vmem:[%s8882_s3 + $0x1d8] sm:$0xf0]  ;;  %2350 = vmatpush.bf16.msrb.mxu2 %v5088_v0 }
 0x189   : > { %1950 = vmatmul.bf16.gmra.mxu1 %v7066_v31  ;;  %v2498_v47 = vmax.f32 %v1851_v4, 0.0  ;;  %1999 = vmatmul.bf16.gmra.mxu2 %v7068_v16  ;;  %v7363_v4 = vperm.slane %v7097_v35, 1 }
 0x18a   : > { %2048 = vmatmul.bf16.gmra.mxu3 %v7070_v17 }
 0x18b   : > { %v7335_v54 = vpack.c.bf16 %v2498_v47, %v2494_v5 }
 0x18c   : > { %v1804_v53 = vpop.f32.mrf.mxu2 }
 0x18d   : > { %8895 = vst [vmem:[#allocation2_spill] sm:$0xff] %v7335_v54  ;;  %v1853_v19 = vpop.f32.mrf.mxu3  ;;  %v1805_v13 = vadd.f32 %v1804_v53, %v1756_v41  ;;  %v1708_v39 = vpop.f32.mrf.mxu0  ;;  %v4976_v41 = vor.u32 %v5948_v15, %v4973_v24 }
 0x18e   : > { %v1757_v7 = vpop.f32.mrf.mxu1  ;;  %v1709_v30 = vadd.f32 %v1708_v39, %v7106_v52 }
 0x18f   : > { %v1854_v1 = vadd.f32 %v1853_v19, %v1805_v13  ;;  %2300 = vmatpush.bf16.msrb.mxu1 %v4976_v41  ;;  %v5912_v13 = vld [vmem:[%s8882_s3 + $0xac] sm:$0xf] }
 0x190   : > { %v1758_v18 = vadd.f32 %v1757_v7, %v1709_v30  ;;  %v6008_v30 = vld [vmem:[%s8882_s3 + $0x3ac] sm:$0xf]  ;;  %v4832_v41 = vor.u32 %v5912_v13, %v4829_v29 }
 0x191   : > { %v2502_v36 = vmax.f32 %v1854_v1, 0.0  ;;  %v5213_v1 = vld [vmem:[%s8882_s3 + $0x3b8] sm:$0xf0] }
 0x192   : > { %2252 = vmatpush.bf16.msrb.mxu0 %v4832_v41 }
 0x194   : > { %v1806_v5 = vpop.f32.mrf.mxu2 }
 0x195   : > { %v1855_v47 = vpop.f32.mrf.mxu3  ;;  %v1807_v52 = vadd.f32 %v1806_v5, %v1758_v18  ;;  %v1867_v2 = vpop.f32.mrf.mxu0  ;;  %v5216_v5 = vor.u32 %v6008_v30, %v5213_v1  ;;  %v5972_v1 = vld [vmem:[%s8882_s3 + $0x28c] sm:$0xf] }
 0x196   : > { %v1916_v33 = vpop.f32.mrf.mxu1  ;;  %v1868_v51 = vadd.f32 %v1867_v2, %v7363_v4 }
 0x197   : > { %v1856_v53 = vadd.f32 %v1855_v47, %v1807_v52  ;;  %2399 = vmatpush.bf16.msrb.mxu3 %v5216_v5 }
 0x198   : > { %v1917_v19 = vadd.f32 %v1916_v33, %v1868_v51  ;;  %2062 = vmatmul.bf16.vlgmr.msra.gmra.mxu0 %v6639_v42  ;;  %v5944_v33 = vld [vmem:[%s8882_s3 + $0x1ac] sm:$0xf]  ;;  %v4957_v51 = vld [vmem:[%s8882_s3 + $0x1b8] sm:$0xf0] }
 0x199   : > { %2111 = vmatmul.bf16.vlgmr.msra.gmra.mxu1 %v6641_v43  ;;  %v2506_v11 = vmax.f32 %v1856_v53, 0.0  ;;  %2160 = vmatmul.bf16.vlgmr.msra.gmra.mxu2 %v6643_v44  ;;  %v4960_v53 = vor.u32 %v5944_v33, %v4957_v51 }
 0x19a   : > { %2209 = vmatmul.bf16.vlgmr.msra.gmra.mxu3 %v6645_v45 }
 0x19b   : > { %v7370_v35 = vpack.c.bf16 %v2506_v11, %v2502_v36  ;;  %2301 = vmatpush.bf16.msrb.mxu1 %v4960_v53 }
 0x19c   : > { %v1965_v39 = vpop.f32.mrf.mxu2 }
 0x19d   : > { %8896 = vst [vmem:[#allocation3_spill] sm:$0xff] %v7370_v35  ;;  %v2014_v7 = vpop.f32.mrf.mxu3  ;;  %v1966_v18 = vadd.f32 %v1965_v39, %v1917_v19  ;;  %v1869_v15 = vpop.f32.mrf.mxu0 }
 0x19e   : > { %v1918_v24 = vpop.f32.mrf.mxu1  ;;  %v1870_v47 = vadd.f32 %v1869_v15, %v7363_v4  ;;  %v5908_v15 = vld [vmem:[%s8882_s3 + $0x8c] sm:$0xf] }
 0x19f   : > { %v2015_v52 = vadd.f32 %v2014_v7, %v1966_v18  ;;  %v5069_v18 = vld [vmem:[%s8882_s3 + $0x298] sm:$0xf0] }
 0x1a0   : > { %v1919_v2 = vadd.f32 %v1918_v24, %v1870_v47  ;;  %v5072_v5 = vor.u32 %v5972_v1, %v5069_v18  ;;  %v4813_v47 = vld [vmem:[%s8882_s3 + $0x98] sm:$0xf0] }
 0x1a1   : > { %v2447_v0 = vmax.f32 %v2015_v52, 0.0  ;;  %v6004_v52 = vld [vmem:[%s8882_s3 + $0x38c] sm:$0xf] }
 0x1a2   : > { %2351 = vmatpush.bf16.msrb.mxu2 %v5072_v5 }
 0x1a4   : > { %v1967_v19 = vpop.f32.mrf.mxu2 }
 0x1a5   : > { %v2016_v36 = vpop.f32.mrf.mxu3  ;;  %v1968_v11 = vadd.f32 %v1967_v19, %v1919_v2  ;;  %v1872_v38 = vpop.f32.mrf.mxu0  ;;  %v5197_v2 = vld [vmem:[%s8882_s3 + $0x398] sm:$0xf0]  ;;  %v4816_v19 = vor.u32 %v5908_v15, %v4813_v47 }
 0x1a6   : > { %v1921_v12 = vpop.f32.mrf.mxu1  ;;  %v1873_v13 = vadd.f32 %v1872_v38, %v7363_v4 }
 0x1a7   : > { %v2017_v39 = vadd.f32 %v2016_v36, %v1968_v11  ;;  %v5200_v36 = vor.u32 %v6004_v52, %v5197_v2  ;;  %2253 = vmatpush.bf16.msrb.mxu0 %v4816_v19 }
 0x1a8   : > { %v1922_v7 = vadd.f32 %v1921_v12, %v1873_v13  ;;  %2067 = vmatmul.bf16.gmra.mxu0 %v6704_v55  ;;  %v5940_v13 = vld [vmem:[%s8882_s3 + $0x18c] sm:$0xf] }
 0x1a9   : > { %2116 = vmatmul.bf16.gmra.mxu1 %v6706_v56  ;;  %v2451_v29 = vmax.f32 %v2017_v39, 0.0  ;;  %2165 = vmatmul.bf16.gmra.mxu2 %v6709_v57  ;;  %v4941_v39 = vld [vmem:[%s8882_s3 + $0x198] sm:$0xf0] }
 0x1aa   : > { %2214 = vmatmul.bf16.gmra.mxu3 %v6711_v58 }
 0x1ab   : > { %v7402_v30 = vpack.c.bf16 %v2451_v29, %v2447_v0  ;;  %2400 = vmatpush.bf16.msrb.mxu3 %v5200_v36 }
 0x1ac   : > { %v1970_v24 = vpop.f32.mrf.mxu2 }
 0x1ad   : > { %v2019_v41 = vpop.f32.mrf.mxu3  ;;  %v1971_v33 = vadd.f32 %v1970_v24, %v1922_v7  ;;  %v1874_v51 = vpop.f32.mrf.mxu0  ;;  %v4944_v7 = vor.u32 %v5940_v13, %v4941_v39  ;;  %v5181_v13 = vld [vmem:[%s8882_s3 + $0x378] sm:$0xf0] }
 0x1ae   : > { %v1923_v53 = vpop.f32.mrf.mxu1  ;;  %v1875_v11 = vadd.f32 %v1874_v51, %v7363_v4  ;;  %v5053_v51 = vld [vmem:[%s8882_s3 + $0x278] sm:$0xf0] }
 0x1af   : > { %v2020_v38 = vadd.f32 %v2019_v41, %v1971_v33  ;;  %2302 = vmatpush.bf16.msrb.mxu1 %v4944_v7  ;;  %v5968_v33 = vld [vmem:[%s8882_s3 + $0x26c] sm:$0xf] }
 0x1b0   : > { %v1924_v12 = vadd.f32 %v1923_v53, %v1875_v11  ;;  %v5904_v53 = vld [vmem:[%s8882_s3 + $0x6c] sm:$0xf]  ;;  %v5056_v11 = vor.u32 %v5968_v33, %v5053_v51 }
 0x1b1   : > { %v2455_v47 = vmax.f32 %v2020_v38, 0.0  ;;  %v4797_v38 = vld [vmem:[%s8882_s3 + $0x78] sm:$0xf0] }
 0x1b2   : > { %2352 = vmatpush.bf16.msrb.mxu2 %v5056_v11 }
 0x1b4   : > { %v1972_v0 = vpop.f32.mrf.mxu2 }
 0x1b5   : > { %v2021_v29 = vpop.f32.mrf.mxu3  ;;  %v1973_v1 = vadd.f32 %v1972_v0, %v1924_v12  ;;  %v1877_v18 = vpop.f32.mrf.mxu0  ;;  %v6000_v12 = vld [vmem:[%s8882_s3 + $0x36c] sm:$0xf] }
 0x1b6   : > { %v1926_v15 = vpop.f32.mrf.mxu1  ;;  %v1878_v24 = vadd.f32 %v1877_v18, %v7363_v4 }
 0x1b7   : > { %v2022_v41 = vadd.f32 %v2021_v29, %v1973_v1  ;;  %v4800_v29 = vor.u32 %v5904_v53, %v4797_v38  ;;  %v5184_v1 = vor.u32 %v6000_v12, %v5181_v13 }
 0x1b8   : > { %v1927_v5 = vadd.f32 %v1926_v15, %v1878_v24  ;;  %2072 = vmatmul.bf16.gmra.mxu0 %v6769_v8 }
 0x1b9   : > { %2121 = vmatmul.bf16.gmra.mxu1 %v6771_v9  ;;  %v2459_v52 = vmax.f32 %v2022_v41, 0.0  ;;  %2170 = vmatmul.bf16.gmra.mxu2 %v6775_v20  ;;  %v5936_v41 = vld [vmem:[%s8882_s3 + $0x16c] sm:$0xf] }
 0x1ba   : > { %2219 = vmatmul.bf16.gmra.mxu3 %v6777_v21  ;;  %2254 = vmatpush.bf16.msrb.mxu0 %v4800_v29  ;;  %v5900_v29 = vld [vmem:[%s8882_s3 + $0x4c] sm:$0xf] }
 0x1bb   : > { %v7434_v2 = vpack.c.bf16 %v2459_v52, %v2455_v47  ;;  %2401 = vmatpush.bf16.msrb.mxu3 %v5184_v1  ;;  %v4925_v47 = vld [vmem:[%s8882_s3 + $0x178] sm:$0xf0] }
 0x1bc   : > { %v1975_v19 = vpop.f32.mrf.mxu2 }
 0x1bd   : > { %v2024_v36 = vpop.f32.mrf.mxu3  ;;  %v1976_v39 = vadd.f32 %v1975_v19, %v1927_v5  ;;  %v1879_v7 = vpop.f32.mrf.mxu0  ;;  %v4928_v5 = vor.u32 %v5936_v41, %v4925_v47  ;;  %v5996_v41 = vld [vmem:[%s8882_s3 + $0x34c] sm:$0xf]  ;;  %v5165_v47 = vld [vmem:[%s8882_s3 + $0x358] sm:$0xf0] }
 0x1be   : > { %v1928_v0 = vpop.f32.mrf.mxu1  ;;  %v1880_v18 = vadd.f32 %v1879_v7, %v7363_v4  ;;  %v5964_v7 = vld [vmem:[%s8882_s3 + $0x24c] sm:$0xf] }
 0x1bf   : > { %v2025_v15 = vadd.f32 %v2024_v36, %v1976_v39  ;;  %2303 = vmatpush.bf16.msrb.mxu1 %v4928_v5 }
 0x1c0   : > { %v1929_v24 = vadd.f32 %v1928_v0, %v1880_v18  ;;  %v5037_v0 = vld [vmem:[%s8882_s3 + $0x258] sm:$0xf0] }
 0x1c1   : > { %v2463_v12 = vmax.f32 %v2025_v15, 0.0  ;;  %v5040_v15 = vor.u32 %v5964_v7, %v5037_v0 }
 0x1c3   : > { %2353 = vmatpush.bf16.msrb.mxu2 %v5040_v15 }
 0x1c4   : > { %v1977_v52 = vpop.f32.mrf.mxu2 }
 0x1c5   : > { %v2026_v33 = vpop.f32.mrf.mxu3  ;;  %v1978_v51 = vadd.f32 %v1977_v52, %v1929_v24  ;;  %v1882_v53 = vpop.f32.mrf.mxu0  ;;  %v4781_v24 = vld [vmem:[%s8882_s3 + $0x58] sm:$0xf0] }
 0x1c6   : > { %v1931_v19 = vpop.f32.mrf.mxu1  ;;  %v1883_v36 = vadd.f32 %v1882_v53, %v7363_v4  ;;  %v5168_v53 = vor.u32 %v5996_v41, %v5165_v47 }
 0x1c7   : > { %v2027_v11 = vadd.f32 %v2026_v33, %v1978_v51  ;;  %v4784_v51 = vor.u32 %v5900_v29, %v4781_v24 }
 0x1c8   : > { %v1932_v38 = vadd.f32 %v1931_v19, %v1883_v36  ;;  %2077 = vmatmul.bf16.gmra.mxu0 %v6832_v40  ;;  %2402 = vmatpush.bf16.msrb.mxu3 %v5168_v53  ;;  %v5896_v53 = vld [vmem:[%s8882_s3 + $0x2c] sm:$0xf] }
 0x1c9   : > { %2126 = vmatmul.bf16.gmra.mxu1 %v6834_v46  ;;  %v2467_v13 = vmax.f32 %v2027_v11, 0.0  ;;  %2175 = vmatmul.bf16.gmra.mxu2 %v6838_v49 }
 0x1ca   : > { %2224 = vmatmul.bf16.gmra.mxu3 %v6840_v50  ;;  %2255 = vmatpush.bf16.msrb.mxu0 %v4784_v51  ;;  %v5021_v51 = vld [vmem:[%s8882_s3 + $0x238] sm:$0xf0] }
 0x1cb   : > { %v7466_v39 = vpack.c.bf16 %v2467_v13, %v2463_v12  ;;  %v5932_v12 = vld [vmem:[%s8882_s3 + $0x14c] sm:$0xf]  ;;  %v4909_v13 = vld [vmem:[%s8882_s3 + $0x158] sm:$0xf0] }
 0x1cc   : > { %v1980_v1 = vpop.f32.mrf.mxu2 }
 0x1cd   : > { %v2029_v18 = vpop.f32.mrf.mxu3  ;;  %v1981_v5 = vadd.f32 %v1980_v1, %v1932_v38  ;;  %v1884_v52 = vpop.f32.mrf.mxu0  ;;  %v4912_v38 = vor.u32 %v5932_v12, %v4909_v13  ;;  %v4765_v12 = vld [vmem:[%s8882_s3 + $0x38] sm:$0xf0]  ;;  %v5992_v13 = vld [vmem:[%s8882_s3 + $0x32c] sm:$0xf] }
 0x1ce   : > { %v1933_v33 = vpop.f32.mrf.mxu1  ;;  %v1885_v19 = vadd.f32 %v1884_v52, %v7363_v4 }
 0x1cf   : > { %v2030_v36 = vadd.f32 %v2029_v18, %v1981_v5  ;;  %2304 = vmatpush.bf16.msrb.mxu1 %v4912_v38  ;;  %v5149_v38 = vld [vmem:[%s8882_s3 + $0x338] sm:$0xf0] }
 0x1d0   : > { %v1934_v11 = vadd.f32 %v1933_v33, %v1885_v19  ;;  %v5960_v33 = vld [vmem:[%s8882_s3 + $0x22c] sm:$0xf] }
 0x1d1   : > { %v2471_v47 = vmax.f32 %v2030_v36, 0.0 }
 0x1d4   : > { %v1982_v7 = vpop.f32.mrf.mxu2 }
 0x1d5   : > { %v2031_v0 = vpop.f32.mrf.mxu3  ;;  %v1983_v29 = vadd.f32 %v1982_v7, %v1934_v11  ;;  %v1887_v1 = vpop.f32.mrf.mxu0  ;;  %v5024_v11 = vor.u32 %v5960_v33, %v5021_v51  ;;  %v4893_v33 = vld [vmem:[%s8882_s3 + $0x138] sm:$0xf0] }
 0x1d6   : > { %v1936_v24 = vpop.f32.mrf.mxu1  ;;  %v1888_v18 = vadd.f32 %v1887_v1, %v7363_v4  ;;  %v4768_v1 = vor.u32 %v5896_v53, %v4765_v12 }
 0x1d7   : > { %v2032_v15 = vadd.f32 %v2031_v0, %v1983_v29  ;;  %2354 = vmatpush.bf16.msrb.mxu2 %v5024_v11 }
 0x1d8   : > { %v1937_v41 = vadd.f32 %v1936_v24, %v1888_v18  ;;  %2082 = vmatmul.bf16.gmra.mxu0 %v6892_v25  ;;  %v5152_v24 = vor.u32 %v5992_v13, %v5149_v38 }
 0x1d9   : > { %2131 = vmatmul.bf16.gmra.mxu1 %v6894_v26  ;;  %v2475_v5 = vmax.f32 %v2032_v15, 0.0  ;;  %2180 = vmatmul.bf16.gmra.mxu2 %v6898_v27 }
 0x1da   : > { %2229 = vmatmul.bf16.gmra.mxu3 %v8894_v61  ;;  %2256 = vmatpush.bf16.msrb.mxu0 %v4768_v1  ;;  %v5956_v1 = vld [vmem:[%s8882_s3 + $0x20c] sm:$0xf] }
 0x1db   : > { %v7498_v52 = vpack.c.bf16 %v2475_v5, %v2471_v47  ;;  %2403 = vmatpush.bf16.msrb.mxu3 %v5152_v24  ;;  %v5928_v5 = vld [vmem:[%s8882_s3 + $0x12c] sm:$0xf]  ;;  %v5005_v24 = vld [vmem:[%s8882_s3 + $0x218] sm:$0xf0] }
 0x1dc   : > { %v1985_v19 = vpop.f32.mrf.mxu2 }
 0x1dd   : > { %v2034_v36 = vpop.f32.mrf.mxu3  ;;  %v1986_v7 = vadd.f32 %v1985_v19, %v1937_v41  ;;  %v1889_v0 = vpop.f32.mrf.mxu0  ;;  %v4896_v41 = vor.u32 %v5928_v5, %v4893_v33  ;;  %v5008_v5 = vor.u32 %v5956_v1, %v5005_v24  ;;  %v4749_v33 = vld [vmem:[%s8882_s3 + $0x18] sm:$0xf0]  ;;  %v5924_v1 = vld [vmem:[%s8882_s3 + $0x10c] sm:$0xf] }
 0x1de   : > { %v1938_v29 = vpop.f32.mrf.mxu1  ;;  %v1890_v18 = vadd.f32 %v1889_v0, %v7363_v4  ;;  %v4877_v24 = vld [vmem:[%s8882_s3 + $0x118] sm:$0xf0] }
 0x1df   : > { %v2035_v15 = vadd.f32 %v2034_v36, %v1986_v7  ;;  %2305 = vmatpush.bf16.msrb.mxu1 %v4896_v41  ;;  %v5988_v41 = vld [vmem:[%s8882_s3 + $0x30c] sm:$0xf]  ;;  %2355 = vmatpush.bf16.msrb.mxu2 %v5008_v5 }
 0x1e0   : > { %v1939_v47 = vadd.f32 %v1938_v29, %v1890_v18  ;;  %v5892_v18 = vld [vmem:[%s8882_s3 + $0xc] sm:$0xf] }
 0x1e1   : > { %v2479_v7 = vmax.f32 %v2035_v15, 0.0 }
 0x1e4   : > { %v1987_v51 = vpop.f32.mrf.mxu2 }
 0x1e5   : > { %v2036_v19 = vpop.f32.mrf.mxu3  ;;  %v1988_v53 = vadd.f32 %v1987_v51, %v1939_v47  ;;  %v1892_v12 = vpop.f32.mrf.mxu0  ;;  %v5133_v51 = vld [vmem:[%s8882_s3 + $0x318] sm:$0xf0] }
 0x1e6   : > { %v1941_v13 = vpop.f32.mrf.mxu1  ;;  %v1893_v36 = vadd.f32 %v1892_v12, %v7363_v4 }
 0x1e7   : > { %v2037_v11 = vadd.f32 %v2036_v19, %v1988_v53 }
 0x1e8   : > { %v1942_v38 = vadd.f32 %v1941_v13, %v1893_v36  ;;  %2087 = vmatmul.bf16.gmra.mxu0 %v6952_v22  ;;  %v4752_v13 = vor.u32 %v5892_v18, %v4749_v33  ;;  %v5136_v36 = vor.u32 %v5988_v41, %v5133_v51 }
 0x1e9   : > { %2136 = vmatmul.bf16.gmra.mxu1 %v6954_v34  ;;  %v2483_v0 = vmax.f32 %v2037_v11, 0.0  ;;  %2185 = vmatmul.bf16.gmra.mxu2 %v6958_v23 }
 0x1ea   : > { %2234 = vmatmul.bf16.gmra.mxu3 %v6960_v48  ;;  %2257 = vmatpush.bf16.msrb.mxu0 %v4752_v13 }
 0x1eb   : > { %v7530_v29 = vpack.c.bf16 %v2483_v0, %v2479_v7  ;;  %2404 = vmatpush.bf16.msrb.mxu3 %v5136_v36 }
 0x1ec   : > { %v1990_v15 = vpop.f32.mrf.mxu2 }
 0x1ed   : > { %v2039_v47 = vpop.f32.mrf.mxu3  ;;  %v1991_v19 = vadd.f32 %v1990_v15, %v1942_v38  ;;  %v1894_v53 = vpop.f32.mrf.mxu0  ;;  %v4880_v38 = vor.u32 %v5924_v1, %v4877_v24 }
 0x1ee   : > { %v1943_v12 = vpop.f32.mrf.mxu1  ;;  %v1895_v11 = vadd.f32 %v1894_v53, %v7363_v4 }
 0x1ef   : > { %v2040_v7 = vadd.f32 %v2039_v47, %v1991_v19  ;;  %2306 = vmatpush.bf16.msrb.mxu1 %v4880_v38 }
 0x1f0   : > { %v1944_v0 = vadd.f32 %v1943_v12, %v1895_v11 }
 0x1f1   : > { %v2487_v19 = vmax.f32 %v2040_v7, 0.0 }
 0x1f4   : > { %v1992_v15 = vpop.f32.mrf.mxu2 }
 0x1f5   : > { %v2041_v35 = vpop.f32.mrf.mxu3  ;;  %v1993_v18 = vadd.f32 %v1992_v15, %v1944_v0  ;;  %v1897_v33 = vpop.f32.mrf.mxu0 }
 0x1f6   : > { %v1946_v41 = vpop.f32.mrf.mxu1  ;;  %v1898_v47 = vadd.f32 %v1897_v33, %v7363_v4 }
 0x1f7   : > { %v2042_v5 = vadd.f32 %v2041_v35, %v1993_v18 }
 0x1f8   : > { %v1947_v51 = vadd.f32 %v1946_v41, %v1898_v47  ;;  %2092 = vmatmul.bf16.gmra.mxu0 %v7008_v60 }
 0x1f9   : > { %2141 = vmatmul.bf16.gmra.mxu1 %v7010_v37  ;;  %v2491_v53 = vmax.f32 %v2042_v5, 0.0  ;;  %2190 = vmatmul.bf16.gmra.mxu2 %v7014_v62 }
 0x1fa   : > { %2239 = vmatmul.bf16.gmra.mxu3 %v7016_v3 }
 0x1fb   : > { %v7562_v12 = vpack.c.bf16 %v2491_v53, %v2487_v19 }
 0x1fc   : > { %v1995_v13 = vpop.f32.mrf.mxu2 }
 0x1fd   : > { %v2044_v36 = vpop.f32.mrf.mxu3  ;;  %v1996_v11 = vadd.f32 %v1995_v13, %v1947_v51  ;;  %v1899_v0 = vpop.f32.mrf.mxu0  ;;  %v5619_v13 = vld [vmem:[%s8884_s5 + $0x2e0] sm:$0xf] }
 0x1fe   : > { %v1948_v1 = vpop.f32.mrf.mxu1  ;;  %v1900_v35 = vadd.f32 %v1899_v0, %v7363_v4 }
 0x1ff   : > { %v2045_v24 = vadd.f32 %v2044_v36, %v1996_v11  ;;  %v6113_v36 = vld [vmem:[%s8884_s5 + $0x2ec] sm:$0xf0] }
 0x200   : > { %v1949_v38 = vadd.f32 %v1948_v1, %v1900_v35  ;;  %v5620_v1 = vor.u32 %v6113_v36, %v5619_v13  ;;  %v6081_v36 = vld [vmem:[%s8884_s5 + $0x1ec] sm:$0xf0] }
 0x201   : > { %v2495_v51 = vmax.f32 %v2045_v24, 0.0 }
 0x202   : > { %3418 = vmatpush.bf16.msra.mxu2 %v5620_v1 }
 0x204   : > { %v1997_v15 = vpop.f32.mrf.mxu2 }
 0x205   : > { %v2046_v18 = vpop.f32.mrf.mxu3  ;;  %v1998_v33 = vadd.f32 %v1997_v15, %v1949_v38  ;;  %v1902_v7 = vpop.f32.mrf.mxu0 }
 0x206   : > { %v1951_v41 = vpop.f32.mrf.mxu1  ;;  %v1903_v47 = vadd.f32 %v1902_v7, %v7363_v4  ;;  %v7582_v7 = vld [vmem:[%s8883_s4] sm:$0xf] }
 0x207   : > { %v2047_v5 = vadd.f32 %v2046_v18, %v1998_v33 }
 0x208   : > { %v1952_v54 = vadd.f32 %v1951_v41, %v1903_v47  ;;  %2097 = vmatmul.bf16.gmra.mxu0 %v7064_v14  ;;  %v7585_v41 = vperm.slane %v7582_v7, 2  ;;  %v5363_v47 = vld [vmem:[%s8884_s5 + $0xe0] sm:$0xf] }
 0x209   : > { %2146 = vmatmul.bf16.gmra.mxu1 %v7066_v31  ;;  %v2499_v19 = vmax.f32 %v2047_v5, 0.0  ;;  %2195 = vmatmul.bf16.gmra.mxu2 %v7068_v16  ;;  %v5747_v5 = vld [vmem:[%s8884_s5 + $0x3e0] sm:$0xf] }
 0x20a   : > { %2244 = vmatmul.bf16.gmra.mxu3 %v7070_v17 }
 0x20b   : > { %v7570_v53 = vpack.c.bf16 %v2499_v19, %v2495_v51  ;;  %v6145_v51 = vld [vmem:[%s8884_s5 + $0x3ec] sm:$0xf0]  ;;  %v5491_v19 = vld [vmem:[%s8884_s5 + $0x1e0] sm:$0xf] }
 0x20c   : > { %v2000_v11 = vpop.f32.mrf.mxu2  ;;  %v5748_v13 = vor.u32 %v6145_v51, %v5747_v5  ;;  %v5492_v1 = vor.u32 %v6081_v36, %v5491_v19  ;;  %v6109_v19 = vld [vmem:[%s8884_s5 + $0x2cc] sm:$0xf0] }
 0x20d   : > { %v2049_v0 = vpop.f32.mrf.mxu3  ;;  %v2001_v35 = vadd.f32 %v2000_v11, %v1952_v54  ;;  %v1904_v24 = vpop.f32.mrf.mxu0  ;;  %v6049_v54 = vld [vmem:[%s8884_s5 + $0xec] sm:$0xf0] }
 0x20e   : > { %v1953_v38 = vpop.f32.mrf.mxu1  ;;  %v1905_v15 = vadd.f32 %v1904_v24, %v7363_v4  ;;  %v5364_v4 = vor.u32 %v6049_v54, %v5363_v47  ;;  %3467 = vmatpush.bf16.msra.mxu3 %v5748_v13  ;;  %3369 = vmatpush.bf16.msra.mxu1 %v5492_v1  ;;  %v5347_v1 = vld [vmem:[%s8884_s5 + $0xc0] sm:$0xf] }
 0x20f   : > { %v2050_v18 = vadd.f32 %v2049_v0, %v2001_v35 }
 0x210   : > { %v1954_v33 = vadd.f32 %v1953_v38, %v1905_v15  ;;  %3320 = vmatpush.bf16.msra.mxu0 %v5364_v4 }
 0x211   : > { %v2503_v5 = vmax.f32 %v2050_v18, 0.0 }
 0x214   : > { %v2002_v11 = vpop.f32.mrf.mxu2 }
 0x215   : > { %v2051_v0 = vpop.f32.mrf.mxu3  ;;  %v2003_v35 = vadd.f32 %v2002_v11, %v1954_v33  ;;  %v2063_v24 = vpop.f32.mrf.mxu0  ;;  %v5603_v33 = vld [vmem:[%s8884_s5 + $0x2c0] sm:$0xf] }
 0x216   : > { %v2112_v38 = vpop.f32.mrf.mxu1  ;;  %v2064_v15 = vadd.f32 %v2063_v24, %v7585_v41  ;;  %v5604_v36 = vor.u32 %v6109_v19, %v5603_v33 }
 0x217   : > { %v2052_v47 = vadd.f32 %v2051_v0, %v2003_v35  ;;  %v6045_v35 = vld [vmem:[%s8884_s5 + $0xcc] sm:$0xf0] }
 0x218   : > { %v2113_v54 = vadd.f32 %v2112_v38, %v2064_v15  ;;  %2258 = vmatmul.bf16.vlgmr.msrb.gmra.mxu0 %v6639_v42  ;;  %3419 = vmatpush.bf16.msra.mxu2 %v5604_v36  ;;  %v5348_v24 = vor.u32 %v6045_v35, %v5347_v1  ;;  %v5731_v38 = vld [vmem:[%s8884_s5 + $0x3c0] sm:$0xf]  ;;  %v6141_v15 = vld [vmem:[%s8884_s5 + $0x3cc] sm:$0xf0] }
 0x219   : > { %2307 = vmatmul.bf16.vlgmr.msrb.gmra.mxu1 %v6641_v43  ;;  %v2507_v51 = vmax.f32 %v2052_v47, 0.0  ;;  %2356 = vmatmul.bf16.vlgmr.msrb.gmra.mxu2 %v6643_v44  ;;  %v5475_v47 = vld [vmem:[%s8884_s5 + $0x1c0] sm:$0xf] }
 0x21a   : > { %2405 = vmatmul.bf16.vlgmr.msrb.gmra.mxu3 %v6645_v45  ;;  %3321 = vmatpush.bf16.msra.mxu0 %v5348_v24  ;;  %v6105_v24 = vld [vmem:[%s8884_s5 + $0x2ac] sm:$0xf0] }
 0x21b   : > { %v7610_v4 = vpack.c.bf16 %v2507_v51, %v2503_v5  ;;  %v6077_v5 = vld [vmem:[%s8884_s5 + $0x1cc] sm:$0xf0] }
 0x21c   : > { %v2161_v13 = vpop.f32.mrf.mxu2  ;;  %v5476_v19 = vor.u32 %v6077_v5, %v5475_v47  ;;  %v5331_v5 = vld [vmem:[%s8884_s5 + $0xa0] sm:$0xf] }
 0x21d   : > { %v2210_v42 = vpop.f32.mrf.mxu3  ;;  %v2162_v43 = vadd.f32 %v2161_v13, %v2113_v54  ;;  %v2065_v18 = vpop.f32.mrf.mxu0  ;;  %v5732_v54 = vor.u32 %v6141_v15, %v5731_v38 }
 0x21e   : > { %v2114_v11 = vpop.f32.mrf.mxu1  ;;  %v2066_v44 = vadd.f32 %v2065_v18, %v7585_v41  ;;  %3370 = vmatpush.bf16.msra.mxu1 %v5476_v19  ;;  %v5715_v19 = vld [vmem:[%s8884_s5 + $0x3a0] sm:$0xf] }
 0x21f   : > { %v2211_v45 = vadd.f32 %v2210_v42, %v2162_v43  ;;  %3468 = vmatpush.bf16.msra.mxu3 %v5732_v54 }
 0x220   : > { %v2115_v0 = vadd.f32 %v2114_v11, %v2066_v44 }
 0x221   : > { %v2448_v44 = vmax.f32 %v2211_v45, 0.0 }
 0x224   : > { %v2163_v51 = vpop.f32.mrf.mxu2 }
 0x225   : > { %v2212_v33 = vpop.f32.mrf.mxu3  ;;  %v2164_v13 = vadd.f32 %v2163_v51, %v2115_v0  ;;  %v2068_v42 = vpop.f32.mrf.mxu0  ;;  %v5587_v0 = vld [vmem:[%s8884_s5 + $0x2a0] sm:$0xf]  ;;  %v6041_v51 = vld [vmem:[%s8884_s5 + $0xac] sm:$0xf0] }
 0x226   : > { %v2117_v36 = vpop.f32.mrf.mxu1  ;;  %v2069_v43 = vadd.f32 %v2068_v42, %v7585_v41  ;;  %v5588_v15 = vor.u32 %v6105_v24, %v5587_v0  ;;  %v5459_v42 = vld [vmem:[%s8884_s5 + $0x1a0] sm:$0xf] }
 0x227   : > { %v2213_v18 = vadd.f32 %v2212_v33, %v2164_v13  ;;  %v5332_v33 = vor.u32 %v6041_v51, %v5331_v5  ;;  %v6137_v13 = vld [vmem:[%s8884_s5 + $0x3ac] sm:$0xf0] }
 0x228   : > { %v2118_v11 = vadd.f32 %v2117_v36, %v2069_v43  ;;  %2263 = vmatmul.bf16.gmra.mxu0 %v6704_v55  ;;  %3420 = vmatpush.bf16.msra.mxu2 %v5588_v15  ;;  %v5716_v36 = vor.u32 %v6137_v13, %v5715_v19  ;;  %v6073_v43 = vld [vmem:[%s8884_s5 + $0x1ac] sm:$0xf0]  ;;  %v5315_v13 = vld [vmem:[%s8884_s5 + $0x80] sm:$0xf] }
 0x229   : > { %2312 = vmatmul.bf16.gmra.mxu1 %v6706_v56  ;;  %v2452_v1 = vmax.f32 %v2213_v18, 0.0  ;;  %2361 = vmatmul.bf16.gmra.mxu2 %v6709_v57 }
 0x22a   : > { %2410 = vmatmul.bf16.gmra.mxu3 %v6711_v58  ;;  %3322 = vmatpush.bf16.msra.mxu0 %v5332_v33 }
 0x22b   : > { %v7642_v35 = vpack.c.bf16 %v2452_v1, %v2448_v44  ;;  %v5460_v44 = vor.u32 %v6073_v43, %v5459_v42  ;;  %3469 = vmatpush.bf16.msra.mxu3 %v5716_v36  ;;  %v6037_v42 = vld [vmem:[%s8884_s5 + $0x8c] sm:$0xf0]  ;;  %v5699_v43 = vld [vmem:[%s8884_s5 + $0x380] sm:$0xf] }
 0x22c   : > { %v2166_v38 = vpop.f32.mrf.mxu2  ;;  %v5316_v36 = vor.u32 %v6037_v42, %v5315_v13  ;;  %v5299_v42 = vld [vmem:[%s8884_s5 + $0x60] sm:$0xf] }
 0x22d   : > { %v2215_v55 = vpop.f32.mrf.mxu3  ;;  %v2167_v56 = vadd.f32 %v2166_v38, %v2118_v11  ;;  %v2070_v45 = vpop.f32.mrf.mxu0  ;;  %3371 = vmatpush.bf16.msra.mxu1 %v5460_v44 }
 0x22e   : > { %v2119_v47 = vpop.f32.mrf.mxu1  ;;  %v2071_v57 = vadd.f32 %v2070_v45, %v7585_v41  ;;  %3323 = vmatpush.bf16.msra.mxu0 %v5316_v36  ;;  %v6033_v36 = vld [vmem:[%s8884_s5 + $0x6c] sm:$0xf0] }
 0x22f   : > { %v2216_v58 = vadd.f32 %v2215_v55, %v2167_v56 }
 0x230   : > { %v2120_v54 = vadd.f32 %v2119_v47, %v2071_v57  ;;  %v5571_v57 = vld [vmem:[%s8884_s5 + $0x280] sm:$0xf] }
 0x231   : > { %v2456_v56 = vmax.f32 %v2216_v58, 0.0 }
 0x234   : > { %v2168_v18 = vpop.f32.mrf.mxu2 }
 0x235   : > { %v2217_v11 = vpop.f32.mrf.mxu3  ;;  %v2169_v1 = vadd.f32 %v2168_v18, %v2120_v54  ;;  %v2073_v0 = vpop.f32.mrf.mxu0  ;;  %v6101_v54 = vld [vmem:[%s8884_s5 + $0x28c] sm:$0xf0] }
 0x236   : > { %v2122_v24 = vpop.f32.mrf.mxu1  ;;  %v2074_v38 = vadd.f32 %v2073_v0, %v7585_v41  ;;  %v5572_v51 = vor.u32 %v6101_v54, %v5571_v57  ;;  %v6133_v18 = vld [vmem:[%s8884_s5 + $0x38c] sm:$0xf0] }
 0x237   : > { %v2218_v55 = vadd.f32 %v2217_v11, %v2169_v1  ;;  %v5443_v11 = vld [vmem:[%s8884_s5 + $0x180] sm:$0xf]  ;;  %v5700_v44 = vor.u32 %v6133_v18, %v5699_v43  ;;  %v6069_v1 = vld [vmem:[%s8884_s5 + $0x18c] sm:$0xf0]  ;;  %v5300_v43 = vor.u32 %v6033_v36, %v5299_v42 }
 0x238   : > { %v2123_v15 = vadd.f32 %v2122_v24, %v2074_v38  ;;  %2268 = vmatmul.bf16.gmra.mxu0 %v6769_v8  ;;  %3421 = vmatpush.bf16.msra.mxu2 %v5572_v51  ;;  %v5444_v38 = vor.u32 %v6069_v1, %v5443_v11  ;;  %v5683_v18 = vld [vmem:[%s8884_s5 + $0x360] sm:$0xf]  ;;  %v6129_v11 = vld [vmem:[%s8884_s5 + $0x36c] sm:$0xf0] }
 0x239   : > { %2317 = vmatmul.bf16.gmra.mxu1 %v6771_v9  ;;  %v2460_v45 = vmax.f32 %v2218_v55, 0.0  ;;  %2366 = vmatmul.bf16.gmra.mxu2 %v6775_v20  ;;  %v5684_v1 = vor.u32 %v6129_v11, %v5683_v18  ;;  %v5667_v36 = vld [vmem:[%s8884_s5 + $0x340] sm:$0xf] }
 0x23a   : > { %2415 = vmatmul.bf16.gmra.mxu3 %v6777_v21  ;;  %3372 = vmatpush.bf16.msra.mxu1 %v5444_v38  ;;  %v5411_v18 = vld [vmem:[%s8884_s5 + $0x140] sm:$0xf] }
 0x23b   : > { %v7674_v47 = vpack.c.bf16 %v2460_v45, %v2456_v56  ;;  %3470 = vmatpush.bf16.msra.mxu3 %v5700_v44  ;;  %v5427_v44 = vld [vmem:[%s8884_s5 + $0x160] sm:$0xf]  ;;  %3324 = vmatpush.bf16.msra.mxu0 %v5300_v43  ;;  %v6125_v43 = vld [vmem:[%s8884_s5 + $0x34c] sm:$0xf0] }
 0x23c   : > { %v2171_v5 = vpop.f32.mrf.mxu2  ;;  %v5668_v11 = vor.u32 %v6125_v43, %v5667_v36 }
 0x23d   : > { %v2220_v8 = vpop.f32.mrf.mxu3  ;;  %v2172_v9 = vadd.f32 %v2171_v5, %v2123_v15  ;;  %v2075_v58 = vpop.f32.mrf.mxu0 }
 0x23e   : > { %v2124_v33 = vpop.f32.mrf.mxu1  ;;  %v2076_v20 = vadd.f32 %v2075_v58, %v7585_v41  ;;  %v6097_v58 = vld [vmem:[%s8884_s5 + $0x26c] sm:$0xf0] }
 0x23f   : > { %v2221_v21 = vadd.f32 %v2220_v8, %v2172_v9  ;;  %v5555_v9 = vld [vmem:[%s8884_s5 + $0x260] sm:$0xf]  ;;  %3471 = vmatpush.bf16.msra.mxu3 %v5684_v1 }
 0x240   : > { %v2125_v19 = vadd.f32 %v2124_v33, %v2076_v20  ;;  %v5556_v20 = vor.u32 %v6097_v58, %v5555_v9 }
 0x241   : > { %v2464_v5 = vmax.f32 %v2221_v21, 0.0 }
 0x242   : > { %3422 = vmatpush.bf16.msra.mxu2 %v5556_v20 }
 0x243   : > { %3472 = vmatpush.bf16.msra.mxu3 %v5668_v11 }
 0x244   : > { %v2173_v0 = vpop.f32.mrf.mxu2 }
 0x245   : > { %v2222_v24 = vpop.f32.mrf.mxu3  ;;  %v2174_v55 = vadd.f32 %v2173_v0, %v2125_v19  ;;  %v2078_v15 = vpop.f32.mrf.mxu0  ;;  %v6065_v0 = vld [vmem:[%s8884_s5 + $0x16c] sm:$0xf0] }
 0x246   : > { %v2127_v56 = vpop.f32.mrf.mxu1  ;;  %v2079_v45 = vadd.f32 %v2078_v15, %v7585_v41 }
 0x247   : > { %v2223_v57 = vadd.f32 %v2222_v24, %v2174_v55  ;;  %v5428_v55 = vor.u32 %v6065_v0, %v5427_v44  ;;  %v6061_v44 = vld [vmem:[%s8884_s5 + $0x14c] sm:$0xf0] }
 0x248   : > { %v2128_v54 = vadd.f32 %v2127_v56, %v2079_v45  ;;  %2273 = vmatmul.bf16.gmra.mxu0 %v6832_v40 }
 0x249   : > { %2322 = vmatmul.bf16.gmra.mxu1 %v6834_v46  ;;  %v2468_v8 = vmax.f32 %v2223_v57, 0.0  ;;  %2371 = vmatmul.bf16.gmra.mxu2 %v6838_v49 }
 0x24a   : > { %2420 = vmatmul.bf16.gmra.mxu3 %v6840_v50  ;;  %3373 = vmatpush.bf16.msra.mxu1 %v5428_v55 }
 0x24b   : > { %v7706_v51 = vpack.c.bf16 %v2468_v8, %v2464_v5 }
 0x24c   : > { %v2176_v33 = vpop.f32.mrf.mxu2 }
 0x24d   : > { %v2225_v40 = vpop.f32.mrf.mxu3  ;;  %v2177_v46 = vadd.f32 %v2176_v33, %v2128_v54  ;;  %v2080_v21 = vpop.f32.mrf.mxu0  ;;  %v5539_v33 = vld [vmem:[%s8884_s5 + $0x240] sm:$0xf] }
 0x24e   : > { %v2129_v19 = vpop.f32.mrf.mxu1  ;;  %v2081_v49 = vadd.f32 %v2080_v21, %v7585_v41 }
 0x24f   : > { %v2226_v50 = vadd.f32 %v2225_v40, %v2177_v46  ;;  %v6093_v40 = vld [vmem:[%s8884_s5 + $0x24c] sm:$0xf0] }
 0x250   : > { %v2130_v13 = vadd.f32 %v2129_v19, %v2081_v49  ;;  %v5540_v46 = vor.u32 %v6093_v40, %v5539_v33  ;;  %v6089_v33 = vld [vmem:[%s8884_s5 + $0x22c] sm:$0xf0] }
 0x251   : > { %v2472_v8 = vmax.f32 %v2226_v50, 0.0  ;;  %v5283_v50 = vld [vmem:[%s8884_s5 + $0x40] sm:$0xf] }
 0x252   : > { %3423 = vmatpush.bf16.msra.mxu2 %v5540_v46 }
 0x254   : > { %v2178_v24 = vpop.f32.mrf.mxu2 }
 0x255   : > { %v2227_v38 = vpop.f32.mrf.mxu3  ;;  %v2179_v15 = vadd.f32 %v2178_v24, %v2130_v13  ;;  %v2083_v56 = vpop.f32.mrf.mxu0  ;;  %v6029_v13 = vld [vmem:[%s8884_s5 + $0x4c] sm:$0xf0]  ;;  %v5412_v24 = vor.u32 %v6061_v44, %v5411_v18 }
 0x256   : > { %v2132_v45 = vpop.f32.mrf.mxu1  ;;  %v2084_v57 = vadd.f32 %v2083_v56, %v7585_v41  ;;  %v5284_v42 = vor.u32 %v6029_v13, %v5283_v50  ;;  %v5395_v50 = vld [vmem:[%s8884_s5 + $0x120] sm:$0xf] }
 0x257   : > { %v2228_v54 = vadd.f32 %v2227_v38, %v2179_v15  ;;  %3374 = vmatpush.bf16.msra.mxu1 %v5412_v24  ;;  %v5251_v24 = vld [vmem:[%s8884_s5] sm:$0xf] }
 0x258   : > { %v2133_v5 = vadd.f32 %v2132_v45, %v2084_v57  ;;  %2278 = vmatmul.bf16.gmra.mxu0 %v6892_v25 }
 0x259   : > { %2327 = vmatmul.bf16.gmra.mxu1 %v6894_v26  ;;  %v2476_v9 = vmax.f32 %v2228_v54, 0.0  ;;  %2376 = vmatmul.bf16.gmra.mxu2 %v6898_v27 }
 0x25a   : > { %2425 = vmatmul.bf16.gmra.mxu3 %v8894_v61  ;;  %3325 = vmatpush.bf16.msra.mxu0 %v5284_v42  ;;  %v6057_v42 = vld [vmem:[%s8884_s5 + $0x12c] sm:$0xf0] }
 0x25b   : > { %v7738_v58 = vpack.c.bf16 %v2476_v9, %v2472_v8  ;;  %v5523_v9 = vld [vmem:[%s8884_s5 + $0x220] sm:$0xf]  ;;  %v5396_v18 = vor.u32 %v6057_v42, %v5395_v50 }
 0x25c   : > { %v2181_v20 = vpop.f32.mrf.mxu2 }
 0x25d   : > { %v2230_v25 = vpop.f32.mrf.mxu3  ;;  %v2182_v26 = vadd.f32 %v2181_v20, %v2133_v5  ;;  %v2085_v21 = vpop.f32.mrf.mxu0  ;;  %v5524_v20 = vor.u32 %v6089_v33, %v5523_v9  ;;  %3375 = vmatpush.bf16.msra.mxu1 %v5396_v18 }
 0x25e   : > { %v2134_v19 = vpop.f32.mrf.mxu1  ;;  %v2086_v27 = vadd.f32 %v2085_v21, %v7585_v41  ;;  %v5267_v21 = vld [vmem:[%s8884_s5 + $0x20] sm:$0xf] }
 0x25f   : > { %v2231_v61 = vadd.f32 %v2230_v25, %v2182_v26  ;;  %3424 = vmatpush.bf16.msra.mxu2 %v5524_v20 }
 0x260   : > { %v2135_v49 = vadd.f32 %v2134_v19, %v2086_v27  ;;  %v6025_v19 = vld [vmem:[%s8884_s5 + $0x2c] sm:$0xf0] }
 0x261   : > { %v2480_v54 = vmax.f32 %v2231_v61, 0.0  ;;  %v5268_v27 = vor.u32 %v6025_v19, %v5267_v21  ;;  %v5651_v61 = vld [vmem:[%s8884_s5 + $0x320] sm:$0xf] }
 0x263   : > { %3326 = vmatpush.bf16.msra.mxu0 %v5268_v27 }
 0x264   : > { %v2183_v1 = vpop.f32.mrf.mxu2 }
 0x265   : > { %v2232_v0 = vpop.f32.mrf.mxu3  ;;  %v2184_v38 = vadd.f32 %v2183_v1, %v2135_v49  ;;  %v2088_v55 = vpop.f32.mrf.mxu0  ;;  %v6121_v49 = vld [vmem:[%s8884_s5 + $0x32c] sm:$0xf0] }
 0x266   : > { %v2137_v15 = vpop.f32.mrf.mxu1  ;;  %v2089_v56 = vadd.f32 %v2088_v55, %v7585_v41  ;;  %v5652_v13 = vor.u32 %v6121_v49, %v5651_v61  ;;  %v5379_v55 = vld [vmem:[%s8884_s5 + $0x100] sm:$0xf] }
 0x267   : > { %v2233_v45 = vadd.f32 %v2232_v0, %v2184_v38  ;;  %v6021_v38 = vld [vmem:[%s8884_s5 + $0xc] sm:$0xf0] }
 0x268   : > { %v2138_v57 = vadd.f32 %v2137_v15, %v2089_v56  ;;  %2283 = vmatmul.bf16.gmra.mxu0 %v6952_v22  ;;  %3473 = vmatpush.bf16.msra.mxu3 %v5652_v13  ;;  %v5252_v56 = vor.u32 %v6021_v38, %v5251_v24 }
 0x269   : > { %2332 = vmatmul.bf16.gmra.mxu1 %v6954_v34  ;;  %v2484_v5 = vmax.f32 %v2233_v45, 0.0  ;;  %2381 = vmatmul.bf16.gmra.mxu2 %v6958_v23  ;;  %v6053_v45 = vld [vmem:[%s8884_s5 + $0x10c] sm:$0xf0] }
 0x26a   : > { %2430 = vmatmul.bf16.gmra.mxu3 %v6960_v48  ;;  %v5380_v9 = vor.u32 %v6053_v45, %v5379_v55  ;;  %3327 = vmatpush.bf16.msra.mxu0 %v5252_v56  ;;  %v6047_v56 = vld [vmem:[%s8884_s5 + $0xe4] sm:$0xf]  ;;  %v5365_v45 = vld [vmem:[%s8884_s5 + $0xf0] sm:$0xf0] }
 0x26b   : > { %v7770_v8 = vpack.c.bf16 %v2484_v5, %v2480_v54  ;;  %v6085_v54 = vld [vmem:[%s8884_s5 + $0x20c] sm:$0xf0] }
 0x26c   : > { %v2186_v40 = vpop.f32.mrf.mxu2  ;;  %3376 = vmatpush.bf16.msra.mxu1 %v5380_v9 }
 0x26d   : > { %v2235_v22 = vpop.f32.mrf.mxu3  ;;  %v2187_v34 = vadd.f32 %v2186_v40, %v2138_v57  ;;  %v2090_v25 = vpop.f32.mrf.mxu0  ;;  %v5507_v57 = vld [vmem:[%s8884_s5 + $0x200] sm:$0xf] }
 0x26e   : > { %v2139_v46 = vpop.f32.mrf.mxu1  ;;  %v2091_v23 = vadd.f32 %v2090_v25, %v7585_v41  ;;  %v5508_v33 = vor.u32 %v6085_v54, %v5507_v57  ;;  %v5368_v57 = vor.u32 %v6047_v56, %v5365_v45  ;;  %v6143_v54 = vld [vmem:[%s8884_s5 + $0x3e4] sm:$0xf] }
 0x26f   : > { %v2236_v48 = vadd.f32 %v2235_v22, %v2187_v34 }
 0x270   : > { %v2140_v26 = vadd.f32 %v2139_v46, %v2091_v23  ;;  %3425 = vmatpush.bf16.msra.mxu2 %v5508_v33  ;;  %v5493_v33 = vld [vmem:[%s8884_s5 + $0x1f0] sm:$0xf0]  ;;  %3516 = vmatpush.bf16.msrb.mxu0 %v5368_v57 }
 0x271   : > { %v2488_v40 = vmax.f32 %v2236_v48, 0.0 }
 0x274   : > { %v2188_v36 = vpop.f32.mrf.mxu2 }
 0x275   : > { %v2237_v43 = vpop.f32.mrf.mxu3  ;;  %v2189_v11 = vadd.f32 %v2188_v36, %v2140_v26  ;;  %v2093_v44 = vpop.f32.mrf.mxu0 }
 0x276   : > { %v2142_v1 = vpop.f32.mrf.mxu1  ;;  %v2094_v0 = vadd.f32 %v2093_v44, %v7585_v41  ;;  %v6111_v44 = vld [vmem:[%s8884_s5 + $0x2e4] sm:$0xf] }
 0x277   : > { %v2238_v15 = vadd.f32 %v2237_v43, %v2189_v11 }
 0x278   : > { %v2143_v5 = vadd.f32 %v2142_v1, %v2094_v0  ;;  %2288 = vmatmul.bf16.gmra.mxu0 %v7008_v60  ;;  %v5621_v1 = vld [vmem:[%s8884_s5 + $0x2f0] sm:$0xf0] }
 0x279   : > { %2337 = vmatmul.bf16.gmra.mxu1 %v7010_v37  ;;  %v2492_v22 = vmax.f32 %v2238_v15, 0.0  ;;  %2386 = vmatmul.bf16.gmra.mxu2 %v7014_v62  ;;  %v5635_v62 = vld [vmem:[%s8884_s5 + $0x300] sm:$0xf]  ;;  %v5624_v24 = vor.u32 %v6111_v44, %v5621_v1  ;;  %v6139_v1 = vld [vmem:[%s8884_s5 + $0x3c4] sm:$0xf] }
 0x27a   : > { %2435 = vmatmul.bf16.gmra.mxu3 %v7016_v3  ;;  %v6117_v3 = vld [vmem:[%s8884_s5 + $0x30c] sm:$0xf0] }
 0x27b   : > { %v7820_v20 = vpack.c.bf16 %v2492_v22, %v2488_v40  ;;  %v5636_v48 = vor.u32 %v6117_v3, %v5635_v62  ;;  %3614 = vmatpush.bf16.msrb.mxu2 %v5624_v24 }
 0x27c   : > { %v2191_v34 = vpop.f32.mrf.mxu2 }
 0x27d   : > { %v2240_v25 = vpop.f32.mrf.mxu3  ;;  %v2192_v46 = vadd.f32 %v2191_v34, %v2143_v5  ;;  %v2095_v23 = vpop.f32.mrf.mxu0  ;;  %3474 = vmatpush.bf16.msra.mxu3 %v5636_v48  ;;  %v6079_v5 = vld [vmem:[%s8884_s5 + $0x1e4] sm:$0xf] }
 0x27e   : > { %v2144_v60 = vpop.f32.mrf.mxu1  ;;  %v2096_v37 = vadd.f32 %v2095_v23, %v7585_v41  ;;  %v5496_v34 = vor.u32 %v6079_v5, %v5493_v33  ;;  %v6107_v48 = vld [vmem:[%s8884_s5 + $0x2c4] sm:$0xf] }
 0x27f   : > { %v2241_v26 = vadd.f32 %v2240_v25, %v2192_v46 }
 0x280   : > { %v2145_v21 = vadd.f32 %v2144_v60, %v2096_v37  ;;  %3565 = vmatpush.bf16.msrb.mxu1 %v5496_v34  ;;  %v7862_v37 = vperm.slane %v7582_v7, 3  ;;  %v5605_v7 = vld [vmem:[%s8884_s5 + $0x2d0] sm:$0xf0] }
 0x281   : > { %v2496_v43 = vmax.f32 %v2241_v26, 0.0 }
 0x284   : > { %v2193_v19 = vpop.f32.mrf.mxu2 }
 0x285   : > { %v2242_v27 = vpop.f32.mrf.mxu3  ;;  %v2194_v61 = vadd.f32 %v2193_v19, %v2145_v21  ;;  %v2098_v49 = vpop.f32.mrf.mxu0 }
 0x286   : > { %v2147_v50 = vpop.f32.mrf.mxu1  ;;  %v2099_v13 = vadd.f32 %v2098_v49, %v7585_v41 }
 0x287   : > { %v2243_v42 = vadd.f32 %v2242_v27, %v2194_v61  ;;  %v5608_v61 = vor.u32 %v6107_v48, %v5605_v7  ;;  %v6039_v48 = vld [vmem:[%s8884_s5 + $0xa4] sm:$0xf]  ;;  %v5333_v7 = vld [vmem:[%s8884_s5 + $0xb0] sm:$0xf0] }
 0x288   : > { %v2148_v36 = vadd.f32 %v2147_v50, %v2099_v13  ;;  %2293 = vmatmul.bf16.gmra.mxu0 %v7064_v14 }
 0x289   : > { %2342 = vmatmul.bf16.gmra.mxu1 %v7066_v31  ;;  %v2500_v18 = vmax.f32 %v2243_v42, 0.0  ;;  %2391 = vmatmul.bf16.gmra.mxu2 %v7068_v16 }
 0x28a   : > { %2440 = vmatmul.bf16.gmra.mxu3 %v7070_v17  ;;  %3615 = vmatpush.bf16.msrb.mxu2 %v5608_v61  ;;  %v5717_v61 = vld [vmem:[%s8884_s5 + $0x3b0] sm:$0xf0] }
 0x28b   : > { %v7834_v11 = vpack.c.bf16 %v2500_v18, %v2496_v43  ;;  %v6043_v43 = vld [vmem:[%s8884_s5 + $0xc4] sm:$0xf]  ;;  %v5349_v18 = vld [vmem:[%s8884_s5 + $0xd0] sm:$0xf0] }
 0x28c   : > { %v2196_v0 = vpop.f32.mrf.mxu2  ;;  %v5352_v44 = vor.u32 %v6043_v43, %v5349_v18 }
 0x28d   : > { %v2245_v14 = vpop.f32.mrf.mxu3  ;;  %v2197_v31 = vadd.f32 %v2196_v0, %v2148_v36  ;;  %v2100_v38 = vpop.f32.mrf.mxu0  ;;  %v5733_v0 = vld [vmem:[%s8884_s5 + $0x3d0] sm:$0xf0] }
 0x28e   : > { %v2149_v55 = vpop.f32.mrf.mxu1  ;;  %v2101_v16 = vadd.f32 %v2100_v38, %v7585_v41  ;;  %v5749_v41 = vld [vmem:[%s8884_s5 + $0x3f0] sm:$0xf0]  ;;  %3517 = vmatpush.bf16.msrb.mxu0 %v5352_v44 }
 0x28f   : > { %v2246_v17 = vadd.f32 %v2245_v14, %v2197_v31  ;;  %v5752_v9 = vor.u32 %v6143_v54, %v5749_v41  ;;  %v6075_v14 = vld [vmem:[%s8884_s5 + $0x1c4] sm:$0xf]  ;;  %v5736_v31 = vor.u32 %v6139_v1, %v5733_v0  ;;  %v5477_v38 = vld [vmem:[%s8884_s5 + $0x1d0] sm:$0xf0] }
 0x290   : > { %v2150_v15 = vadd.f32 %v2149_v55, %v2101_v16 }
 0x291   : > { %3663 = vmatpush.bf16.msrb.mxu3 %v5752_v9  ;;  %v2504_v26 = vmax.f32 %v2246_v17, 0.0  ;;  %v5480_v17 = vor.u32 %v6075_v14, %v5477_v38 }
 0x293   : > { %3566 = vmatpush.bf16.msrb.mxu1 %v5480_v17  ;;  %v6099_v17 = vld [vmem:[%s8884_s5 + $0x284] sm:$0xf] }
 0x294   : > { %v2198_v40 = vpop.f32.mrf.mxu2 }
 0x295   : > { %v2247_v22 = vpop.f32.mrf.mxu3  ;;  %v2199_v25 = vadd.f32 %v2198_v40, %v2150_v15  ;;  %v2259_v46 = vpop.f32.mrf.mxu0  ;;  %3664 = vmatpush.bf16.msrb.mxu3 %v5736_v31  ;;  %v6103_v40 = vld [vmem:[%s8884_s5 + $0x2a4] sm:$0xf] }
 0x296   : > { %v2308_v23 = vpop.f32.mrf.mxu1  ;;  %v2260_v3 = vadd.f32 %v2259_v46, %v7862_v37 }
 0x297   : > { %v2248_v60 = vadd.f32 %v2247_v22, %v2199_v25  ;;  %v5589_v22 = vld [vmem:[%s8884_s5 + $0x2b0] sm:$0xf0] }
 0x298   : > { %3328 = vmatmul.bf16.vlgmr.msra.gmra.mxu0 %v7143_v59  ;;  %v2309_v13 = vadd.f32 %v2308_v23, %v2260_v3  ;;  %v5592_v46 = vor.u32 %v6103_v40, %v5589_v22  ;;  %v6035_v22 = vld [vmem:[%s8884_s5 + $0x84] sm:$0xf] }
 0x299   : > { %3377 = vmatmul.bf16.vlgmr.msra.gmra.mxu1 %v7402_v30  ;;  %v2508_v21 = vmax.f32 %v2248_v60, 0.0  ;;  %3426 = vmatmul.bf16.vlgmr.msra.gmra.mxu2 %v7642_v35 }
 0x29a   : > { %3616 = vmatpush.bf16.msrb.mxu2 %v5592_v46  ;;  %v6131_v46 = vld [vmem:[%s8884_s5 + $0x384] sm:$0xf] }
 0x29b   : > { %v7867_v62 = vpack.c.bf16 %v2508_v21, %v2504_v26 }
 0x29c   : > { %v2357_v19 = vpop.f32.mrf.mxu2 }
 0x29d   : > { %v2406_v27 = vpop.f32.mrf.mxu3  ;;  %v2261_v49 = vpop.f32.mrf.mxu0  ;;  %v2358_v36 = vadd.f32 %v2357_v19, %v2309_v13  ;;  %v5336_v19 = vor.u32 %v6039_v48, %v5333_v7 }
 0x29e   : > { %v2310_v50 = vpop.f32.mrf.mxu1  ;;  %v2262_v42 = vadd.f32 %v2261_v49, %v7862_v37  ;;  %v6071_v49 = vld [vmem:[%s8884_s5 + $0x1a4] sm:$0xf] }
 0x29f   : > { %v2407_v15 = vadd.f32 %v2406_v27, %v2358_v36  ;;  %v6135_v27 = vld [vmem:[%s8884_s5 + $0x3a4] sm:$0xf]  ;;  %3518 = vmatpush.bf16.msrb.mxu0 %v5336_v19 }
 0x2a0   : > { %v2311_v24 = vadd.f32 %v2310_v50, %v2262_v42  ;;  %v5720_v13 = vor.u32 %v6135_v27, %v5717_v61  ;;  %v5461_v42 = vld [vmem:[%s8884_s5 + $0x1b0] sm:$0xf0] }
 0x2a1   : > { %v2449_v41 = vmax.f32 %v2407_v15, 0.0  ;;  %v5464_v18 = vor.u32 %v6071_v49, %v5461_v42  ;;  %v5573_v15 = vld [vmem:[%s8884_s5 + $0x290] sm:$0xf0] }
 0x2a2   : > { %3665 = vmatpush.bf16.msrb.mxu3 %v5720_v13 }
 0x2a3   : > { %3567 = vmatpush.bf16.msrb.mxu1 %v5464_v18 }
 0x2a4   : > { %v2359_v55 = vpop.f32.mrf.mxu2 }
 0x2a5   : > { %v2408_v16 = vpop.f32.mrf.mxu3  ;;  %v2360_v56 = vadd.f32 %v2359_v55, %v2311_v24  ;;  %v2264_v45 = vpop.f32.mrf.mxu0 }
 0x2a6   : > { %v2313_v57 = vpop.f32.mrf.mxu1  ;;  %v2265_v33 = vadd.f32 %v2264_v45, %v7862_v37 }
 0x2a7   : > { %v2409_v54 = vadd.f32 %v2408_v16, %v2360_v56 }
 0x2a8   : > { %3333 = vmatmul.bf16.gmra.mxu0 %v7175_v63  ;;  %v2314_v26 = vadd.f32 %v2313_v57, %v2265_v33  ;;  %v5576_v57 = vor.u32 %v6099_v17, %v5573_v15 }
 0x2a9   : > { %3382 = vmatmul.bf16.gmra.mxu1 %v7434_v2  ;;  %v2453_v5 = vmax.f32 %v2409_v54, 0.0  ;;  %3431 = vmatmul.bf16.gmra.mxu2 %v7674_v47 }
 0x2aa   : > { %3617 = vmatpush.bf16.msrb.mxu2 %v5576_v57 }
 0x2ab   : > { %v7898_v9 = vpack.c.bf16 %v2453_v5, %v2449_v41 }
 0x2ac   : > { %v2362_v34 = vpop.f32.mrf.mxu2 }
 0x2ad   : > { %v2411_v25 = vpop.f32.mrf.mxu3  ;;  %3475 = vmatmul.bf16.vlgmr.msra.gmra.mxu3 %v7898_v9  ;;  %v2266_v23 = vpop.f32.mrf.mxu0  ;;  %v2363_v3 = vadd.f32 %v2362_v34, %v2314_v26  ;;  %v5317_v34 = vld [vmem:[%s8884_s5 + $0x90] sm:$0xf0] }
 0x2ae   : > { %v2315_v60 = vpop.f32.mrf.mxu1  ;;  %v2267_v21 = vadd.f32 %v2266_v23, %v7862_v37  ;;  %v5701_v23 = vld [vmem:[%s8884_s5 + $0x390] sm:$0xf0] }
 0x2af   : > { %v2412_v44 = vadd.f32 %v2411_v25, %v2363_v3  ;;  %v5320_v25 = vor.u32 %v6035_v22, %v5317_v34  ;;  %v5445_v3 = vld [vmem:[%s8884_s5 + $0x190] sm:$0xf0] }
 0x2b0   : > { %v2316_v50 = vadd.f32 %v2315_v60, %v2267_v21  ;;  %v6067_v60 = vld [vmem:[%s8884_s5 + $0x184] sm:$0xf]  ;;  %v5704_v21 = vor.u32 %v6131_v46, %v5701_v23  ;;  %v5429_v22 = vld [vmem:[%s8884_s5 + $0x170] sm:$0xf0] }
 0x2b1   : > { %v2457_v31 = vmax.f32 %v2412_v44, 0.0  ;;  %3519 = vmatpush.bf16.msrb.mxu0 %v5320_v25  ;;  %v5448_v19 = vor.u32 %v6067_v60, %v5445_v3  ;;  %v6095_v44 = vld [vmem:[%s8884_s5 + $0x264] sm:$0xf] }
 0x2b2   : > { %3666 = vmatpush.bf16.msrb.mxu3 %v5704_v21 }
 0x2b3   : > { %3568 = vmatpush.bf16.msrb.mxu1 %v5448_v19 }
 0x2b4   : > { %v2364_v36 = vpop.f32.mrf.mxu2 }
 0x2b5   : > { %v2413_v43 = vpop.f32.mrf.mxu3  ;;  %v2365_v1 = vadd.f32 %v2364_v36, %v2316_v50  ;;  %v2269_v0 = vpop.f32.mrf.mxu0 }
 0x2b6   : > { %v2318_v14 = vpop.f32.mrf.mxu1  ;;  %v2270_v16 = vadd.f32 %v2269_v0, %v7862_v37 }
 0x2b7   : > { %v2414_v24 = vadd.f32 %v2413_v43, %v2365_v1  ;;  %v5557_v1 = vld [vmem:[%s8884_s5 + $0x270] sm:$0xf0] }
 0x2b8   : > { %3338 = vmatmul.bf16.gmra.mxu0 %v7207_v32  ;;  %v2319_v5 = vadd.f32 %v2318_v14, %v2270_v16 }
 0x2b9   : > { %3387 = vmatmul.bf16.gmra.mxu1 %v7466_v39  ;;  %v2461_v38 = vmax.f32 %v2414_v24, 0.0  ;;  %3436 = vmatmul.bf16.gmra.mxu2 %v7706_v51  ;;  %v5560_v24 = vor.u32 %v6095_v44, %v5557_v1 }
 0x2bb   : > { %v7930_v55 = vpack.c.bf16 %v2461_v38, %v2457_v31  ;;  %3618 = vmatpush.bf16.msrb.mxu2 %v5560_v24  ;;  %v5285_v24 = vld [vmem:[%s8884_s5 + $0x50] sm:$0xf0] }
 0x2bc   : > { %v2367_v56 = vpop.f32.mrf.mxu2 }
 0x2bd   : > { %v2416_v45 = vpop.f32.mrf.mxu3  ;;  %3480 = vmatmul.bf16.gmra.mxu3 %v7930_v55  ;;  %v2271_v54 = vpop.f32.mrf.mxu0  ;;  %v2368_v40 = vadd.f32 %v2367_v56, %v2319_v5  ;;  %v6031_v56 = vld [vmem:[%s8884_s5 + $0x64] sm:$0xf] }
 0x2be   : > { %v2320_v41 = vpop.f32.mrf.mxu1  ;;  %v2272_v33 = vadd.f32 %v2271_v54, %v7862_v37  ;;  %v6127_v54 = vld [vmem:[%s8884_s5 + $0x364] sm:$0xf] }
 0x2bf   : > { %v2417_v27 = vadd.f32 %v2416_v45, %v2368_v40  ;;  %v5301_v45 = vld [vmem:[%s8884_s5 + $0x70] sm:$0xf0]  ;;  %v6063_v5 = vld [vmem:[%s8884_s5 + $0x164] sm:$0xf] }
 0x2c0   : > { %v2321_v26 = vadd.f32 %v2320_v41, %v2272_v33  ;;  %v5304_v57 = vor.u32 %v6031_v56, %v5301_v45  ;;  %v5685_v41 = vld [vmem:[%s8884_s5 + $0x370] sm:$0xf0]  ;;  %v5432_v46 = vor.u32 %v6063_v5, %v5429_v22 }
 0x2c1   : > { %v2465_v42 = vmax.f32 %v2417_v27, 0.0  ;;  %v5688_v40 = vor.u32 %v6127_v54, %v5685_v41  ;;  %v5413_v45 = vld [vmem:[%s8884_s5 + $0x150] sm:$0xf0] }
 0x2c2   : > { %3520 = vmatpush.bf16.msrb.mxu0 %v5304_v57  ;;  %3569 = vmatpush.bf16.msrb.mxu1 %v5432_v46 }
 0x2c3   : > { %3667 = vmatpush.bf16.msrb.mxu3 %v5688_v40 }
 0x2c4   : > { %v2369_v48 = vpop.f32.mrf.mxu2 }
 0x2c5   : > { %v2418_v7 = vpop.f32.mrf.mxu3  ;;  %v2370_v61 = vadd.f32 %v2369_v48, %v2321_v26  ;;  %v2274_v49 = vpop.f32.mrf.mxu0 }
 0x2c6   : > { %v2323_v50 = vpop.f32.mrf.mxu1  ;;  %v2275_v18 = vadd.f32 %v2274_v49, %v7862_v37  ;;  %v5541_v49 = vld [vmem:[%s8884_s5 + $0x250] sm:$0xf0] }
 0x2c7   : > { %v2419_v13 = vadd.f32 %v2418_v7, %v2370_v61  ;;  %v6091_v61 = vld [vmem:[%s8884_s5 + $0x244] sm:$0xf] }
 0x2c8   : > { %3343 = vmatmul.bf16.gmra.mxu0 %v7239_v10  ;;  %v2324_v16 = vadd.f32 %v2323_v50, %v2275_v18 }
 0x2c9   : > { %3392 = vmatmul.bf16.gmra.mxu1 %v7498_v52  ;;  %v2469_v36 = vmax.f32 %v2419_v13, 0.0  ;;  %3441 = vmatmul.bf16.gmra.mxu2 %v7738_v58 }
 0x2cb   : > { %v7962_v43 = vpack.c.bf16 %v2469_v36, %v2465_v42  ;;  %v5544_v42 = vor.u32 %v6091_v61, %v5541_v49 }
 0x2cc   : > { %v2372_v0 = vpop.f32.mrf.mxu2 }
 0x2cd   : > { %v2421_v14 = vpop.f32.mrf.mxu3  ;;  %3485 = vmatmul.bf16.gmra.mxu3 %v7962_v43  ;;  %v2276_v31 = vpop.f32.mrf.mxu0  ;;  %v2373_v15 = vadd.f32 %v2372_v0, %v2324_v16  ;;  %3619 = vmatpush.bf16.msrb.mxu2 %v5544_v42  ;;  %v5669_v16 = vld [vmem:[%s8884_s5 + $0x350] sm:$0xf0]  ;;  %v6023_v42 = vld [vmem:[%s8884_s5 + $0x24] sm:$0xf] }
 0x2ce   : > { %v2325_v38 = vpop.f32.mrf.mxu1  ;;  %v2277_v17 = vadd.f32 %v2276_v31, %v7862_v37 }
 0x2cf   : > { %v2422_v23 = vadd.f32 %v2421_v14, %v2373_v15  ;;  %v6027_v14 = vld [vmem:[%s8884_s5 + $0x44] sm:$0xf] }
 0x2d0   : > { %v2326_v33 = vadd.f32 %v2325_v38, %v2277_v17  ;;  %v5288_v31 = vor.u32 %v6027_v14, %v5285_v24  ;;  %v6123_v38 = vld [vmem:[%s8884_s5 + $0x344] sm:$0xf] }
 0x2d1   : > { %v2473_v48 = vmax.f32 %v2422_v23, 0.0  ;;  %v6059_v17 = vld [vmem:[%s8884_s5 + $0x144] sm:$0xf]  ;;  %v5672_v56 = vor.u32 %v6123_v38, %v5669_v16 }
 0x2d2   : > { %3521 = vmatpush.bf16.msrb.mxu0 %v5288_v31  ;;  %v5416_v41 = vor.u32 %v6059_v17, %v5413_v45  ;;  %v5397_v31 = vld [vmem:[%s8884_s5 + $0x130] sm:$0xf0] }
 0x2d3   : > { %3668 = vmatpush.bf16.msrb.mxu3 %v5672_v56 }
 0x2d4   : > { %v2374_v34 = vpop.f32.mrf.mxu2  ;;  %3570 = vmatpush.bf16.msrb.mxu1 %v5416_v41  ;;  %v5253_v41 = vld [vmem:[%s8884_s5 + $0x10] sm:$0xf0] }
 0x2d5   : > { %v2423_v25 = vpop.f32.mrf.mxu3  ;;  %v2375_v60 = vadd.f32 %v2374_v34, %v2326_v33  ;;  %v2279_v26 = vpop.f32.mrf.mxu0 }
 0x2d6   : > { %v2328_v21 = vpop.f32.mrf.mxu1  ;;  %v2280_v27 = vadd.f32 %v2279_v26, %v7862_v37  ;;  %v6087_v26 = vld [vmem:[%s8884_s5 + $0x224] sm:$0xf] }
 0x2d7   : > { %v2424_v3 = vadd.f32 %v2423_v25, %v2375_v60 }
 0x2d8   : > { %3348 = vmatmul.bf16.gmra.mxu0 %v7271_v28  ;;  %v2329_v44 = vadd.f32 %v2328_v21, %v2280_v27  ;;  %v5525_v21 = vld [vmem:[%s8884_s5 + $0x230] sm:$0xf0] }
 0x2d9   : > { %3397 = vmatmul.bf16.gmra.mxu1 %v7530_v29  ;;  %v2477_v7 = vmax.f32 %v2424_v3, 0.0  ;;  %3446 = vmatmul.bf16.gmra.mxu2 %v7770_v8 }
 0x2db   : > { %v7994_v19 = vpack.c.bf16 %v2477_v7, %v2473_v48  ;;  %v5528_v7 = vor.u32 %v6087_v26, %v5525_v21 }
 0x2dc   : > { %v2377_v50 = vpop.f32.mrf.mxu2 }
 0x2dd   : > { %v2426_v13 = vpop.f32.mrf.mxu3  ;;  %3490 = vmatmul.bf16.gmra.mxu3 %v7994_v19  ;;  %v2281_v36 = vpop.f32.mrf.mxu0  ;;  %v2378_v0 = vadd.f32 %v2377_v50, %v2329_v44  ;;  %3620 = vmatpush.bf16.msrb.mxu2 %v5528_v7  ;;  %v6119_v44 = vld [vmem:[%s8884_s5 + $0x324] sm:$0xf] }
 0x2de   : > { %v2330_v18 = vpop.f32.mrf.mxu1  ;;  %v2282_v1 = vadd.f32 %v2281_v36, %v7862_v37  ;;  %v5269_v36 = vld [vmem:[%s8884_s5 + $0x30] sm:$0xf0] }
 0x2df   : > { %v2427_v5 = vadd.f32 %v2426_v13, %v2378_v0  ;;  %v6055_v0 = vld [vmem:[%s8884_s5 + $0x124] sm:$0xf] }
 0x2e0   : > { %v2331_v15 = vadd.f32 %v2330_v18, %v2282_v1  ;;  %v5272_v18 = vor.u32 %v6023_v42, %v5269_v36  ;;  %v5653_v1 = vld [vmem:[%s8884_s5 + $0x330] sm:$0xf0]  ;;  %v5400_v17 = vor.u32 %v6055_v0, %v5397_v31 }
 0x2e1   : > { %v2481_v25 = vmax.f32 %v2427_v5, 0.0  ;;  %v5656_v24 = vor.u32 %v6119_v44, %v5653_v1  ;;  %v6051_v5 = vld [vmem:[%s8884_s5 + $0x104] sm:$0xf]  ;;  %v5637_v42 = vld [vmem:[%s8884_s5 + $0x310] sm:$0xf0] }
 0x2e2   : > { %3522 = vmatpush.bf16.msrb.mxu0 %v5272_v18  ;;  %3571 = vmatpush.bf16.msrb.mxu1 %v5400_v17 }
 0x2e3   : > { %3669 = vmatpush.bf16.msrb.mxu3 %v5656_v24 }
 0x2e4   : > { %v2379_v57 = vpop.f32.mrf.mxu2 }
 0x2e5   : > { %v2428_v54 = vpop.f32.mrf.mxu3  ;;  %v2380_v33 = vadd.f32 %v2379_v57, %v2331_v15  ;;  %v2284_v40 = vpop.f32.mrf.mxu0 }
 0x2e6   : > { %v2333_v22 = vpop.f32.mrf.mxu1  ;;  %v2285_v60 = vadd.f32 %v2284_v40, %v7862_v37 }
 0x2e7   : > { %v2429_v34 = vadd.f32 %v2428_v54, %v2380_v33  ;;  %v6019_v54 = vld [vmem:[%s8884_s5 + $0x4] sm:$0xf] }
 0x2e8   : > { %3353 = vmatmul.bf16.gmra.mxu0 %v7303_v6  ;;  %v2334_v49 = vadd.f32 %v2333_v22, %v2285_v60  ;;  %v5256_v40 = vor.u32 %v6019_v54, %v5253_v41  ;;  %v5381_v22 = vld [vmem:[%s8884_s5 + $0x110] sm:$0xf0]  ;;  %v6114_v41 = vld [vmem:[%s8884_s5 + $0x2f4] sm:$0xf0] }
 0x2e9   : > { %3402 = vmatmul.bf16.gmra.mxu1 %v7562_v12  ;;  %v2485_v46 = vmax.f32 %v2429_v34, 0.0  ;;  %3451 = vmatmul.bf16.gmra.mxu2 %v7820_v20  ;;  %v6083_v34 = vld [vmem:[%s8884_s5 + $0x204] sm:$0xf]  ;;  %v5509_v60 = vld [vmem:[%s8884_s5 + $0x210] sm:$0xf0] }
 0x2ea   : > { %3523 = vmatpush.bf16.msrb.mxu0 %v5256_v40 }
 0x2eb   : > { %v8026_v23 = vpack.c.bf16 %v2485_v46, %v2481_v25  ;;  %v8897_v25 = vld [vmem:[#allocation2_spill] sm:$0xff]  ;;  %v5384_v46 = vor.u32 %v6051_v5, %v5381_v22 }
 0x2ec   : > { %v2382_v3 = vpop.f32.mrf.mxu2 }
 0x2ed   : > { %v2431_v48 = vpop.f32.mrf.mxu3  ;;  %3495 = vmatmul.bf16.gmra.mxu3 %v8026_v23  ;;  %v2286_v27 = vpop.f32.mrf.mxu0  ;;  %v2383_v13 = vadd.f32 %v2382_v3, %v2334_v49  ;;  %v5512_v3 = vor.u32 %v6083_v34, %v5509_v60  ;;  %3572 = vmatpush.bf16.msrb.mxu1 %v5384_v46 }
 0x2ee   : > { %v2335_v61 = vpop.f32.mrf.mxu1  ;;  %v2287_v50 = vadd.f32 %v2286_v27, %v7862_v37 }
 0x2ef   : > { %v2432_v15 = vadd.f32 %v2431_v48, %v2383_v13  ;;  %3621 = vmatpush.bf16.msrb.mxu2 %v5512_v3  ;;  %v6115_v13 = vld [vmem:[%s8884_s5 + $0x304] sm:$0xf]  ;;  %v5755_v3 = vld [vmem:[%s8884_s5 + $0x3e8] sm:$0xf] }
 0x2f0   : > { %v2336_v14 = vadd.f32 %v2335_v61, %v2287_v50  ;;  %v5640_v36 = vor.u32 %v6115_v13, %v5637_v42  ;;  %v5499_v42 = vld [vmem:[%s8884_s5 + $0x1e8] sm:$0xf] }
 0x2f1   : > { %v2489_v26 = vmax.f32 %v2432_v15, 0.0 }
 0x2f2   : > { %3670 = vmatpush.bf16.msrb.mxu3 %v5640_v36  ;;  %v6082_v36 = vld [vmem:[%s8884_s5 + $0x1f4] sm:$0xf0] }
 0x2f4   : > { %v2384_v38 = vpop.f32.mrf.mxu2 }
 0x2f5   : > { %v2433_v16 = vpop.f32.mrf.mxu3  ;;  %v2385_v56 = vadd.f32 %v2384_v38, %v2336_v14  ;;  %v2289_v45 = vpop.f32.mrf.mxu0 }
 0x2f6   : > { %v2338_v57 = vpop.f32.mrf.mxu1  ;;  %v2290_v7 = vadd.f32 %v2289_v45, %v7862_v37 }
 0x2f7   : > { %v2434_v33 = vadd.f32 %v2433_v16, %v2385_v56  ;;  %v8898_v56 = vld [vmem:[#allocation3_spill] sm:$0xff] }
 0x2f8   : > { %3358 = vmatmul.bf16.gmra.mxu0 %v8897_v25  ;;  %v2339_v18 = vadd.f32 %v2338_v57, %v2290_v7  ;;  %v5627_v57 = vld [vmem:[%s8884_s5 + $0x2e8] sm:$0xf] }
 0x2f9   : > { %3407 = vmatmul.bf16.gmra.mxu1 %v7570_v53  ;;  %v2493_v21 = vmax.f32 %v2434_v33, 0.0  ;;  %3456 = vmatmul.bf16.gmra.mxu2 %v7834_v11  ;;  %v5628_v5 = vor.u32 %v6114_v41, %v5627_v57 }
 0x2fb   : > { %v8076_v48 = vpack.c.bf16 %v2493_v21, %v2489_v26  ;;  %3810 = vmatpush.bf16.msra.mxu2 %v5628_v5  ;;  %v5371_v26 = vld [vmem:[%s8884_s5 + $0xe8] sm:$0xf]  ;;  %v6050_v21 = vld [vmem:[%s8884_s5 + $0xf4] sm:$0xf0] }
 0x2fc   : > { %v2387_v27 = vpop.f32.mrf.mxu2  ;;  %v5372_v7 = vor.u32 %v6050_v21, %v5371_v26  ;;  %v5355_v26 = vld [vmem:[%s8884_s5 + $0xc8] sm:$0xf] }
 0x2fd   : > { %v2436_v61 = vpop.f32.mrf.mxu3  ;;  %3500 = vmatmul.bf16.gmra.mxu3 %v8076_v48  ;;  %v2291_v49 = vpop.f32.mrf.mxu0  ;;  %v2388_v1 = vadd.f32 %v2387_v27, %v2339_v18  ;;  %v6146_v27 = vld [vmem:[%s8884_s5 + $0x3f4] sm:$0xf0] }
 0x2fe   : > { %v2340_v50 = vpop.f32.mrf.mxu1  ;;  %v2292_v44 = vadd.f32 %v2291_v49, %v7862_v37  ;;  %v5756_v13 = vor.u32 %v6146_v27, %v5755_v3  ;;  %3712 = vmatpush.bf16.msra.mxu0 %v5372_v7  ;;  %v6046_v7 = vld [vmem:[%s8884_s5 + $0xd4] sm:$0xf0]  ;;  %v5739_v27 = vld [vmem:[%s8884_s5 + $0x3c8] sm:$0xf] }
 0x2ff   : > { %v2437_v31 = vadd.f32 %v2436_v61, %v2388_v1 }
 0x300   : > { %v2341_v0 = vadd.f32 %v2340_v50, %v2292_v44  ;;  %v8116_v50 = vld [vmem:[%s8885_s6] sm:$0xf]  ;;  %3859 = vmatpush.bf16.msra.mxu3 %v5756_v13  ;;  %v5500_v44 = vor.u32 %v6082_v36, %v5499_v42  ;;  %v5483_v36 = vld [vmem:[%s8884_s5 + $0x1c8] sm:$0xf] }
 0x301   : > { %v2497_v45 = vmax.f32 %v2437_v31, 0.0 }
 0x302   : > { %3761 = vmatpush.bf16.msra.mxu1 %v5500_v44 }
 0x304   : > { %v2389_v14 = vpop.f32.mrf.mxu2 }
 0x305   : > { %v2438_v24 = vpop.f32.mrf.mxu3  ;;  %v2390_v38 = vadd.f32 %v2389_v14, %v2341_v0  ;;  %v2294_v16 = vpop.f32.mrf.mxu0 }
 0x306   : > { %v2343_v17 = vpop.f32.mrf.mxu1  ;;  %v2295_v40 = vadd.f32 %v2294_v16, %v7862_v37 }
 0x307   : > { %v2439_v15 = vadd.f32 %v2438_v24, %v2390_v38 }
 0x308   : > { %3363 = vmatmul.bf16.gmra.mxu0 %v8898_v56  ;;  %v2344_v61 = vadd.f32 %v2343_v17, %v2295_v40 }
 0x309   : > { %3412 = vmatmul.bf16.gmra.mxu1 %v7610_v4  ;;  %v2501_v54 = vmax.f32 %v2439_v15, 0.0  ;;  %3461 = vmatmul.bf16.gmra.mxu2 %v7867_v62 }
 0x30b   : > { %v8096_v33 = vpack.c.bf16 %v2501_v54, %v2497_v45 }
 0x30c   : > { %v2392_v22 = vpop.f32.mrf.mxu2 }
 0x30d   : > { %v2441_v34 = vpop.f32.mrf.mxu3  ;;  %3505 = vmatmul.bf16.gmra.mxu3 %v8096_v33  ;;  %v2296_v46 = vpop.f32.mrf.mxu0  ;;  %v2393_v18 = vadd.f32 %v2392_v22, %v2344_v61  ;;  %v6142_v61 = vld [vmem:[%s8884_s5 + $0x3d4] sm:$0xf0] }
 0x30e   : > { %v2345_v60 = vpop.f32.mrf.mxu1  ;;  %v2297_v49 = vadd.f32 %v2296_v46, %v7862_v37  ;;  %v8125_v37 = vperm.slane %v8116_v50, 0  ;;  %v5611_v46 = vld [vmem:[%s8884_s5 + $0x2c8] sm:$0xf]  ;;  %v5740_v13 = vor.u32 %v6142_v61, %v5739_v27 }
 0x30f   : > { %v2442_v14 = vadd.f32 %v2441_v34, %v2393_v18  ;;  %v6078_v18 = vld [vmem:[%s8884_s5 + $0x1d4] sm:$0xf0]  ;;  %v5467_v61 = vld [vmem:[%s8884_s5 + $0x1a8] sm:$0xf] }
 0x310   : > { %v2346_v1 = vadd.f32 %v2345_v60, %v2297_v49  ;;  %v6110_v60 = vld [vmem:[%s8884_s5 + $0x2d4] sm:$0xf0]  ;;  %v5356_v49 = vor.u32 %v6046_v7, %v5355_v26  ;;  %3860 = vmatpush.bf16.msra.mxu3 %v5740_v13  ;;  %v5484_v44 = vor.u32 %v6078_v18, %v5483_v36 }
 0x311   : > { %v2505_v54 = vmax.f32 %v2442_v14, 0.0  ;;  %v5612_v3 = vor.u32 %v6110_v60, %v5611_v46  ;;  %v5723_v46 = vld [vmem:[%s8884_s5 + $0x3a8] sm:$0xf] }
 0x312   : > { %3713 = vmatpush.bf16.msra.mxu0 %v5356_v49  ;;  %3762 = vmatpush.bf16.msra.mxu1 %v5484_v44  ;;  %v6074_v49 = vld [vmem:[%s8884_s5 + $0x1b4] sm:$0xf0] }
 0x313   : > { %3811 = vmatpush.bf16.msra.mxu2 %v5612_v3 }
 0x314   : > { %v2394_v0 = vpop.f32.mrf.mxu2 }
 0x315   : > { %v2395_v24 = vadd.f32 %v2394_v0, %v2346_v1  ;;  %v3329_v31 = vpop.f32.mrf.mxu0  ;;  %v2443_v16 = vpop.f32.mrf.mxu3 }
 0x316   : > { %v3378_v38 = vpop.f32.mrf.mxu1  ;;  %v3330_v17 = vadd.f32 %v3329_v31, %v8125_v37 }
 0x317   : > { %v2444_v15 = vadd.f32 %v2443_v16, %v2395_v24  ;;  %v5595_v16 = vld [vmem:[%s8884_s5 + $0x2a8] sm:$0xf] }
 0x318   : > { %v3379_v45 = vadd.f32 %v3378_v38, %v3330_v17  ;;  %3524 = vmatmul.bf16.vlgmr.msrb.gmra.mxu0 %v7143_v59  ;;  %v6106_v17 = vld [vmem:[%s8884_s5 + $0x2b4] sm:$0xf0] }
 0x319   : > { %3573 = vmatmul.bf16.vlgmr.msrb.gmra.mxu1 %v7402_v30  ;;  %v2509_v57 = vmax.f32 %v2444_v15, 0.0  ;;  %3622 = vmatmul.bf16.vlgmr.msrb.gmra.mxu2 %v7642_v35 }
 0x31b   : > { %v8131_v41 = vpack.c.bf16 %v2509_v57, %v2505_v54 }
 0x31c   : > { %v3427_v5 = vpop.f32.mrf.mxu2 }
 0x31d   : > { %v3428_v40 = vadd.f32 %v3427_v5, %v3379_v45  ;;  %3510 = vmatmul.bf16.gmra.mxu3 %v8131_v41  ;;  %v3331_v22 = vpop.f32.mrf.mxu0  ;;  %v5596_v45 = vor.u32 %v6106_v17, %v5595_v16  ;;  %v5579_v17 = vld [vmem:[%s8884_s5 + $0x288] sm:$0xf] }
 0x31e   : > { %v3380_v34 = vpop.f32.mrf.mxu1  ;;  %v3332_v21 = vadd.f32 %v3331_v22, %v8125_v37  ;;  %v5339_v22 = vld [vmem:[%s8884_s5 + $0xa8] sm:$0xf] }
 0x31f   : > { %3812 = vmatpush.bf16.msra.mxu2 %v5596_v45 }
 0x320   : > { %v3381_v42 = vadd.f32 %v3380_v34, %v3332_v21  ;;  %v6042_v34 = vld [vmem:[%s8884_s5 + $0xb4] sm:$0xf0] }
 0x321   : > { %v5340_v26 = vor.u32 %v6042_v34, %v5339_v22  ;;  %v6138_v21 = vld [vmem:[%s8884_s5 + $0x3b4] sm:$0xf0] }
 0x322   : > { %v5724_v3 = vor.u32 %v6138_v21, %v5723_v46  ;;  %v5323_v46 = vld [vmem:[%s8884_s5 + $0x88] sm:$0xf] }
 0x323   : > { %3714 = vmatpush.bf16.msra.mxu0 %v5340_v26  ;;  %v5707_v26 = vld [vmem:[%s8884_s5 + $0x388] sm:$0xf] }
 0x324   : > { %v3429_v1 = vpop.f32.mrf.mxu2  ;;  %3861 = vmatpush.bf16.msra.mxu3 %v5724_v3 }
 0x325   : > { %v3430_v0 = vadd.f32 %v3429_v1, %v3381_v42  ;;  %v3334_v14 = vpop.f32.mrf.mxu0  ;;  %v5468_v42 = vor.u32 %v6074_v49, %v5467_v61 }
 0x326   : > { %v3383_v24 = vpop.f32.mrf.mxu1  ;;  %v3335_v31 = vadd.f32 %v3334_v14, %v8125_v37 }
 0x327   : > { %3763 = vmatpush.bf16.msra.mxu1 %v5468_v42  ;;  %v6070_v42 = vld [vmem:[%s8884_s5 + $0x194] sm:$0xf0] }
 0x328   : > { %v3384_v38 = vadd.f32 %v3383_v24, %v3335_v31  ;;  %3529 = vmatmul.bf16.gmra.mxu0 %v7175_v63 }
 0x329   : > { %3578 = vmatmul.bf16.gmra.mxu1 %v7434_v2  ;;  %3627 = vmatmul.bf16.gmra.mxu2 %v7674_v47 }
 0x32c   : > { %v3432_v15 = vpop.f32.mrf.mxu2 }
 0x32d   : > { %v3433_v54 = vadd.f32 %v3432_v15, %v3384_v38  ;;  %3671 = vmatmul.bf16.vlgmr.msrb.gmra.mxu3 %v7898_v9  ;;  %v3336_v57 = vpop.f32.mrf.mxu0  ;;  %v6102_v15 = vld [vmem:[%s8884_s5 + $0x294] sm:$0xf0] }
 0x32e   : > { %v3385_v5 = vpop.f32.mrf.mxu1  ;;  %v3337_v60 = vadd.f32 %v3336_v57, %v8125_v37  ;;  %v5580_v57 = vor.u32 %v6102_v15, %v5579_v17 }
 0x330   : > { %v3386_v7 = vadd.f32 %v3385_v5, %v3337_v60  ;;  %v3476_v27 = vpop.f32.mrf.mxu3  ;;  %v6038_v60 = vld [vmem:[%s8884_s5 + $0x94] sm:$0xf0]  ;;  %3813 = vmatpush.bf16.msra.mxu2 %v5580_v57 }
 0x331   : > { %v3477_v13 = vadd.f32 %v3476_v27, %v3428_v40  ;;  %v5324_v3 = vor.u32 %v6038_v60, %v5323_v46  ;;  %v6098_v57 = vld [vmem:[%s8884_s5 + $0x274] sm:$0xf0] }
 0x333   : > { %v4104_v16 = vmax.f32 %v3477_v13, 0.0  ;;  %3715 = vmatpush.bf16.msra.mxu0 %v5324_v3  ;;  %v5451_v13 = vld [vmem:[%s8884_s5 + $0x188] sm:$0xf] }
 0x334   : > { %v3434_v36 = vpop.f32.mrf.mxu2  ;;  %v5691_v3 = vld [vmem:[%s8884_s5 + $0x368] sm:$0xf] }
 0x335   : > { %v3435_v18 = vadd.f32 %v3434_v36, %v3386_v7  ;;  %v3339_v44 = vpop.f32.mrf.mxu0  ;;  %v6134_v7 = vld [vmem:[%s8884_s5 + $0x394] sm:$0xf0] }
 0x336   : > { %v3388_v1 = vpop.f32.mrf.mxu1  ;;  %v3340_v14 = vadd.f32 %v3339_v44, %v8125_v37  ;;  %v5708_v27 = vor.u32 %v6134_v7, %v5707_v26  ;;  %v5452_v44 = vor.u32 %v6070_v42, %v5451_v13 }
 0x338   : > { %v3389_v24 = vadd.f32 %v3388_v1, %v3340_v14  ;;  %v3478_v31 = vpop.f32.mrf.mxu3  ;;  %3534 = vmatmul.bf16.gmra.mxu0 %v7207_v32  ;;  %3862 = vmatpush.bf16.msra.mxu3 %v5708_v27 }
 0x339   : > { %3583 = vmatmul.bf16.gmra.mxu1 %v7466_v39  ;;  %v3479_v38 = vadd.f32 %v3478_v31, %v3430_v0  ;;  %3632 = vmatmul.bf16.gmra.mxu2 %v7706_v51 }
 0x33a   : > { %3764 = vmatpush.bf16.msra.mxu1 %v5452_v44  ;;  %v5435_v44 = vld [vmem:[%s8884_s5 + $0x168] sm:$0xf] }
 0x33b   : > { %v4108_v40 = vmax.f32 %v3479_v38, 0.0 }
 0x33c   : > { %v3437_v45 = vpop.f32.mrf.mxu2 }
 0x33d   : > { %v8199_v5 = vpack.c.bf16 %v4108_v40, %v4104_v16  ;;  %v3438_v22 = vadd.f32 %v3437_v45, %v3389_v24  ;;  %3676 = vmatmul.bf16.gmra.mxu3 %v7930_v55  ;;  %v3341_v0 = vpop.f32.mrf.mxu0  ;;  %v5563_v45 = vld [vmem:[%s8884_s5 + $0x268] sm:$0xf] }
 0x33e   : > { %v3390_v34 = vpop.f32.mrf.mxu1  ;;  %v3342_v21 = vadd.f32 %v3341_v0, %v8125_v37 }
 0x340   : > { %v3391_v61 = vadd.f32 %v3390_v34, %v3342_v21  ;;  %v3481_v49 = vpop.f32.mrf.mxu3  ;;  %v5564_v34 = vor.u32 %v6098_v57, %v5563_v45  ;;  %v6034_v21 = vld [vmem:[%s8884_s5 + $0x74] sm:$0xf0] }
 0x341   : > { %v3482_v36 = vadd.f32 %v3481_v49, %v3433_v54  ;;  %v6130_v49 = vld [vmem:[%s8884_s5 + $0x374] sm:$0xf0] }
 0x342   : > { %3814 = vmatpush.bf16.msra.mxu2 %v5564_v34  ;;  %v5692_v13 = vor.u32 %v6130_v49, %v5691_v3  ;;  %v5547_v34 = vld [vmem:[%s8884_s5 + $0x248] sm:$0xf] }
 0x343   : > { %v4112_v15 = vmax.f32 %v3482_v36, 0.0  ;;  %v5675_v49 = vld [vmem:[%s8884_s5 + $0x348] sm:$0xf] }
 0x344   : > { %v3439_v1 = vpop.f32.mrf.mxu2  ;;  %3863 = vmatpush.bf16.msra.mxu3 %v5692_v13 }
 0x345   : > { %v3440_v14 = vadd.f32 %v3439_v1, %v3391_v61  ;;  %v3344_v24 = vpop.f32.mrf.mxu0  ;;  %v6066_v1 = vld [vmem:[%s8884_s5 + $0x174] sm:$0xf0] }
 0x346   : > { %v3393_v31 = vpop.f32.mrf.mxu1  ;;  %v3345_v38 = vadd.f32 %v3344_v24, %v8125_v37 }
 0x348   : > { %v3394_v16 = vadd.f32 %v3393_v31, %v3345_v38  ;;  %v3483_v40 = vpop.f32.mrf.mxu3  ;;  %3539 = vmatmul.bf16.gmra.mxu0 %v7239_v10  ;;  %v5436_v31 = vor.u32 %v6066_v1, %v5435_v44  ;;  %v6126_v44 = vld [vmem:[%s8884_s5 + $0x354] sm:$0xf0] }
 0x349   : > { %3588 = vmatmul.bf16.gmra.mxu1 %v7498_v52  ;;  %v3484_v17 = vadd.f32 %v3483_v40, %v3435_v18  ;;  %3637 = vmatmul.bf16.gmra.mxu2 %v7738_v58  ;;  %v5307_v18 = vld [vmem:[%s8884_s5 + $0x68] sm:$0xf]  ;;  %v5676_v1 = vor.u32 %v6126_v44, %v5675_v49  ;;  %v6026_v44 = vld [vmem:[%s8884_s5 + $0x34] sm:$0xf0] }
 0x34a   : > { %v5308_v61 = vor.u32 %v6034_v21, %v5307_v18  ;;  %3765 = vmatpush.bf16.msra.mxu1 %v5436_v31 }
 0x34b   : > { %v4116_v54 = vmax.f32 %v3484_v17, 0.0  ;;  %3864 = vmatpush.bf16.msra.mxu3 %v5676_v1  ;;  %v5659_v1 = vld [vmem:[%s8884_s5 + $0x328] sm:$0xf] }
 0x34c   : > { %v3442_v0 = vpop.f32.mrf.mxu2  ;;  %3716 = vmatpush.bf16.msra.mxu0 %v5308_v61  ;;  %v6030_v61 = vld [vmem:[%s8884_s5 + $0x54] sm:$0xf0] }
 0x34d   : > { %v3443_v46 = vadd.f32 %v3442_v0, %v3394_v16  ;;  %3681 = vmatmul.bf16.gmra.mxu3 %v7962_v43  ;;  %v3346_v60 = vpop.f32.mrf.mxu0  ;;  %v8241_v7 = vpack.c.bf16 %v4116_v54, %v4112_v15 }
 0x34e   : > { %v3395_v26 = vpop.f32.mrf.mxu1  ;;  %v3347_v27 = vadd.f32 %v3346_v60, %v8125_v37  ;;  %v6094_v60 = vld [vmem:[%s8884_s5 + $0x254] sm:$0xf0] }
 0x34f   : > { %v5548_v18 = vor.u32 %v6094_v60, %v5547_v34 }
 0x350   : > { %v3396_v42 = vadd.f32 %v3395_v26, %v3347_v27  ;;  %v3486_v36 = vpop.f32.mrf.mxu3 }
 0x351   : > { %v3487_v24 = vadd.f32 %v3486_v36, %v3438_v22  ;;  %3815 = vmatpush.bf16.msra.mxu2 %v5548_v18 }
 0x353   : > { %v4120_v0 = vmax.f32 %v3487_v24, 0.0 }
 0x354   : > { %v3444_v38 = vpop.f32.mrf.mxu2 }
 0x355   : > { %v3445_v16 = vadd.f32 %v3444_v38, %v3396_v42  ;;  %v3349_v40 = vpop.f32.mrf.mxu0  ;;  %v5419_v38 = vld [vmem:[%s8884_s5 + $0x148] sm:$0xf] }
 0x356   : > { %v3398_v17 = vpop.f32.mrf.mxu1  ;;  %v3350_v15 = vadd.f32 %v3349_v40, %v8125_v37  ;;  %v6062_v40 = vld [vmem:[%s8884_s5 + $0x154] sm:$0xf0] }
 0x358   : > { %v3399_v54 = vadd.f32 %v3398_v17, %v3350_v15  ;;  %v3488_v45 = vpop.f32.mrf.mxu3  ;;  %3544 = vmatmul.bf16.gmra.mxu0 %v7271_v28  ;;  %v5420_v15 = vor.u32 %v6062_v40, %v5419_v38  ;;  %v6122_v40 = vld [vmem:[%s8884_s5 + $0x334] sm:$0xf0] }
 0x359   : > { %3593 = vmatmul.bf16.gmra.mxu1 %v7530_v29  ;;  %v3489_v57 = vadd.f32 %v3488_v45, %v3440_v14  ;;  %3642 = vmatmul.bf16.gmra.mxu2 %v7770_v8  ;;  %v5291_v14 = vld [vmem:[%s8884_s5 + $0x48] sm:$0xf] }
 0x35a   : > { %v5292_v36 = vor.u32 %v6030_v61, %v5291_v14  ;;  %3766 = vmatpush.bf16.msra.mxu1 %v5420_v15 }
 0x35b   : > { %v4124_v22 = vmax.f32 %v3489_v57, 0.0 }
 0x35c   : > { %v3447_v26 = vpop.f32.mrf.mxu2  ;;  %3717 = vmatpush.bf16.msra.mxu0 %v5292_v36 }
 0x35d   : > { %v3448_v21 = vadd.f32 %v3447_v26, %v3399_v54  ;;  %3686 = vmatmul.bf16.gmra.mxu3 %v7994_v19  ;;  %v3351_v3 = vpop.f32.mrf.mxu0  ;;  %v8273_v13 = vpack.c.bf16 %v4124_v22, %v4120_v0 }
 0x35e   : > { %v3400_v27 = vpop.f32.mrf.mxu1  ;;  %v3352_v42 = vadd.f32 %v3351_v3, %v8125_v37  ;;  %v5531_v3 = vld [vmem:[%s8884_s5 + $0x228] sm:$0xf] }
 0x360   : > { %v3401_v24 = vadd.f32 %v3400_v27, %v3352_v42  ;;  %v3491_v31 = vpop.f32.mrf.mxu3  ;;  %v6090_v27 = vld [vmem:[%s8884_s5 + $0x234] sm:$0xf0] }
 0x361   : > { %v3492_v17 = vadd.f32 %v3491_v31, %v3443_v46  ;;  %v5532_v61 = vor.u32 %v6090_v27, %v5531_v3  ;;  %v5259_v27 = vld [vmem:[%s8884_s5 + $0x8] sm:$0xf] }
 0x363   : > { %v4128_v18 = vmax.f32 %v3492_v17, 0.0  ;;  %3816 = vmatpush.bf16.msra.mxu2 %v5532_v61  ;;  %v5660_v17 = vor.u32 %v6122_v40, %v5659_v1 }
 0x364   : > { %v3449_v54 = vpop.f32.mrf.mxu2 }
 0x365   : > { %v3450_v45 = vadd.f32 %v3449_v54, %v3401_v24  ;;  %v3354_v57 = vpop.f32.mrf.mxu0  ;;  %3865 = vmatpush.bf16.msra.mxu3 %v5660_v17 }
 0x366   : > { %v3403_v0 = vpop.f32.mrf.mxu1  ;;  %v3355_v22 = vadd.f32 %v3354_v57, %v8125_v37  ;;  %v5403_v57 = vld [vmem:[%s8884_s5 + $0x128] sm:$0xf] }
 0x368   : > { %v3404_v34 = vadd.f32 %v3403_v0, %v3355_v22  ;;  %v3493_v60 = vpop.f32.mrf.mxu3  ;;  %3549 = vmatmul.bf16.gmra.mxu0 %v7303_v6  ;;  %v6058_v0 = vld [vmem:[%s8884_s5 + $0x134] sm:$0xf0] }
 0x369   : > { %3598 = vmatmul.bf16.gmra.mxu1 %v7562_v12  ;;  %v3494_v26 = vadd.f32 %v3493_v60, %v3445_v16  ;;  %3647 = vmatmul.bf16.gmra.mxu2 %v7820_v20  ;;  %v5275_v16 = vld [vmem:[%s8884_s5 + $0x28] sm:$0xf] }
 0x36a   : > { %v5276_v38 = vor.u32 %v6026_v44, %v5275_v16  ;;  %v6086_v16 = vld [vmem:[%s8884_s5 + $0x214] sm:$0xf0] }
 0x36b   : > { %v4132_v46 = vmax.f32 %v3494_v26, 0.0 }
 0x36c   : > { %v3452_v14 = vpop.f32.mrf.mxu2  ;;  %3718 = vmatpush.bf16.msra.mxu0 %v5276_v38 }
 0x36d   : > { %v3453_v49 = vadd.f32 %v3452_v14, %v3404_v34  ;;  %3691 = vmatmul.bf16.gmra.mxu3 %v8026_v23  ;;  %v3356_v42 = vpop.f32.mrf.mxu0  ;;  %v8305_v24 = vpack.c.bf16 %v4132_v46, %v4128_v18  ;;  %v5404_v34 = vor.u32 %v6058_v0, %v5403_v57  ;;  %v6022_v14 = vld [vmem:[%s8884_s5 + $0x14] sm:$0xf0] }
 0x36e   : > { %v3405_v36 = vpop.f32.mrf.mxu1  ;;  %v3357_v31 = vadd.f32 %v3356_v42, %v8125_v37  ;;  %v5260_v61 = vor.u32 %v6022_v14, %v5259_v27  ;;  %v6054_v42 = vld [vmem:[%s8884_s5 + $0x114] sm:$0xf0] }
 0x36f   : > { %3767 = vmatpush.bf16.msra.mxu1 %v5404_v34 }
 0x370   : > { %v3406_v15 = vadd.f32 %v3405_v36, %v3357_v31  ;;  %v3496_v54 = vpop.f32.mrf.mxu3  ;;  %v5515_v36 = vld [vmem:[%s8884_s5 + $0x208] sm:$0xf]  ;;  %3719 = vmatpush.bf16.msra.mxu0 %v5260_v61 }
 0x371   : > { %v3497_v22 = vadd.f32 %v3496_v54, %v3448_v21  ;;  %v5387_v21 = vld [vmem:[%s8884_s5 + $0x108] sm:$0xf]  ;;  %v5516_v38 = vor.u32 %v6086_v16, %v5515_v36 }
 0x372   : > { %v5388_v31 = vor.u32 %v6054_v42, %v5387_v21 }
 0x373   : > { %3817 = vmatpush.bf16.msra.mxu2 %v5516_v38  ;;  %v4136_v17 = vmax.f32 %v3497_v22, 0.0 }
 0x374   : > { %v3454_v60 = vpop.f32.mrf.mxu2  ;;  %3768 = vmatpush.bf16.msra.mxu1 %v5388_v31 }
 0x375   : > { %v3455_v26 = vadd.f32 %v3454_v60, %v3406_v15  ;;  %v3359_v18 = vpop.f32.mrf.mxu0  ;;  %v5643_v60 = vld [vmem:[%s8884_s5 + $0x308] sm:$0xf] }
 0x376   : > { %v3408_v46 = vpop.f32.mrf.mxu1  ;;  %v3360_v3 = vadd.f32 %v3359_v18, %v8125_v37 }
 0x378   : > { %v3409_v44 = vadd.f32 %v3408_v46, %v3360_v3  ;;  %v3498_v1 = vpop.f32.mrf.mxu3  ;;  %3554 = vmatmul.bf16.gmra.mxu0 %v8897_v25 }
 0x379   : > { %3603 = vmatmul.bf16.gmra.mxu1 %v7570_v53  ;;  %v3499_v40 = vadd.f32 %v3498_v1, %v3450_v45  ;;  %3652 = vmatmul.bf16.gmra.mxu2 %v7834_v11  ;;  %v6118_v45 = vld [vmem:[%s8884_s5 + $0x314] sm:$0xf0] }
 0x37a   : > { %v5644_v22 = vor.u32 %v6118_v45, %v5643_v60  ;;  %v5373_v45 = vld [vmem:[%s8884_s5 + $0xf8] sm:$0xf0] }
 0x37b   : > { %v4140_v15 = vmax.f32 %v3499_v40, 0.0 }
 0x37c   : > { %v3457_v54 = vpop.f32.mrf.mxu2  ;;  %3866 = vmatpush.bf16.msra.mxu3 %v5644_v22 }
 0x37d   : > { %v3458_v57 = vadd.f32 %v3457_v54, %v3409_v44  ;;  %3696 = vmatmul.bf16.gmra.mxu3 %v8076_v48  ;;  %v3361_v0 = vpop.f32.mrf.mxu0  ;;  %v8346_v18 = vpack.c.bf16 %v4140_v15, %v4136_v17  ;;  %v5629_v17 = vld [vmem:[%s8884_s5 + $0x2f8] sm:$0xf0] }
 0x37e   : > { %v3410_v34 = vpop.f32.mrf.mxu1  ;;  %v3362_v46 = vadd.f32 %v3361_v0, %v8125_v37 }
 0x380   : > { %v3411_v3 = vadd.f32 %v3410_v34, %v3362_v46  ;;  %v3501_v27 = vpop.f32.mrf.mxu3  ;;  %v6144_v46 = vld [vmem:[%s8884_s5 + $0x3ec] sm:$0xf] }
 0x381   : > { %v3502_v14 = vadd.f32 %v3501_v27, %v3453_v49  ;;  %v6112_v49 = vld [vmem:[%s8884_s5 + $0x2ec] sm:$0xf] }
 0x382   : > { %v5632_v54 = vor.u32 %v6112_v49, %v5629_v17 }
 0x383   : > { %v4144_v38 = vmax.f32 %v3502_v14, 0.0  ;;  %v5757_v14 = vld [vmem:[%s8884_s5 + $0x3f8] sm:$0xf0] }
 0x384   : > { %v3459_v21 = vpop.f32.mrf.mxu2  ;;  %4006 = vmatpush.bf16.msrb.mxu2 %v5632_v54 }
 0x385   : > { %v3460_v61 = vadd.f32 %v3459_v21, %v3411_v3  ;;  %v3364_v42 = vpop.f32.mrf.mxu0  ;;  %v5760_v21 = vor.u32 %v6144_v46, %v5757_v14  ;;  %v5613_v14 = vld [vmem:[%s8884_s5 + $0x2d8] sm:$0xf0] }
 0x386   : > { %v3413_v36 = vpop.f32.mrf.mxu1  ;;  %v3365_v16 = vadd.f32 %v3364_v42, %v8125_v37 }
 0x387   : > { %4055 = vmatpush.bf16.msrb.mxu3 %v5760_v21 }
 0x388   : > { %v3414_v44 = vadd.f32 %v3413_v36, %v3365_v16  ;;  %v3503_v1 = vpop.f32.mrf.mxu3  ;;  %3559 = vmatmul.bf16.gmra.mxu0 %v8898_v56  ;;  %v6080_v16 = vld [vmem:[%s8884_s5 + $0x1ec] sm:$0xf] }
 0x389   : > { %3608 = vmatmul.bf16.gmra.mxu1 %v7610_v4  ;;  %v3504_v31 = vadd.f32 %v3503_v1, %v3455_v26  ;;  %3657 = vmatmul.bf16.gmra.mxu2 %v7867_v62  ;;  %v6048_v26 = vld [vmem:[%s8884_s5 + $0xec] sm:$0xf] }
 0x38a   : > { %v5376_v27 = vor.u32 %v6048_v26, %v5373_v45 }
 0x38b   : > { %v4148_v40 = vmax.f32 %v3504_v31, 0.0  ;;  %v8382_v31 = vperm.slane %v8116_v50, 1 }
 0x38c   : > { %v3462_v15 = vpop.f32.mrf.mxu2  ;;  %3908 = vmatpush.bf16.msrb.mxu0 %v5376_v27  ;;  %v6108_v27 = vld [vmem:[%s8884_s5 + $0x2cc] sm:$0xf] }
 0x38d   : > { %v3463_v0 = vadd.f32 %v3462_v15, %v3414_v44  ;;  %3701 = vmatmul.bf16.gmra.mxu3 %v8096_v33  ;;  %v3366_v34 = vpop.f32.mrf.mxu0  ;;  %v8369_v22 = vpack.c.bf16 %v4148_v40, %v4144_v38  ;;  %v5501_v44 = vld [vmem:[%s8884_s5 + $0x1f8] sm:$0xf0] }
 0x38e   : > { %v3415_v60 = vpop.f32.mrf.mxu1  ;;  %v3367_v3 = vadd.f32 %v3366_v34, %v8125_v37  ;;  %v5504_v37 = vor.u32 %v6080_v16, %v5501_v44  ;;  %v5357_v16 = vld [vmem:[%s8884_s5 + $0xd8] sm:$0xf0]  ;;  %v6140_v44 = vld [vmem:[%s8884_s5 + $0x3cc] sm:$0xf] }
 0x38f   : > { %8899 = vst [vmem:[#allocation2_spill] sm:$0xff] %v8369_v22 }
 0x390   : > { %v3416_v42 = vadd.f32 %v3415_v60, %v3367_v3  ;;  %v3506_v36 = vpop.f32.mrf.mxu3  ;;  %3957 = vmatpush.bf16.msrb.mxu1 %v5504_v37 }
 0x391   : > { %v3507_v1 = vadd.f32 %v3506_v36, %v3458_v57  ;;  %v5616_v36 = vor.u32 %v6108_v27, %v5613_v14 }
 0x393   : > { %v4152_v57 = vmax.f32 %v3507_v1, 0.0  ;;  %v5741_v1 = vld [vmem:[%s8884_s5 + $0x3d8] sm:$0xf0]  ;;  %4007 = vmatpush.bf16.msrb.mxu2 %v5616_v36  ;;  %v6104_v36 = vld [vmem:[%s8884_s5 + $0x2ac] sm:$0xf] }
 0x394   : > { %v3464_v38 = vpop.f32.mrf.mxu2 }
 0x395   : > { %v3465_v40 = vadd.f32 %v3464_v38, %v3416_v42  ;;  %v3525_v49 = vpop.f32.mrf.mxu0  ;;  %v5744_v38 = vor.u32 %v6140_v44, %v5741_v1 }
 0x396   : > { %v3574_v17 = vpop.f32.mrf.mxu1  ;;  %v3526_v15 = vadd.f32 %v3525_v49, %v8382_v31 }
 0x397   : > { %4056 = vmatpush.bf16.msrb.mxu3 %v5744_v38 }
 0x398   : > { %v3575_v54 = vadd.f32 %v3574_v17, %v3526_v15  ;;  %v3508_v34 = vpop.f32.mrf.mxu3  ;;  %3720 = vmatmul.bf16.vlgmr.msra.gmra.mxu0 %v7143_v59  ;;  %v6076_v15 = vld [vmem:[%s8884_s5 + $0x1cc] sm:$0xf] }
 0x399   : > { %3769 = vmatmul.bf16.vlgmr.msra.gmra.mxu1 %v7402_v30  ;;  %v3509_v60 = vadd.f32 %v3508_v34, %v3460_v61  ;;  %3818 = vmatmul.bf16.vlgmr.msra.gmra.mxu2 %v7642_v35  ;;  %v6044_v61 = vld [vmem:[%s8884_s5 + $0xcc] sm:$0xf] }
 0x39a   : > { %v5360_v37 = vor.u32 %v6044_v61, %v5357_v16  ;;  %v5597_v16 = vld [vmem:[%s8884_s5 + $0x2b8] sm:$0xf0] }
 0x39b   : > { %v4156_v26 = vmax.f32 %v3509_v60, 0.0  ;;  %v5600_v1 = vor.u32 %v6104_v36, %v5597_v16 }
 0x39c   : > { %v3623_v50 = vpop.f32.mrf.mxu2  ;;  %3909 = vmatpush.bf16.msrb.mxu0 %v5360_v37 }
 0x39d   : > { %v3624_v45 = vadd.f32 %v3623_v50, %v3575_v54  ;;  %3706 = vmatmul.bf16.gmra.mxu3 %v8131_v41  ;;  %v3527_v46 = vpop.f32.mrf.mxu0  ;;  %v8398_v21 = vpack.c.bf16 %v4156_v26, %v4152_v57  ;;  %v5485_v54 = vld [vmem:[%s8884_s5 + $0x1d8] sm:$0xf0]  ;;  %4008 = vmatpush.bf16.msrb.mxu2 %v5600_v1 }
 0x39e   : > { %v3576_v3 = vpop.f32.mrf.mxu1  ;;  %v3528_v42 = vadd.f32 %v3527_v46, %v8382_v31  ;;  %v5488_v60 = vor.u32 %v6076_v15, %v5485_v54  ;;  %v6136_v15 = vld [vmem:[%s8884_s5 + $0x3ac] sm:$0xf] }
 0x39f   : > { %8900 = vst [vmem:[#allocation3_spill] sm:$0xff] %v8398_v21  ;;  %v6116_v21 = vld [vmem:[%s8884_s5 + $0x30c] sm:$0xf] }
 0x3a0   : > { %v3577_v49 = vadd.f32 %v3576_v3, %v3528_v42  ;;  %v3511_v17 = vpop.f32.mrf.mxu3  ;;  %3958 = vmatpush.bf16.msrb.mxu1 %v5488_v60 }
 0x3a1   : > { %v3512_v34 = vadd.f32 %v3511_v17, %v3463_v0  ;;  %v5341_v17 = vld [vmem:[%s8884_s5 + $0xb8] sm:$0xf0] }
 0x3a3   : > { %v4160_v0 = vmax.f32 %v3512_v34, 0.0 }
 0x3a4   : > { %v3625_v57 = vpop.f32.mrf.mxu2 }
 0x3a5   : > { %v3626_v26 = vadd.f32 %v3625_v57, %v3577_v49  ;;  %v3530_v50 = vpop.f32.mrf.mxu0  ;;  %v5725_v57 = vld [vmem:[%s8884_s5 + $0x3b8] sm:$0xf0] }
 0x3a6   : > { %v3579_v46 = vpop.f32.mrf.mxu1  ;;  %v3531_v3 = vadd.f32 %v3530_v50, %v8382_v31  ;;  %v5728_v50 = vor.u32 %v6136_v15, %v5725_v57  ;;  %v6100_v15 = vld [vmem:[%s8884_s5 + $0x28c] sm:$0xf] }
 0x3a8   : > { %v3580_v27 = vadd.f32 %v3579_v46, %v3531_v3  ;;  %v3513_v14 = vpop.f32.mrf.mxu3  ;;  %3725 = vmatmul.bf16.gmra.mxu0 %v7175_v63  ;;  %4057 = vmatpush.bf16.msrb.mxu3 %v5728_v50 }
 0x3a9   : > { %3774 = vmatmul.bf16.gmra.mxu1 %v7434_v2  ;;  %v3514_v61 = vadd.f32 %v3513_v14, %v3465_v40  ;;  %3823 = vmatmul.bf16.gmra.mxu2 %v7674_v47  ;;  %v6040_v40 = vld [vmem:[%s8884_s5 + $0xac] sm:$0xf]  ;;  %v5469_v14 = vld [vmem:[%s8884_s5 + $0x1b8] sm:$0xf0] }
 0x3aa   : > { %v5344_v60 = vor.u32 %v6040_v40, %v5341_v17 }
 0x3ab   : > { %v4164_v42 = vmax.f32 %v3514_v61, 0.0 }
 0x3ac   : > { %v3628_v44 = vpop.f32.mrf.mxu2  ;;  %3910 = vmatpush.bf16.msrb.mxu0 %v5344_v60 }
 0x3ad   : > { %v3629_v37 = vadd.f32 %v3628_v44, %v3580_v27  ;;  %3867 = vmatmul.bf16.vlgmr.msra.gmra.mxu3 %v7898_v9  ;;  %v3532_v38 = vpop.f32.mrf.mxu0  ;;  %v8436_v54 = vpack.c.bf16 %v4164_v42, %v4160_v0  ;;  %v6072_v27 = vld [vmem:[%s8884_s5 + $0x1ac] sm:$0xf] }
 0x3ae   : > { %v3581_v49 = vpop.f32.mrf.mxu1  ;;  %v3533_v34 = vadd.f32 %v3532_v38, %v8382_v31  ;;  %v5472_v0 = vor.u32 %v6072_v27, %v5469_v14  ;;  %v6036_v27 = vld [vmem:[%s8884_s5 + $0x8c] sm:$0xf]  ;;  %v5325_v14 = vld [vmem:[%s8884_s5 + $0x98] sm:$0xf0] }
 0x3af   : > { %8901 = vst [vmem:[#allocation4_spill] sm:$0xff] %v8436_v54 }
 0x3b0   : > { %v3582_v46 = vadd.f32 %v3581_v49, %v3533_v34  ;;  %v3672_v3 = vpop.f32.mrf.mxu3  ;;  %3959 = vmatpush.bf16.msrb.mxu1 %v5472_v0  ;;  %v5581_v34 = vld [vmem:[%s8884_s5 + $0x298] sm:$0xf0] }
 0x3b1   : > { %v3673_v61 = vadd.f32 %v3672_v3, %v3624_v45  ;;  %v5584_v57 = vor.u32 %v6100_v15, %v5581_v34 }
 0x3b3   : > { %v4105_v17 = vmax.f32 %v3673_v61, 0.0  ;;  %v6132_v61 = vld [vmem:[%s8884_s5 + $0x38c] sm:$0xf]  ;;  %4009 = vmatpush.bf16.msrb.mxu2 %v5584_v57 }
 0x3b4   : > { %v3630_v42 = vpop.f32.mrf.mxu2 }
 0x3b5   : > { %v3631_v36 = vadd.f32 %v3630_v42, %v3582_v46  ;;  %v3535_v16 = vpop.f32.mrf.mxu0  ;;  %v5328_v42 = vor.u32 %v6036_v27, %v5325_v14 }
 0x3b6   : > { %v3584_v44 = vpop.f32.mrf.mxu1  ;;  %v3536_v1 = vadd.f32 %v3535_v16, %v8382_v31  ;;  %v5709_v16 = vld [vmem:[%s8884_s5 + $0x398] sm:$0xf0] }
 0x3b7   : > { %3911 = vmatpush.bf16.msrb.mxu0 %v5328_v42  ;;  %v5565_v42 = vld [vmem:[%s8884_s5 + $0x278] sm:$0xf0] }
 0x3b8   : > { %v3585_v38 = vadd.f32 %v3584_v44, %v3536_v1  ;;  %v3674_v49 = vpop.f32.mrf.mxu3  ;;  %3730 = vmatmul.bf16.gmra.mxu0 %v7207_v32  ;;  %v5712_v44 = vor.u32 %v6132_v61, %v5709_v16 }
 0x3b9   : > { %3779 = vmatmul.bf16.gmra.mxu1 %v7466_v39  ;;  %v3675_v40 = vadd.f32 %v3674_v49, %v3626_v26  ;;  %3828 = vmatmul.bf16.gmra.mxu2 %v7706_v51  ;;  %v6068_v49 = vld [vmem:[%s8884_s5 + $0x18c] sm:$0xf] }
 0x3ba   : > { %4058 = vmatpush.bf16.msrb.mxu3 %v5712_v44 }
 0x3bb   : > { %v4109_v45 = vmax.f32 %v3675_v40, 0.0  ;;  %v5453_v40 = vld [vmem:[%s8884_s5 + $0x198] sm:$0xf0] }
 0x3bc   : > { %v3633_v60 = vpop.f32.mrf.mxu2 }
 0x3bd   : > { %v8458_v50 = vpack.c.bf16 %v4109_v45, %v4105_v17  ;;  %v3634_v46 = vadd.f32 %v3633_v60, %v3585_v38  ;;  %3872 = vmatmul.bf16.gmra.mxu3 %v7930_v55  ;;  %v3537_v26 = vpop.f32.mrf.mxu0  ;;  %v5456_v45 = vor.u32 %v6068_v49, %v5453_v40  ;;  %v5309_v40 = vld [vmem:[%s8884_s5 + $0x78] sm:$0xf0] }
 0x3be   : > { %v3586_v3 = vpop.f32.mrf.mxu1  ;;  %v3538_v0 = vadd.f32 %v3537_v26, %v8382_v31 }
 0x3bf   : > { %3960 = vmatpush.bf16.msrb.mxu1 %v5456_v45 }
 0x3c0   : > { %v3587_v1 = vadd.f32 %v3586_v3, %v3538_v0  ;;  %v3677_v38 = vpop.f32.mrf.mxu3  ;;  %v6096_v0 = vld [vmem:[%s8884_s5 + $0x26c] sm:$0xf] }
 0x3c1   : > { %v3678_v17 = vadd.f32 %v3677_v38, %v3629_v37  ;;  %v5568_v44 = vor.u32 %v6096_v0, %v5565_v42 }
 0x3c3   : > { %v4113_v61 = vmax.f32 %v3678_v17, 0.0  ;;  %v6128_v17 = vld [vmem:[%s8884_s5 + $0x36c] sm:$0xf]  ;;  %4010 = vmatpush.bf16.msrb.mxu2 %v5568_v44 }
 0x3c4   : > { %v3635_v15 = vpop.f32.mrf.mxu2 }
 0x3c5   : > { %v3636_v34 = vadd.f32 %v3635_v15, %v3587_v1  ;;  %v3540_v60 = vpop.f32.mrf.mxu0 }
 0x3c6   : > { %v3589_v57 = vpop.f32.mrf.mxu1  ;;  %v3541_v26 = vadd.f32 %v3540_v60, %v8382_v31 }
 0x3c8   : > { %v3590_v3 = vadd.f32 %v3589_v57, %v3541_v26  ;;  %v3679_v27 = vpop.f32.mrf.mxu3  ;;  %3735 = vmatmul.bf16.gmra.mxu0 %v7239_v10  ;;  %v5693_v57 = vld [vmem:[%s8884_s5 + $0x378] sm:$0xf0] }
 0x3c9   : > { %3784 = vmatmul.bf16.gmra.mxu1 %v7498_v52  ;;  %v3680_v14 = vadd.f32 %v3679_v27, %v3631_v36  ;;  %3833 = vmatmul.bf16.gmra.mxu2 %v7738_v58  ;;  %v6032_v36 = vld [vmem:[%s8884_s5 + $0x6c] sm:$0xf]  ;;  %v5696_v26 = vor.u32 %v6128_v17, %v5693_v57  ;;  %v5549_v57 = vld [vmem:[%s8884_s5 + $0x258] sm:$0xf0] }
 0x3ca   : > { %v5312_v60 = vor.u32 %v6032_v36, %v5309_v40 }
 0x3cb   : > { %v4117_v37 = vmax.f32 %v3680_v14, 0.0  ;;  %v6064_v14 = vld [vmem:[%s8884_s5 + $0x16c] sm:$0xf]  ;;  %4059 = vmatpush.bf16.msrb.mxu3 %v5696_v26 }
 0x3cc   : > { %v3638_v16 = vpop.f32.mrf.mxu2  ;;  %3912 = vmatpush.bf16.msrb.mxu0 %v5312_v60  ;;  %v6092_v60 = vld [vmem:[%s8884_s5 + $0x24c] sm:$0xf] }
 0x3cd   : > { %v3639_v1 = vadd.f32 %v3638_v16, %v3590_v3  ;;  %3877 = vmatmul.bf16.gmra.mxu3 %v7962_v43  ;;  %v3542_v38 = vpop.f32.mrf.mxu0  ;;  %v8500_v45 = vpack.c.bf16 %v4117_v37, %v4113_v61  ;;  %v5437_v61 = vld [vmem:[%s8884_s5 + $0x178] sm:$0xf0] }
 0x3ce   : > { %v3591_v49 = vpop.f32.mrf.mxu1  ;;  %v3543_v15 = vadd.f32 %v3542_v38, %v8382_v31  ;;  %v5440_v0 = vor.u32 %v6064_v14, %v5437_v61 }
 0x3d0   : > { %v3592_v3 = vadd.f32 %v3591_v49, %v3543_v15  ;;  %v3682_v27 = vpop.f32.mrf.mxu3  ;;  %3961 = vmatpush.bf16.msrb.mxu1 %v5440_v0  ;;  %v6124_v0 = vld [vmem:[%s8884_s5 + $0x34c] sm:$0xf] }
 0x3d1   : > { %v3683_v37 = vadd.f32 %v3682_v27, %v3634_v46 }
 0x3d3   : > { %v4121_v15 = vmax.f32 %v3683_v37, 0.0  ;;  %v5293_v37 = vld [vmem:[%s8884_s5 + $0x58] sm:$0xf0] }
 0x3d4   : > { %v3640_v42 = vpop.f32.mrf.mxu2 }
 0x3d5   : > { %v3641_v16 = vadd.f32 %v3640_v42, %v3592_v3  ;;  %v3545_v44 = vpop.f32.mrf.mxu0  ;;  %v5552_v3 = vor.u32 %v6092_v60, %v5549_v57  ;;  %v6060_v60 = vld [vmem:[%s8884_s5 + $0x14c] sm:$0xf] }
 0x3d6   : > { %v3594_v38 = vpop.f32.mrf.mxu1  ;;  %v3546_v49 = vadd.f32 %v3545_v44, %v8382_v31 }
 0x3d7   : > { %4011 = vmatpush.bf16.msrb.mxu2 %v5552_v3 }
 0x3d8   : > { %v3595_v36 = vadd.f32 %v3594_v38, %v3546_v49  ;;  %v3684_v40 = vpop.f32.mrf.mxu3  ;;  %3740 = vmatmul.bf16.gmra.mxu0 %v7271_v28  ;;  %v5677_v49 = vld [vmem:[%s8884_s5 + $0x358] sm:$0xf0] }
 0x3d9   : > { %3789 = vmatmul.bf16.gmra.mxu1 %v7530_v29  ;;  %v3685_v17 = vadd.f32 %v3684_v40, %v3636_v34  ;;  %3838 = vmatmul.bf16.gmra.mxu2 %v7770_v8  ;;  %v6028_v34 = vld [vmem:[%s8884_s5 + $0x4c] sm:$0xf] }
 0x3da   : > { %v5296_v38 = vor.u32 %v6028_v34, %v5293_v37 }
 0x3db   : > { %v4125_v46 = vmax.f32 %v3685_v17, 0.0 }
 0x3dc   : > { %v3643_v26 = vpop.f32.mrf.mxu2  ;;  %3913 = vmatpush.bf16.msrb.mxu0 %v5296_v38 }
 0x3dd   : > { %v3644_v27 = vadd.f32 %v3643_v26, %v3595_v36  ;;  %3882 = vmatmul.bf16.gmra.mxu3 %v7994_v19  ;;  %v3547_v14 = vpop.f32.mrf.mxu0  ;;  %v8532_v42 = vpack.c.bf16 %v4125_v46, %v4121_v15  ;;  %v5680_v36 = vor.u32 %v6124_v0, %v5677_v49  ;;  %v5421_v15 = vld [vmem:[%s8884_s5 + $0x158] sm:$0xf0]  ;;  %v6088_v49 = vld [vmem:[%s8884_s5 + $0x22c] sm:$0xf] }
 0x3de   : > { %v3596_v61 = vpop.f32.mrf.mxu1  ;;  %v3548_v44 = vadd.f32 %v3547_v14, %v8382_v31  ;;  %v5424_v57 = vor.u32 %v6060_v60, %v5421_v15 }
 0x3df   : > { %4060 = vmatpush.bf16.msrb.mxu3 %v5680_v36  ;;  %v5533_v36 = vld [vmem:[%s8884_s5 + $0x238] sm:$0xf0] }
 0x3e0   : > { %v3597_v40 = vadd.f32 %v3596_v61, %v3548_v44  ;;  %v3687_v17 = vpop.f32.mrf.mxu3  ;;  %3962 = vmatpush.bf16.msrb.mxu1 %v5424_v57 }
 0x3e1   : > { %v3688_v46 = vadd.f32 %v3687_v17, %v3639_v1  ;;  %v5536_v17 = vor.u32 %v6088_v49, %v5533_v36  ;;  %v6056_v36 = vld [vmem:[%s8884_s5 + $0x12c] sm:$0xf] }
 0x3e3   : > { %v4129_v38 = vmax.f32 %v3688_v46, 0.0  ;;  %v5277_v46 = vld [vmem:[%s8884_s5 + $0x38] sm:$0xf0]  ;;  %4012 = vmatpush.bf16.msrb.mxu2 %v5536_v17 }
 0x3e4   : > { %v3645_v26 = vpop.f32.mrf.mxu2 }
 0x3e5   : > { %v3646_v3 = vadd.f32 %v3645_v26, %v3597_v40  ;;  %v3550_v14 = vpop.f32.mrf.mxu0  ;;  %v6120_v26 = vld [vmem:[%s8884_s5 + $0x32c] sm:$0xf] }
 0x3e6   : > { %v3599_v34 = vpop.f32.mrf.mxu1  ;;  %v3551_v61 = vadd.f32 %v3550_v14, %v8382_v31 }
 0x3e8   : > { %v3600_v37 = vadd.f32 %v3599_v34, %v3551_v61  ;;  %v3689_v0 = vpop.f32.mrf.mxu3  ;;  %3745 = vmatmul.bf16.gmra.mxu0 %v7303_v6 }
 0x3e9   : > { %3794 = vmatmul.bf16.gmra.mxu1 %v7562_v12  ;;  %v3690_v44 = vadd.f32 %v3689_v0, %v3641_v16  ;;  %3843 = vmatmul.bf16.gmra.mxu2 %v7820_v20  ;;  %v6024_v16 = vld [vmem:[%s8884_s5 + $0x2c] sm:$0xf] }
 0x3ea   : > { %v5280_v61 = vor.u32 %v6024_v16, %v5277_v46 }
 0x3eb   : > { %v4133_v1 = vmax.f32 %v3690_v44, 0.0 }
 0x3ec   : > { %v3648_v40 = vpop.f32.mrf.mxu2  ;;  %3914 = vmatpush.bf16.msrb.mxu0 %v5280_v61 }
 0x3ed   : > { %v3649_v60 = vadd.f32 %v3648_v40, %v3600_v37  ;;  %3887 = vmatmul.bf16.gmra.mxu3 %v8026_v23  ;;  %v3552_v15 = vpop.f32.mrf.mxu0  ;;  %v8564_v14 = vpack.c.bf16 %v4133_v1, %v4129_v38  ;;  %v5661_v37 = vld [vmem:[%s8884_s5 + $0x338] sm:$0xf0] }
 0x3ee   : > { %v3601_v57 = vpop.f32.mrf.mxu1  ;;  %v3553_v34 = vadd.f32 %v3552_v15, %v8382_v31  ;;  %v5664_v0 = vor.u32 %v6120_v26, %v5661_v37  ;;  %v5405_v38 = vld [vmem:[%s8884_s5 + $0x138] sm:$0xf0]  ;;  %v6020_v26 = vld [vmem:[%s8884_s5 + $0xc] sm:$0xf] }
 0x3ef   : > { %v5408_v40 = vor.u32 %v6056_v36, %v5405_v38  ;;  %v5389_v37 = vld [vmem:[%s8884_s5 + $0x118] sm:$0xf0] }
 0x3f0   : > { %v3602_v44 = vadd.f32 %v3601_v57, %v3553_v34  ;;  %v3692_v49 = vpop.f32.mrf.mxu3  ;;  %4061 = vmatpush.bf16.msrb.mxu3 %v5664_v0  ;;  %v5261_v34 = vld [vmem:[%s8884_s5 + $0x18] sm:$0xf0]  ;;  %v6084_v0 = vld [vmem:[%s8884_s5 + $0x20c] sm:$0xf] }
 0x3f1   : > { %v3693_v1 = vadd.f32 %v3692_v49, %v3644_v27  ;;  %3963 = vmatpush.bf16.msrb.mxu1 %v5408_v40  ;;  %v6052_v27 = vld [vmem:[%s8884_s5 + $0x10c] sm:$0xf]  ;;  %v5264_v61 = vor.u32 %v6020_v26, %v5261_v34 }
 0x3f2   : > { %v5392_v38 = vor.u32 %v6052_v27, %v5389_v37 }
 0x3f3   : > { %3915 = vmatpush.bf16.msrb.mxu0 %v5264_v61 }
 0x3f4   : > { %v3650_v17 = vpop.f32.mrf.mxu2 }
 0x3f5   : > { %v3651_v15 = vadd.f32 %v3650_v17, %v3602_v44  ;;  %v3555_v16 = vpop.f32.mrf.mxu0  ;;  %v5517_v44 = vld [vmem:[%s8884_s5 + $0x218] sm:$0xf0]  ;;  %3964 = vmatpush.bf16.msrb.mxu1 %v5392_v38 }
 0x3f6   : > { %v3604_v46 = vpop.f32.mrf.mxu1  ;;  %v3556_v57 = vadd.f32 %v3555_v16, %v8382_v31  ;;  %v5520_v40 = vor.u32 %v6084_v0, %v5517_v44  ;;  %v4137_v16 = vmax.f32 %v3693_v1, 0.0 }
 0x3f8   : > { %v3605_v49 = vadd.f32 %v3604_v46, %v3556_v57  ;;  %v3694_v36 = vpop.f32.mrf.mxu3  ;;  %3750 = vmatmul.bf16.gmra.mxu0 %v8897_v25  ;;  %4013 = vmatpush.bf16.msrb.mxu2 %v5520_v40 }
 0x3f9   : > { %3799 = vmatmul.bf16.gmra.mxu1 %v7570_v53  ;;  %v3695_v17 = vadd.f32 %v3694_v36, %v3646_v3  ;;  %3848 = vmatmul.bf16.gmra.mxu2 %v7834_v11  ;;  %v5645_v3 = vld [vmem:[%s8884_s5 + $0x318] sm:$0xf0] }
 0x3fa   : > { %v5648_v1 = vor.u32 %v6116_v21, %v5645_v3 }
 0x3fb   : > { %v4141_v26 = vmax.f32 %v3695_v17, 0.0 }
 0x3fc   : > { %v3653_v34 = vpop.f32.mrf.mxu2  ;;  %4062 = vmatpush.bf16.msrb.mxu3 %v5648_v1 }
 0x3fd   : > { %v3654_v54 = vadd.f32 %v3653_v34, %v3605_v49  ;;  %3892 = vmatmul.bf16.gmra.mxu3 %v8076_v48  ;;  %v3557_v46 = vpop.f32.mrf.mxu0  ;;  %v8605_v27 = vpack.c.bf16 %v4141_v26, %v4137_v16 }
 0x3fe   : > { %v3606_v57 = vpop.f32.mrf.mxu1  ;;  %v3558_v61 = vadd.f32 %v3557_v46, %v8382_v31 }
 0x400   : > { %v3607_v37 = vadd.f32 %v3606_v57, %v3558_v61  ;;  %v3697_v0 = vpop.f32.mrf.mxu3 }
 0x401   : > { %v3698_v44 = vadd.f32 %v3697_v0, %v3649_v60 }
 0x403   : > { %v4145_v21 = vmax.f32 %v3698_v44, 0.0 }
 0x404   : > { %v3655_v49 = vpop.f32.mrf.mxu2 }
 0x405   : > { %v3656_v36 = vadd.f32 %v3655_v49, %v3607_v37  ;;  %v3560_v38 = vpop.f32.mrf.mxu0 }
 0x406   : > { %v3609_v40 = vpop.f32.mrf.mxu1  ;;  %v3561_v17 = vadd.f32 %v3560_v38, %v8382_v31 }
 0x408   : > { %v3610_v34 = vadd.f32 %v3609_v40, %v3561_v17  ;;  %v3699_v22 = vpop.f32.mrf.mxu3  ;;  %3755 = vmatmul.bf16.gmra.mxu0 %v8898_v56 }
 0x409   : > { %3804 = vmatmul.bf16.gmra.mxu1 %v7610_v4  ;;  %v3700_v16 = vadd.f32 %v3699_v22, %v3651_v15  ;;  %3853 = vmatmul.bf16.gmra.mxu2 %v7867_v62  ;;  %v8619_v22 = vld [vmem:[%s8885_s6] sm:$0xf] }
 0x40a   : > { %v8622_v15 = vperm.slane %v8619_v22, 2 }
 0x40b   : > { %v4149_v26 = vmax.f32 %v3700_v16, 0.0 }
 0x40c   : > { %v3658_v46 = vpop.f32.mrf.mxu2 }
 0x40d   : > { %v3659_v57 = vadd.f32 %v3658_v46, %v3610_v34  ;;  %3897 = vmatmul.bf16.gmra.mxu3 %v8096_v33  ;;  %v3562_v60 = vpop.f32.mrf.mxu0  ;;  %v8613_v61 = vpack.c.bf16 %v4149_v26, %v4145_v21 }
 0x40e   : > { %v3611_v3 = vpop.f32.mrf.mxu1  ;;  %v3563_v1 = vadd.f32 %v3562_v60, %v8382_v31 }
 0x410   : > { %v3612_v37 = vadd.f32 %v3611_v3, %v3563_v1  ;;  %v3702_v0 = vpop.f32.mrf.mxu3 }
 0x411   : > { %v3703_v49 = vadd.f32 %v3702_v0, %v3654_v54 }
 0x413   : > { %v4153_v54 = vmax.f32 %v3703_v49, 0.0  ;;  %v6178_v49 = vld [vmem:[%s8886_s7 + $0xf8] sm:$0xff] }
 0x414   : > { %v3660_v44 = vpop.f32.mrf.mxu2  ;;  %4607 = vmatpush.bf16.msra.mxu3 %v6178_v49 }
 0x415   : > { %v3661_v38 = vadd.f32 %v3660_v44, %v3612_v37  ;;  %v3721_v40 = vpop.f32.mrf.mxu0  ;;  %v6170_v37 = vld [vmem:[%s8886_s7 + $0xb8] sm:$0xff] }
 0x416   : > { %v3770_v17 = vpop.f32.mrf.mxu1  ;;  %v3722_v34 = vadd.f32 %v3721_v40, %v8622_v15  ;;  %4558 = vmatpush.bf16.msra.mxu2 %v6170_v37  ;;  %v6162_v40 = vld [vmem:[%s8886_s7 + $0x78] sm:$0xff] }
 0x417   : > { %4509 = vmatpush.bf16.msra.mxu1 %v6162_v40 }
 0x418   : > { %v3771_v16 = vadd.f32 %v3770_v17, %v3722_v34  ;;  %v3704_v21 = vpop.f32.mrf.mxu3  ;;  %3916 = vmatmul.bf16.vlgmr.msrb.gmra.mxu0 %v7143_v59 }
 0x419   : > { %3965 = vmatmul.bf16.vlgmr.msrb.gmra.mxu1 %v7402_v30  ;;  %v3705_v31 = vadd.f32 %v3704_v21, %v3656_v36  ;;  %4014 = vmatmul.bf16.vlgmr.msrb.gmra.mxu2 %v7642_v35  ;;  %v6154_v35 = vld [vmem:[%s8886_s7 + $0x38] sm:$0xff] }
 0x41a   : > { %4460 = vmatpush.bf16.msra.mxu0 %v6154_v35 }
 0x41b   : > { %v4157_v26 = vmax.f32 %v3705_v31, 0.0 }
 0x41c   : > { %v3819_v46 = vpop.f32.mrf.mxu2 }
 0x41d   : > { %v3820_v60 = vadd.f32 %v3819_v46, %v3771_v16  ;;  %3902 = vmatmul.bf16.gmra.mxu3 %v8131_v41  ;;  %v3723_v3 = vpop.f32.mrf.mxu0  ;;  %v8632_v0 = vpack.c.bf16 %v4157_v26, %v4153_v54 }
 0x41e   : > { %v3772_v1 = vpop.f32.mrf.mxu1  ;;  %v3724_v59 = vadd.f32 %v3723_v3, %v8622_v15 }
 0x420   : > { %v3773_v30 = vadd.f32 %v3772_v1, %v3724_v59  ;;  %v3707_v36 = vpop.f32.mrf.mxu3 }
 0x421   : > { %v3708_v44 = vadd.f32 %v3707_v36, %v3659_v57  ;;  %v6169_v36 = vld [vmem:[%s8886_s7 + $0xb0] sm:$0xff] }
 0x422   : > { %4559 = vmatpush.bf16.msra.mxu2 %v6169_v36 }
 0x423   : > { %v4161_v46 = vmax.f32 %v3708_v44, 0.0  ;;  %v6161_v44 = vld [vmem:[%s8886_s7 + $0x70] sm:$0xff] }
 0x424   : > { %v3821_v17 = vpop.f32.mrf.mxu2  ;;  %4510 = vmatpush.bf16.msra.mxu1 %v6161_v44 }
 0x425   : > { %v3822_v34 = vadd.f32 %v3821_v17, %v3773_v30  ;;  %v3726_v16 = vpop.f32.mrf.mxu0 }
 0x426   : > { %v3775_v21 = vpop.f32.mrf.mxu1  ;;  %v3727_v31 = vadd.f32 %v3726_v16, %v8622_v15 }
 0x428   : > { %v3776_v54 = vadd.f32 %v3775_v21, %v3727_v31  ;;  %v3709_v26 = vpop.f32.mrf.mxu3  ;;  %3921 = vmatmul.bf16.gmra.mxu0 %v7175_v63 }
 0x429   : > { %3970 = vmatmul.bf16.gmra.mxu1 %v7434_v2  ;;  %v3710_v57 = vadd.f32 %v3709_v26, %v3661_v38  ;;  %4019 = vmatmul.bf16.gmra.mxu2 %v7674_v47  ;;  %v6153_v47 = vld [vmem:[%s8886_s7 + $0x30] sm:$0xff] }
 0x42a   : > { %4461 = vmatpush.bf16.msra.mxu0 %v6153_v47 }
 0x42b   : > { %v4165_v3 = vmax.f32 %v3710_v57, 0.0 }
 0x42c   : > { %v3824_v1 = vpop.f32.mrf.mxu2 }
 0x42d   : > { %v3825_v37 = vadd.f32 %v3824_v1, %v3776_v54  ;;  %4063 = vmatmul.bf16.vlgmr.msrb.gmra.mxu3 %v7898_v9  ;;  %v3728_v59 = vpop.f32.mrf.mxu0  ;;  %v8652_v35 = vpack.c.bf16 %v4165_v3, %v4161_v46  ;;  %v6177_v9 = vld [vmem:[%s8886_s7 + $0xf0] sm:$0xff] }
 0x42e   : > { %v3777_v30 = vpop.f32.mrf.mxu1  ;;  %v3729_v63 = vadd.f32 %v3728_v59, %v8622_v15  ;;  %4608 = vmatpush.bf16.msra.mxu3 %v6177_v9 }
 0x430   : > { %v3778_v2 = vadd.f32 %v3777_v30, %v3729_v63  ;;  %v3868_v38 = vpop.f32.mrf.mxu3  ;;  %v6168_v63 = vld [vmem:[%s8886_s7 + $0xa8] sm:$0xff] }
 0x431   : > { %v3869_v49 = vadd.f32 %v3868_v38, %v3820_v60  ;;  %4560 = vmatpush.bf16.msra.mxu2 %v6168_v63  ;;  %v6160_v38 = vld [vmem:[%s8886_s7 + $0x68] sm:$0xff]  ;;  %v6159_v63 = vld [vmem:[%s8886_s7 + $0x60] sm:$0xff] }
 0x432   : > { %4511 = vmatpush.bf16.msra.mxu1 %v6160_v38 }
 0x433   : > { %v4106_v57 = vmax.f32 %v3869_v49, 0.0 }
 0x434   : > { %v3826_v40 = vpop.f32.mrf.mxu2 }
 0x435   : > { %v3827_v17 = vadd.f32 %v3826_v40, %v3778_v2  ;;  %v3731_v16 = vpop.f32.mrf.mxu0  ;;  %v6176_v2 = vld [vmem:[%s8886_s7 + $0xe8] sm:$0xff] }
 0x436   : > { %v3780_v21 = vpop.f32.mrf.mxu1  ;;  %v3732_v31 = vadd.f32 %v3731_v16, %v8622_v15  ;;  %4609 = vmatpush.bf16.msra.mxu3 %v6176_v2  ;;  %4512 = vmatpush.bf16.msra.mxu1 %v6159_v63 }
 0x438   : > { %v3781_v54 = vadd.f32 %v3780_v21, %v3732_v31  ;;  %v3870_v26 = vpop.f32.mrf.mxu3  ;;  %3926 = vmatmul.bf16.gmra.mxu0 %v7207_v32 }
 0x439   : > { %3975 = vmatmul.bf16.gmra.mxu1 %v7466_v39  ;;  %v3871_v60 = vadd.f32 %v3870_v26, %v3822_v34  ;;  %4024 = vmatmul.bf16.gmra.mxu2 %v7706_v51  ;;  %v6152_v51 = vld [vmem:[%s8886_s7 + $0x28] sm:$0xff] }
 0x43a   : > { %4462 = vmatpush.bf16.msra.mxu0 %v6152_v51 }
 0x43b   : > { %v4110_v46 = vmax.f32 %v3871_v60, 0.0 }
 0x43c   : > { %v3829_v3 = vpop.f32.mrf.mxu2 }
 0x43d   : > { %v8668_v1 = vpack.c.bf16 %v4110_v46, %v4106_v57  ;;  %v3830_v59 = vadd.f32 %v3829_v3, %v3781_v54  ;;  %4068 = vmatmul.bf16.gmra.mxu3 %v7930_v55  ;;  %v3733_v30 = vpop.f32.mrf.mxu0  ;;  %v6167_v3 = vld [vmem:[%s8886_s7 + $0xa0] sm:$0xff] }
 0x43e   : > { %v3782_v36 = vpop.f32.mrf.mxu1  ;;  %v3734_v32 = vadd.f32 %v3733_v30, %v8622_v15  ;;  %4561 = vmatpush.bf16.msra.mxu2 %v6167_v3 }
 0x440   : > { %v3783_v39 = vadd.f32 %v3782_v36, %v3734_v32  ;;  %v3873_v34 = vpop.f32.mrf.mxu3 }
 0x441   : > { %v3874_v55 = vadd.f32 %v3873_v34, %v3825_v37 }
 0x443   : > { %v4114_v31 = vmax.f32 %v3874_v55, 0.0 }
 0x444   : > { %v3831_v47 = vpop.f32.mrf.mxu2 }
 0x445   : > { %v3832_v9 = vadd.f32 %v3831_v47, %v3783_v39  ;;  %v3736_v49 = vpop.f32.mrf.mxu0 }
 0x446   : > { %v3785_v44 = vpop.f32.mrf.mxu1  ;;  %v3737_v40 = vadd.f32 %v3736_v49, %v8622_v15 }
 0x448   : > { %v3786_v16 = vadd.f32 %v3785_v44, %v3737_v40  ;;  %v3875_v21 = vpop.f32.mrf.mxu3  ;;  %3931 = vmatmul.bf16.gmra.mxu0 %v7239_v10 }
 0x449   : > { %3980 = vmatmul.bf16.gmra.mxu1 %v7498_v52  ;;  %v3876_v37 = vadd.f32 %v3875_v21, %v3827_v17  ;;  %4029 = vmatmul.bf16.gmra.mxu2 %v7738_v58  ;;  %v6151_v58 = vld [vmem:[%s8886_s7 + $0x20] sm:$0xff] }
 0x44a   : > { %4463 = vmatpush.bf16.msra.mxu0 %v6151_v58 }
 0x44b   : > { %v4118_v54 = vmax.f32 %v3876_v37, 0.0  ;;  %v6166_v37 = vld [vmem:[%s8886_s7 + $0x98] sm:$0xff] }
 0x44c   : > { %v3834_v26 = vpop.f32.mrf.mxu2  ;;  %4562 = vmatpush.bf16.msra.mxu2 %v6166_v37 }
 0x44d   : > { %v3835_v60 = vadd.f32 %v3834_v26, %v3786_v16  ;;  %4073 = vmatmul.bf16.gmra.mxu3 %v7962_v43  ;;  %v3738_v57 = vpop.f32.mrf.mxu0  ;;  %v8692_v30 = vpack.c.bf16 %v4118_v54, %v4114_v31  ;;  %v6175_v43 = vld [vmem:[%s8886_s7 + $0xe0] sm:$0xff]  ;;  %v6158_v26 = vld [vmem:[%s8886_s7 + $0x58] sm:$0xff] }
 0x44e   : > { %v3787_v46 = vpop.f32.mrf.mxu1  ;;  %v3739_v10 = vadd.f32 %v3738_v57, %v8622_v15  ;;  %4610 = vmatpush.bf16.msra.mxu3 %v6175_v43  ;;  %4513 = vmatpush.bf16.msra.mxu1 %v6158_v26 }
 0x450   : > { %v3788_v52 = vadd.f32 %v3787_v46, %v3739_v10  ;;  %v3878_v17 = vpop.f32.mrf.mxu3 }
 0x451   : > { %v3879_v36 = vadd.f32 %v3878_v17, %v3830_v59 }
 0x453   : > { %v4122_v47 = vmax.f32 %v3879_v36, 0.0 }
 0x454   : > { %v3836_v32 = vpop.f32.mrf.mxu2 }
 0x455   : > { %v3837_v39 = vadd.f32 %v3836_v32, %v3788_v52  ;;  %v3741_v34 = vpop.f32.mrf.mxu0 }
 0x456   : > { %v3790_v51 = vpop.f32.mrf.mxu1  ;;  %v3742_v2 = vadd.f32 %v3741_v34, %v8622_v15 }
 0x458   : > { %v3791_v55 = vadd.f32 %v3790_v51, %v3742_v2  ;;  %v3880_v38 = vpop.f32.mrf.mxu3  ;;  %3936 = vmatmul.bf16.gmra.mxu0 %v7271_v28  ;;  %v6165_v2 = vld [vmem:[%s8886_s7 + $0x90] sm:$0xff] }
 0x459   : > { %3985 = vmatmul.bf16.gmra.mxu1 %v7530_v29  ;;  %v3881_v59 = vadd.f32 %v3880_v38, %v3832_v9  ;;  %4034 = vmatmul.bf16.gmra.mxu2 %v7770_v8  ;;  %v6150_v8 = vld [vmem:[%s8886_s7 + $0x18] sm:$0xff]  ;;  %v6173_v38 = vld [vmem:[%s8886_s7 + $0xd0] sm:$0xff] }
 0x45a   : > { %4464 = vmatpush.bf16.msra.mxu0 %v6150_v8  ;;  %4563 = vmatpush.bf16.msra.mxu2 %v6165_v2  ;;  %v6163_v8 = vld [vmem:[%s8886_s7 + $0x80] sm:$0xff] }
 0x45b   : > { %v4126_v49 = vmax.f32 %v3881_v59, 0.0 }
 0x45c   : > { %v3839_v44 = vpop.f32.mrf.mxu2 }
 0x45d   : > { %v3840_v40 = vadd.f32 %v3839_v44, %v3791_v55  ;;  %4078 = vmatmul.bf16.gmra.mxu3 %v7994_v19  ;;  %v3743_v16 = vpop.f32.mrf.mxu0  ;;  %v8712_v31 = vpack.c.bf16 %v4126_v49, %v4122_v47  ;;  %v6174_v19 = vld [vmem:[%s8886_s7 + $0xd8] sm:$0xff]  ;;  %v6148_v47 = vld [vmem:[%s8886_s7 + $0x8] sm:$0xff] }
 0x45e   : > { %v3792_v21 = vpop.f32.mrf.mxu1  ;;  %v3744_v28 = vadd.f32 %v3743_v16, %v8622_v15  ;;  %4611 = vmatpush.bf16.msra.mxu3 %v6174_v19  ;;  %v6156_v49 = vld [vmem:[%s8886_s7 + $0x48] sm:$0xff] }
 0x45f   : > { %v6164_v44 = vld [vmem:[%s8886_s7 + $0x88] sm:$0xff] }
 0x460   : > { %v3793_v29 = vadd.f32 %v3792_v21, %v3744_v28  ;;  %v3883_v9 = vpop.f32.mrf.mxu3  ;;  %4564 = vmatpush.bf16.msra.mxu2 %v6164_v44 }
 0x461   : > { %v3884_v54 = vadd.f32 %v3883_v9, %v3835_v60  ;;  %v6155_v9 = vld [vmem:[%s8886_s7 + $0x40] sm:$0xff] }
 0x462   : > { %4612 = vmatpush.bf16.msra.mxu3 %v6173_v38 }
 0x463   : > { %v4130_v43 = vmax.f32 %v3884_v54, 0.0 }
 0x464   : > { %v3841_v57 = vpop.f32.mrf.mxu2  ;;  %4565 = vmatpush.bf16.msra.mxu2 %v6163_v8 }
 0x465   : > { %v3842_v46 = vadd.f32 %v3841_v57, %v3793_v29  ;;  %v3746_v3 = vpop.f32.mrf.mxu0  ;;  %v6147_v29 = vld [vmem:[%s8886_s7] sm:$0xff] }
 0x466   : > { %v3795_v10 = vpop.f32.mrf.mxu1  ;;  %v3747_v52 = vadd.f32 %v3746_v3, %v8622_v15 }
 0x468   : > { %v3796_v17 = vadd.f32 %v3795_v10, %v3747_v52  ;;  %v3885_v58 = vpop.f32.mrf.mxu3  ;;  %3941 = vmatmul.bf16.gmra.mxu0 %v7303_v6 }
 0x469   : > { %3990 = vmatmul.bf16.gmra.mxu1 %v7562_v12  ;;  %v3886_v60 = vadd.f32 %v3885_v58, %v3837_v39  ;;  %4039 = vmatmul.bf16.gmra.mxu2 %v7820_v20  ;;  %v6149_v12 = vld [vmem:[%s8886_s7 + $0x10] sm:$0xff] }
 0x46a   : > { %v6157_v20 = vld [vmem:[%s8886_s7 + $0x50] sm:$0xff]  ;;  %4465 = vmatpush.bf16.msra.mxu0 %v6149_v12 }
 0x46b   : > { %v4134_v36 = vmax.f32 %v3886_v60, 0.0  ;;  %4514 = vmatpush.bf16.msra.mxu1 %v6157_v20 }
 0x46c   : > { %v3844_v63 = vpop.f32.mrf.mxu2 }
 0x46d   : > { %v3845_v32 = vadd.f32 %v3844_v63, %v3796_v17  ;;  %4083 = vmatmul.bf16.gmra.mxu3 %v8026_v23  ;;  %v3748_v34 = vpop.f32.mrf.mxu0  ;;  %v8732_v55 = vpack.c.bf16 %v4134_v36, %v4130_v43 }
 0x46e   : > { %v3797_v51 = vpop.f32.mrf.mxu1  ;;  %v3749_v6 = vadd.f32 %v3748_v34, %v8622_v15  ;;  %4466 = vmatpush.bf16.msra.mxu0 %v6148_v47 }
 0x46f   : > { %4515 = vmatpush.bf16.msra.mxu1 %v6156_v49 }
 0x470   : > { %v3798_v23 = vadd.f32 %v3797_v51, %v3749_v6  ;;  %v3888_v39 = vpop.f32.mrf.mxu3 }
 0x471   : > { %v3889_v59 = vadd.f32 %v3888_v39, %v3840_v40 }
 0x472   : > { %4467 = vmatpush.bf16.msra.mxu0 %v6147_v29 }
 0x473   : > { %4516 = vmatpush.bf16.msra.mxu1 %v6155_v9  ;;  %v4138_v57 = vmax.f32 %v3889_v59, 0.0 }
 0x474   : > { %v3846_v16 = vpop.f32.mrf.mxu2 }
 0x475   : > { %v3847_v21 = vadd.f32 %v3846_v16, %v3798_v23  ;;  %v3751_v37 = vpop.f32.mrf.mxu0 }
 0x476   : > { %v3800_v28 = vpop.f32.mrf.mxu1  ;;  %v3752_v40 = vadd.f32 %v3751_v37, %v8622_v15 }
 0x478   : > { %v3801_v19 = vadd.f32 %v3800_v28, %v3752_v40  ;;  %v3890_v54 = vpop.f32.mrf.mxu3  ;;  %3946 = vmatmul.bf16.gmra.mxu0 %v8897_v25 }
 0x479   : > { %3995 = vmatmul.bf16.gmra.mxu1 %v7570_v53  ;;  %v3891_v26 = vadd.f32 %v3890_v54, %v3842_v46  ;;  %4044 = vmatmul.bf16.gmra.mxu2 %v7834_v11  ;;  %v6172_v11 = vld [vmem:[%s8886_s7 + $0xc8] sm:$0xff] }
 0x47a   : > { %4613 = vmatpush.bf16.msra.mxu3 %v6172_v11 }
 0x47b   : > { %v4142_v3 = vmax.f32 %v3891_v26, 0.0 }
 0x47c   : > { %v3849_v10 = vpop.f32.mrf.mxu2 }
 0x47d   : > { %v3850_v52 = vadd.f32 %v3849_v10, %v3801_v19  ;;  %4088 = vmatmul.bf16.gmra.mxu3 %v8076_v48  ;;  %v3753_v17 = vpop.f32.mrf.mxu0  ;;  %v8767_v60 = vpack.c.bf16 %v4142_v3, %v4138_v57 }
 0x47e   : > { %v3802_v58 = vpop.f32.mrf.mxu1  ;;  %v3754_v25 = vadd.f32 %v3753_v17, %v8622_v15 }
 0x480   : > { %v3803_v43 = vadd.f32 %v3802_v58, %v3754_v25  ;;  %v3893_v53 = vpop.f32.mrf.mxu3 }
 0x481   : > { %v3894_v46 = vadd.f32 %v3893_v53, %v3845_v32 }
 0x483   : > { %v4146_v20 = vmax.f32 %v3894_v46, 0.0 }
 0x484   : > { %v3851_v36 = vpop.f32.mrf.mxu2 }
 0x485   : > { %v3852_v63 = vadd.f32 %v3851_v36, %v3803_v43  ;;  %v3756_v34 = vpop.f32.mrf.mxu0 }
 0x486   : > { %v3805_v51 = vpop.f32.mrf.mxu1  ;;  %v3757_v48 = vadd.f32 %v3756_v34, %v8622_v15 }
 0x488   : > { %v3806_v2 = vadd.f32 %v3805_v51, %v3757_v48  ;;  %v3895_v6 = vpop.f32.mrf.mxu3  ;;  %3951 = vmatmul.bf16.gmra.mxu0 %v8898_v56 }
 0x489   : > { %4000 = vmatmul.bf16.gmra.mxu1 %v7610_v4  ;;  %v3896_v12 = vadd.f32 %v3895_v6, %v3847_v21  ;;  %4049 = vmatmul.bf16.gmra.mxu2 %v7867_v62  ;;  %v6171_v4 = vld [vmem:[%s8886_s7 + $0xc0] sm:$0xff] }
 0x48a   : > { %4614 = vmatpush.bf16.msra.mxu3 %v6171_v4 }
 0x48b   : > { %v4150_v23 = vmax.f32 %v3896_v12, 0.0 }
 0x48c   : > { %v3854_v39 = vpop.f32.mrf.mxu2 }
 0x48d   : > { %v3855_v32 = vadd.f32 %v3854_v39, %v3806_v2  ;;  %4093 = vmatmul.bf16.gmra.mxu3 %v8096_v33  ;;  %v3758_v38 = vpop.f32.mrf.mxu0  ;;  %v8778_v47 = vpack.c.bf16 %v4150_v23, %v4146_v20 }
 0x48e   : > { %v3807_v59 = vpop.f32.mrf.mxu1  ;;  %v3759_v49 = vadd.f32 %v3758_v38, %v8622_v15 }
 0x490   : > { %v3808_v44 = vadd.f32 %v3807_v59, %v3759_v49  ;;  %v3898_v16 = vpop.f32.mrf.mxu3 }
 0x491   : > { %v3899_v56 = vadd.f32 %v3898_v16, %v3850_v52 }
 0x493   : > { %v4154_v15 = vmax.f32 %v3899_v56, 0.0 }
 0x494   : > { %v3856_v62 = vpop.f32.mrf.mxu2 }
 0x495   : > { %v3857_v21 = vadd.f32 %v3856_v62, %v3808_v44  ;;  %v3917_v37 = vpop.f32.mrf.mxu0 }
 0x496   : > { %v3966_v28 = vpop.f32.mrf.mxu1 }
 0x498   : > { %v3900_v40 = vpop.f32.mrf.mxu3  ;;  %4468 = vmatmul.bf16.vlgmr.msra.gmra.mxu0 %v8199_v5 }
 0x499   : > { %4517 = vmatmul.bf16.vlgmr.msra.gmra.mxu1 %v8458_v50  ;;  %v3901_v33 = vadd.f32 %v3900_v40, %v3852_v63  ;;  %4566 = vmatmul.bf16.vlgmr.msra.gmra.mxu2 %v8668_v1  ;;  %v8794_v1 = vperm.slane %v8619_v22, 3 }
 0x49b   : > { %v4158_v29 = vmax.f32 %v3901_v33, 0.0  ;;  %v3918_v11 = vadd.f32 %v3917_v37, %v8794_v1 }
 0x49c   : > { %v4015_v9 = vpop.f32.mrf.mxu2 }
 0x49d   : > { %4098 = vmatmul.bf16.gmra.mxu3 %v8131_v41  ;;  %v3919_v8 = vpop.f32.mrf.mxu0  ;;  %v8788_v54 = vpack.c.bf16 %v4158_v29, %v4154_v15  ;;  %v3967_v36 = vadd.f32 %v3966_v28, %v3918_v11 }
 0x49e   : > { %v3968_v19 = vpop.f32.mrf.mxu1 }
 0x49f   : > { %v4016_v63 = vadd.f32 %v4015_v9, %v3967_v36 }
 0x4a0   : > { %v3903_v26 = vpop.f32.mrf.mxu3 }
 0x4a1   : > { %v3904_v57 = vadd.f32 %v3903_v26, %v3855_v32 }
 0x4a3   : > { %v4162_v41 = vmax.f32 %v3904_v57, 0.0 }
 0x4a4   : > { %v4017_v3 = vpop.f32.mrf.mxu2 }
 0x4a5   : > { %v3922_v10 = vpop.f32.mrf.mxu0 }
 0x4a6   : > { %v3971_v52 = vpop.f32.mrf.mxu1  ;;  %v3923_v59 = vadd.f32 %v3922_v10, %v8794_v1 }
 0x4a8   : > { %v3905_v5 = vpop.f32.mrf.mxu3  ;;  %4473 = vmatmul.bf16.gmra.mxu0 %v8241_v7  ;;  %v3920_v7 = vadd.f32 %v3919_v8, %v8794_v1  ;;  %v3972_v16 = vadd.f32 %v3971_v52, %v3923_v59 }
 0x4a9   : > { %4522 = vmatmul.bf16.gmra.mxu1 %v8500_v45  ;;  %v3906_v50 = vadd.f32 %v3905_v5, %v3857_v21  ;;  %4571 = vmatmul.bf16.gmra.mxu2 %v8692_v30 }
 0x4aa   : > { %v3969_v34 = vadd.f32 %v3968_v19, %v3920_v7 }
 0x4ab   : > { %v4166_v17 = vmax.f32 %v3906_v50, 0.0 }
 0x4ac   : > { %v4020_v58 = vpop.f32.mrf.mxu2  ;;  %v4018_v22 = vadd.f32 %v4017_v3, %v3969_v34 }
 0x4ad   : > { %v3924_v25 = vpop.f32.mrf.mxu0  ;;  %v8796_v53 = vpack.c.bf16 %v4166_v17, %v4162_v41 }
 0x4ae   : > { %v3973_v43 = vpop.f32.mrf.mxu1  ;;  %v3925_v44 = vadd.f32 %v3924_v25, %v8794_v1 }
 0x4b0   : > { %v4064_v46 = vpop.f32.mrf.mxu3  ;;  %v3974_v56 = vadd.f32 %v3973_v43, %v3925_v44 }
 0x4b1   : > { %v4065_v48 = vadd.f32 %v4064_v46, %v4016_v63 }
 0x4b3   : > { %v4107_v12 = vmax.f32 %v4065_v48, 0.0 }
 0x4b4   : > { %v4022_v45 = vpop.f32.mrf.mxu2 }
 0x4b5   : > { %v3927_v30 = vpop.f32.mrf.mxu0  ;;  %v4023_v21 = vadd.f32 %v4022_v45, %v3974_v56 }
 0x4b6   : > { %v3976_v51 = vpop.f32.mrf.mxu1  ;;  %v3928_v19 = vadd.f32 %v3927_v30, %v8794_v1 }
 0x4b8   : > { %v4066_v2 = vpop.f32.mrf.mxu3  ;;  %4478 = vmatmul.bf16.gmra.mxu0 %v8273_v13  ;;  %v4021_v13 = vadd.f32 %v4020_v58, %v3972_v16  ;;  %v3977_v3 = vadd.f32 %v3976_v51, %v3928_v19 }
 0x4b9   : > { %4527 = vmatmul.bf16.gmra.mxu1 %v8532_v42  ;;  %v4067_v6 = vadd.f32 %v4066_v2, %v4018_v22  ;;  %4576 = vmatmul.bf16.gmra.mxu2 %v8712_v31 }
 0x4bb   : > { %v4111_v20 = vmax.f32 %v4067_v6, 0.0  ;;  %v8902_v6 = vld [vmem:[#allocation2_spill] sm:$0xff] }
 0x4bc   : > { %v4025_v23 = vpop.f32.mrf.mxu2 }
 0x4bd   : > { %v4171_v39 = vpack.c.bf16 %v4111_v20, %v4107_v12  ;;  %v3929_v32 = vpop.f32.mrf.mxu0 }
 0x4be   : > { %v3978_v38 = vpop.f32.mrf.mxu1  ;;  %v3930_v57 = vadd.f32 %v3929_v32, %v8794_v1 }
 0x4bf   : > { %4615 = vmatmul.bf16.vlgmr.msra.gmra.mxu3 %v4171_v39 }
 0x4c0   : > { %v4069_v49 = vpop.f32.mrf.mxu3  ;;  %v3979_v52 = vadd.f32 %v3978_v38, %v3930_v57 }
 0x4c1   : > { %v4070_v31 = vadd.f32 %v4069_v49, %v4021_v13 }
 0x4c3   : > { %v4115_v40 = vmax.f32 %v4070_v31, 0.0 }
 0x4c4   : > { %v4027_v4 = vpop.f32.mrf.mxu2 }
 0x4c5   : > { %v3932_v42 = vpop.f32.mrf.mxu0  ;;  %v4028_v50 = vadd.f32 %v4027_v4, %v3979_v52 }
 0x4c6   : > { %v3981_v62 = vpop.f32.mrf.mxu1  ;;  %v3933_v36 = vadd.f32 %v3932_v42, %v8794_v1 }
 0x4c8   : > { %v4071_v37 = vpop.f32.mrf.mxu3  ;;  %4483 = vmatmul.bf16.gmra.mxu0 %v8305_v24  ;;  %v4026_v24 = vadd.f32 %v4025_v23, %v3977_v3  ;;  %v3982_v34 = vadd.f32 %v3981_v62, %v3933_v36 }
 0x4c9   : > { %4532 = vmatmul.bf16.gmra.mxu1 %v8564_v14  ;;  %v4072_v28 = vadd.f32 %v4071_v37, %v4023_v21  ;;  %4581 = vmatmul.bf16.gmra.mxu2 %v8732_v55  ;;  %v8903_v37 = vld [vmem:[#allocation3_spill] sm:$0xff] }
 0x4cb   : > { %v4119_v33 = vmax.f32 %v4072_v28, 0.0 }
 0x4cc   : > { %v4030_v15 = vpop.f32.mrf.mxu2 }
 0x4cd   : > { %v3934_v29 = vpop.f32.mrf.mxu0  ;;  %v4175_v8 = vpack.c.bf16 %v4119_v33, %v4115_v40 }
 0x4ce   : > { %v3983_v9 = vpop.f32.mrf.mxu1  ;;  %v3935_v63 = vadd.f32 %v3934_v29, %v8794_v1 }
 0x4cf   : > { %4620 = vmatmul.bf16.gmra.mxu3 %v4175_v8 }
 0x4d0   : > { %v4074_v26 = vpop.f32.mrf.mxu3  ;;  %v3984_v51 = vadd.f32 %v3983_v9, %v3935_v63 }
 0x4d1   : > { %v4075_v55 = vadd.f32 %v4074_v26, %v4026_v24 }
 0x4d3   : > { %v4123_v58 = vmax.f32 %v4075_v55, 0.0 }
 0x4d4   : > { %v4032_v10 = vpop.f32.mrf.mxu2 }
 0x4d5   : > { %v3937_v14 = vpop.f32.mrf.mxu0  ;;  %v4033_v48 = vadd.f32 %v4032_v10, %v3984_v51 }
 0x4d6   : > { %v3986_v5 = vpop.f32.mrf.mxu1  ;;  %v3938_v49 = vadd.f32 %v3937_v14, %v8794_v1 }
 0x4d8   : > { %v4076_v41 = vpop.f32.mrf.mxu3  ;;  %4488 = vmatmul.bf16.gmra.mxu0 %v8346_v18  ;;  %v4031_v18 = vadd.f32 %v4030_v15, %v3982_v34  ;;  %v3987_v4 = vadd.f32 %v3986_v5, %v3938_v49 }
 0x4d9   : > { %4537 = vmatmul.bf16.gmra.mxu1 %v8605_v27  ;;  %v4077_v17 = vadd.f32 %v4076_v41, %v4028_v50  ;;  %4586 = vmatmul.bf16.gmra.mxu2 %v8767_v60  ;;  %v8904_v50 = vld [vmem:[#allocation4_spill] sm:$0xff] }
 0x4db   : > { %v4127_v25 = vmax.f32 %v4077_v17, 0.0 }
 0x4dc   : > { %v4035_v43 = vpop.f32.mrf.mxu2 }
 0x4dd   : > { %v3939_v11 = vpop.f32.mrf.mxu0  ;;  %v4179_v7 = vpack.c.bf16 %v4127_v25, %v4123_v58  ;;  %v4036_v56 = vadd.f32 %v4035_v43, %v3987_v4 }
 0x4de   : > { %v3988_v46 = vpop.f32.mrf.mxu1  ;;  %v3940_v16 = vadd.f32 %v3939_v11, %v8794_v1 }
 0x4df   : > { %4625 = vmatmul.bf16.gmra.mxu3 %v4179_v7 }
 0x4e0   : > { %v4079_v45 = vpop.f32.mrf.mxu3  ;;  %v3989_v42 = vadd.f32 %v3988_v46, %v3940_v16 }
 0x4e1   : > { %v4080_v60 = vadd.f32 %v4079_v45, %v4031_v18 }
 0x4e3   : > { %v4131_v20 = vmax.f32 %v4080_v60, 0.0 }
 0x4e4   : > { %v4037_v30 = vpop.f32.mrf.mxu2 }
 0x4e5   : > { %v3942_v27 = vpop.f32.mrf.mxu0  ;;  %v4038_v62 = vadd.f32 %v4037_v30, %v3989_v42 }
 0x4e6   : > { %v3991_v22 = vpop.f32.mrf.mxu1  ;;  %v3943_v8 = vadd.f32 %v3942_v27, %v8794_v1 }
 0x4e8   : > { %v4081_v2 = vpop.f32.mrf.mxu3  ;;  %4493 = vmatmul.bf16.gmra.mxu0 %v8902_v6  ;;  %v3992_v3 = vadd.f32 %v3991_v22, %v3943_v8 }
 0x4e9   : > { %4542 = vmatmul.bf16.gmra.mxu1 %v8613_v61  ;;  %v4082_v12 = vadd.f32 %v4081_v2, %v4033_v48  ;;  %4591 = vmatmul.bf16.gmra.mxu2 %v8778_v47 }
 0x4eb   : > { %v4135_v23 = vmax.f32 %v4082_v12, 0.0 }
 0x4ec   : > { %v4040_v39 = vpop.f32.mrf.mxu2 }
 0x4ed   : > { %v3944_v32 = vpop.f32.mrf.mxu0  ;;  %v4183_v59 = vpack.c.bf16 %v4135_v23, %v4131_v20  ;;  %v4041_v24 = vadd.f32 %v4040_v39, %v3992_v3 }
 0x4ee   : > { %v3993_v38 = vpop.f32.mrf.mxu1  ;;  %v3945_v26 = vadd.f32 %v3944_v32, %v8794_v1 }
 0x4ef   : > { %4630 = vmatmul.bf16.gmra.mxu3 %v4183_v59 }
 0x4f0   : > { %v4084_v44 = vpop.f32.mrf.mxu3  ;;  %v3994_v52 = vadd.f32 %v3993_v38, %v3945_v26 }
 0x4f1   : > { %v4085_v21 = vadd.f32 %v4084_v44, %v4036_v56 }
 0x4f3   : > { %v4139_v40 = vmax.f32 %v4085_v21, 0.0 }
 0x4f4   : > { %v4042_v13 = vpop.f32.mrf.mxu2 }
 0x4f5   : > { %v3947_v61 = vpop.f32.mrf.mxu0  ;;  %v4043_v14 = vadd.f32 %v4042_v13, %v3994_v52 }
 0x4f6   : > { %v3996_v47 = vpop.f32.mrf.mxu1  ;;  %v3948_v11 = vadd.f32 %v3947_v61, %v8794_v1 }
 0x4f8   : > { %v4086_v31 = vpop.f32.mrf.mxu3  ;;  %4498 = vmatmul.bf16.gmra.mxu0 %v8903_v37  ;;  %v3997_v45 = vadd.f32 %v3996_v47, %v3948_v11 }
 0x4f9   : > { %4547 = vmatmul.bf16.gmra.mxu1 %v8632_v0  ;;  %v4087_v28 = vadd.f32 %v4086_v31, %v4038_v62  ;;  %4596 = vmatmul.bf16.gmra.mxu2 %v8788_v54 }
 0x4fb   : > { %v4143_v33 = vmax.f32 %v4087_v28, 0.0 }
 0x4fc   : > { %v4045_v15 = vpop.f32.mrf.mxu2 }
 0x4fd   : > { %v4187_v29 = vpack.c.bf16 %v4143_v33, %v4139_v40  ;;  %v3949_v9 = vpop.f32.mrf.mxu0  ;;  %v4046_v63 = vadd.f32 %v4045_v15, %v3997_v45 }
 0x4fe   : > { %v3998_v57 = vpop.f32.mrf.mxu1  ;;  %v3950_v36 = vadd.f32 %v3949_v9, %v8794_v1 }
 0x4ff   : > { %4635 = vmatmul.bf16.gmra.mxu3 %v4187_v29 }
 0x500   : > { %v4089_v19 = vpop.f32.mrf.mxu3  ;;  %v3999_v34 = vadd.f32 %v3998_v57, %v3950_v36 }
 0x501   : > { %v4090_v5 = vadd.f32 %v4089_v19, %v4041_v24 }
 0x503   : > { %v4147_v41 = vmax.f32 %v4090_v5, 0.0 }
 0x504   : > { %v4047_v10 = vpop.f32.mrf.mxu2 }
 0x505   : > { %v3952_v0 = vpop.f32.mrf.mxu0  ;;  %v4048_v18 = vadd.f32 %v4047_v10, %v3999_v34 }
 0x506   : > { %v4001_v17 = vpop.f32.mrf.mxu1  ;;  %v3953_v6 = vadd.f32 %v3952_v0, %v8794_v1 }
 0x508   : > { %v4091_v54 = vpop.f32.mrf.mxu3  ;;  %4503 = vmatmul.bf16.gmra.mxu0 %v8904_v50  ;;  %v4002_v32 = vadd.f32 %v4001_v17, %v3953_v6 }
 0x509   : > { %4552 = vmatmul.bf16.gmra.mxu1 %v8652_v35  ;;  %v4092_v55 = vadd.f32 %v4091_v54, %v4043_v14  ;;  %4601 = vmatmul.bf16.gmra.mxu2 %v8796_v53 }
 0x50b   : > { %v4151_v58 = vmax.f32 %v4092_v55, 0.0 }
 0x50c   : > { %v4050_v25 = vpop.f32.mrf.mxu2 }
 0x50d   : > { %v4191_v43 = vpack.c.bf16 %v4151_v58, %v4147_v41  ;;  %v3954_v46 = vpop.f32.mrf.mxu0  ;;  %v4051_v59 = vadd.f32 %v4050_v25, %v4002_v32 }
 0x50e   : > { %v4003_v30 = vpop.f32.mrf.mxu1  ;;  %v3955_v39 = vadd.f32 %v3954_v46, %v8794_v1  ;;  %v8835_v1 = vld [vmem:[%s8887_s8] ss:$0 sm:$0xff] }
 0x50f   : > { %4640 = vmatmul.bf16.gmra.mxu3 %v4191_v43 }
 0x510   : > { %v4094_v7 = vpop.f32.mrf.mxu3  ;;  %v4004_v49 = vadd.f32 %v4003_v30, %v3955_v39 }
 0x511   : > { %v4095_v51 = vadd.f32 %v4094_v7, %v4046_v63 }
 0x513   : > { %v4155_v48 = vmax.f32 %v4095_v51, 0.0 }
 0x514   : > { %v4052_v35 = vpop.f32.mrf.mxu2 }
 0x515   : > { %v4469_v22 = vpop.f32.mrf.mxu0  ;;  %v4053_v44 = vadd.f32 %v4052_v35, %v4004_v49 }
 0x516   : > { %v4518_v12 = vpop.f32.mrf.mxu1  ;;  %v4470_v40 = vadd.f32 %v8835_v1, %v4469_v22 }
 0x518   : > { %v4096_v53 = vpop.f32.mrf.mxu3  ;;  %v4519_v29 = vadd.f32 %v4518_v12, %v4470_v40 }
 0x519   : > { %v4097_v27 = vadd.f32 %v4096_v53, %v4048_v18 }
 0x51b   : > { %v4159_v60 = vmax.f32 %v4097_v27, 0.0 }
 0x51c   : > { %v4567_v20 = vpop.f32.mrf.mxu2 }
 0x51d   : > { %v4195_v2 = vpack.c.bf16 %v4159_v60, %v4155_v48  ;;  %v4471_v38 = vpop.f32.mrf.mxu0  ;;  %v4568_v9 = vadd.f32 %v4567_v20, %v4519_v29 }
 0x51e   : > { %v4520_v13 = vpop.f32.mrf.mxu1  ;;  %v4472_v26 = vadd.f32 %v8835_v1, %v4471_v38 }
 0x51f   : > { %4645 = vmatmul.bf16.gmra.mxu3 %v4195_v2 }
 0x520   : > { %v4099_v23 = vpop.f32.mrf.mxu3  ;;  %v4521_v3 = vadd.f32 %v4520_v13, %v4472_v26 }
 0x521   : > { %v4100_v16 = vadd.f32 %v4099_v23, %v4051_v59 }
 0x523   : > { %v4163_v61 = vmax.f32 %v4100_v16, 0.0 }
 0x524   : > { %v4569_v42 = vpop.f32.mrf.mxu2 }
 0x525   : > { %v4474_v47 = vpop.f32.mrf.mxu0  ;;  %v4570_v52 = vadd.f32 %v4569_v42, %v4521_v3 }
 0x526   : > { %v4523_v31 = vpop.f32.mrf.mxu1  ;;  %v4475_v14 = vadd.f32 %v8835_v1, %v4474_v47 }
 0x528   : > { %v4101_v4 = vpop.f32.mrf.mxu3  ;;  %v4524_v50 = vadd.f32 %v4523_v31, %v4475_v14 }
 0x529   : > { %v4102_v56 = vadd.f32 %v4101_v4, %v4053_v44 }
 0x52b   : > { %v4167_v62 = vmax.f32 %v4102_v56, 0.0 }
 0x52c   : > { %v4572_v37 = vpop.f32.mrf.mxu2 }
 0x52d   : > { %v4199_v21 = vpack.c.bf16 %v4167_v62, %v4163_v61  ;;  %v4476_v28 = vpop.f32.mrf.mxu0  ;;  %v4573_v55 = vadd.f32 %v4572_v37, %v4524_v50 }
 0x52e   : > { %v4525_v33 = vpop.f32.mrf.mxu1  ;;  %v4477_v25 = vadd.f32 %v8835_v1, %v4476_v28 }
 0x52f   : > { %4650 = vmatmul.bf16.gmra.mxu3 %v4199_v21 }
 0x530   : > { %v4526_v46 = vadd.f32 %v4525_v33, %v4477_v25 }
 0x534   : > { %v4574_v15 = vpop.f32.mrf.mxu2 }
 0x535   : > { %v4479_v8 = vpop.f32.mrf.mxu0  ;;  %v4575_v7 = vadd.f32 %v4574_v15, %v4526_v46 }
 0x536   : > { %v4528_v10 = vpop.f32.mrf.mxu1  ;;  %v4480_v45 = vadd.f32 %v8835_v1, %v4479_v8 }
 0x538   : > { %v4529_v35 = vadd.f32 %v4528_v10, %v4480_v45 }
 0x53c   : > { %v4577_v24 = vpop.f32.mrf.mxu2 }
 0x53d   : > { %v4481_v54 = vpop.f32.mrf.mxu0  ;;  %v4578_v51 = vadd.f32 %v4577_v24, %v4529_v35 }
 0x53e   : > { %v4530_v41 = vpop.f32.mrf.mxu1  ;;  %v4482_v27 = vadd.f32 %v8835_v1, %v4481_v54 }
 0x540   : > { %v4531_v2 = vadd.f32 %v4530_v41, %v4482_v27 }
 0x542   : > { %v4616_v19 = vpop.f32.mrf.mxu3 }
 0x543   : > { %v4617_v57 = vadd.f32 %v4616_v19, %v4568_v9 }
 0x544   : > { %v4579_v17 = vpop.f32.mrf.mxu2 }
 0x545   : > { %4656 = vst [vmem:[%s8843_s26] sm:$0xff] %v4617_v57  ;;  %v4484_v11 = vpop.f32.mrf.mxu0  ;;  %v4580_v6 = vadd.f32 %v4579_v17, %v4531_v2 }
 0x546   : > { %v4533_v63 = vpop.f32.mrf.mxu1  ;;  %v4485_v23 = vadd.f32 %v8835_v1, %v4484_v11 }
 0x548   : > { %v4534_v32 = vadd.f32 %v4533_v63, %v4485_v23 }
 0x54a   : > { %v4618_v0 = vpop.f32.mrf.mxu3 }
 0x54b   : > { %v4619_v5 = vadd.f32 %v4618_v0, %v4570_v52 }
 0x54c   : > { %v4582_v30 = vpop.f32.mrf.mxu2 }
 0x54d   : > { %4657 = vst [vmem:[%s8843_s26 + $0x8] sm:$0xff] %v4619_v5  ;;  %v4486_v18 = vpop.f32.mrf.mxu0  ;;  %v4583_v49 = vadd.f32 %v4582_v30, %v4534_v32 }
 0x54e   : > { %v4535_v48 = vpop.f32.mrf.mxu1  ;;  %v4487_v16 = vadd.f32 %v8835_v1, %v4486_v18 }
 0x550   : > { %v4536_v56 = vadd.f32 %v4535_v48, %v4487_v16 }
 0x552   : > { %v4621_v58 = vpop.f32.mrf.mxu3 }
 0x553   : > { %v4622_v43 = vadd.f32 %v4621_v58, %v4573_v55 }
 0x554   : > { %v4584_v60 = vpop.f32.mrf.mxu2 }
 0x555   : > { %4658 = vst [vmem:[%s8843_s26 + $0x10] sm:$0xff] %v4622_v43  ;;  %v4489_v12 = vpop.f32.mrf.mxu0  ;;  %v4585_v42 = vadd.f32 %v4584_v60, %v4536_v56 }
 0x556   : > { %v4538_v38 = vpop.f32.mrf.mxu1  ;;  %v4490_v47 = vadd.f32 %v8835_v1, %v4489_v12 }
 0x558   : > { %v4539_v28 = vadd.f32 %v4538_v38, %v4490_v47 }
 0x55a   : > { %v4623_v36 = vpop.f32.mrf.mxu3 }
 0x55b   : > { %v4624_v34 = vadd.f32 %v4623_v36, %v4575_v7 }
 0x55c   : > { %v4587_v59 = vpop.f32.mrf.mxu2 }
 0x55d   : > { %4659 = vst [vmem:[%s8843_s26 + $0x18] sm:$0xff] %v4624_v34  ;;  %v4491_v13 = vpop.f32.mrf.mxu0  ;;  %v4588_v40 = vadd.f32 %v4587_v59, %v4539_v28 }
 0x55e   : > { %v4540_v61 = vpop.f32.mrf.mxu1  ;;  %v4492_v15 = vadd.f32 %v8835_v1, %v4491_v13 }
 0x560   : > { %v4541_v19 = vadd.f32 %v4540_v61, %v4492_v15 }
 0x562   : > { %v4626_v53 = vpop.f32.mrf.mxu3 }
 0x563   : > { %v4627_v22 = vadd.f32 %v4626_v53, %v4578_v51 }
 0x564   : > { %v4589_v62 = vpop.f32.mrf.mxu2 }
 0x565   : > { %4660 = vst [vmem:[%s8843_s26 + $0x20] sm:$0xff] %v4627_v22  ;;  %v4494_v37 = vpop.f32.mrf.mxu0  ;;  %v4590_v57 = vadd.f32 %v4589_v62, %v4541_v19 }
 0x566   : > { %v4543_v29 = vpop.f32.mrf.mxu1  ;;  %v4495_v10 = vadd.f32 %v8835_v1, %v4494_v37 }
 0x568   : > { %v4544_v14 = vadd.f32 %v4543_v29, %v4495_v10 }
 0x56a   : > { %v4628_v20 = vpop.f32.mrf.mxu3 }
 0x56b   : > { %v4629_v39 = vadd.f32 %v4628_v20, %v4580_v6 }
 0x56c   : > { %v4592_v8 = vpop.f32.mrf.mxu2 }
 0x56d   : > { %4661 = vst [vmem:[%s8843_s26 + $0x28] sm:$0xff] %v4629_v39  ;;  %v4496_v26 = vpop.f32.mrf.mxu0  ;;  %v4593_v5 = vadd.f32 %v4592_v8, %v4544_v14 }
 0x56e   : > { %v4545_v52 = vpop.f32.mrf.mxu1  ;;  %v4497_v55 = vadd.f32 %v8835_v1, %v4496_v26 }
 0x570   : > { %v4546_v17 = vadd.f32 %v4545_v52, %v4497_v55 }
 0x572   : > { %v4631_v44 = vpop.f32.mrf.mxu3 }
 0x573   : > { %v4632_v4 = vadd.f32 %v4631_v44, %v4583_v49 }
 0x574   : > { %v4594_v0 = vpop.f32.mrf.mxu2 }
 0x575   : > { %4662 = vst [vmem:[%s8843_s26 + $0x30] sm:$0xff] %v4632_v4  ;;  %v4499_v54 = vpop.f32.mrf.mxu0  ;;  %v4595_v43 = vadd.f32 %v4594_v0, %v4546_v17 }
 0x576   : > { %v4548_v58 = vpop.f32.mrf.mxu1  ;;  %v4500_v46 = vadd.f32 %v8835_v1, %v4499_v54 }
 0x578   : > { %v4549_v45 = vadd.f32 %v4548_v58, %v4500_v46 }
 0x57a   : > { %v4633_v21 = vpop.f32.mrf.mxu3 }
 0x57b   : > { %v4634_v31 = vadd.f32 %v4633_v21, %v4585_v42 }
 0x57c   : > { %v4597_v25 = vpop.f32.mrf.mxu2 }
 0x57d   : > { %4663 = vst [vmem:[%s8843_s26 + $0x38] sm:$0xff] %v4634_v31  ;;  %v4501_v36 = vpop.f32.mrf.mxu0  ;;  %v4598_v63 = vadd.f32 %v4597_v25, %v4549_v45 }
 0x57e   : > { %v4550_v34 = vpop.f32.mrf.mxu1  ;;  %v4502_v18 = vadd.f32 %v8835_v1, %v4501_v36 }
 0x580   : > { %v4551_v27 = vadd.f32 %v4550_v34, %v4502_v18 }
 0x582   : > { %v4636_v33 = vpop.f32.mrf.mxu3 }
 0x583   : > { %v4637_v9 = vadd.f32 %v4636_v33, %v4588_v40 }
 0x584   : > { %v4599_v30 = vpop.f32.mrf.mxu2 }
 0x585   : > { %4664 = vst [vmem:[%s8843_s26 + $0x40] sm:$0xff] %v4637_v9  ;;  %v4504_v53 = vpop.f32.mrf.mxu0  ;;  %v4600_v22 = vadd.f32 %v4599_v30, %v4551_v27 }
 0x586   : > { %v4505_v60 = vadd.f32 %v8835_v1, %v4504_v53  ;;  %v4553_v6 = vpop.f32.mrf.mxu1 }
 0x588   : > { %v4554_v20 = vadd.f32 %v4553_v6, %v4505_v60 }
 0x58a   : > { %v4638_v3 = vpop.f32.mrf.mxu3 }
 0x58b   : > { %v4639_v24 = vadd.f32 %v4638_v3, %v4590_v57 }
 0x58c   : > { %v4602_v12 = vpop.f32.mrf.mxu2 }
 0x58d   : > { %4665 = vst [vmem:[%s8843_s26 + $0x48] sm:$0xff] %v4639_v24  ;;  %v4506_v23 = vpop.f32.mrf.mxu0  ;;  %v4603_v39 = vadd.f32 %v4602_v12, %v4554_v20 }
 0x58e   : > { %v4507_v38 = vadd.f32 %v8835_v1, %v4506_v23  ;;  %v4555_v49 = vpop.f32.mrf.mxu1 }
 0x590   : > { %v4556_v16 = vadd.f32 %v4555_v49, %v4507_v38 }
 0x592   : > { %v4641_v50 = vpop.f32.mrf.mxu3 }
 0x593   : > { %v4642_v41 = vadd.f32 %v4641_v50, %v4593_v5 }
 0x594   : > { %v4604_v44 = vpop.f32.mrf.mxu2 }
 0x595   : > { %4666 = vst [vmem:[%s8843_s26 + $0x50] sm:$0xff] %v4642_v41  ;;  %v4605_v4 = vadd.f32 %v4604_v44, %v4556_v16 }
 0x59a   : > { %v4643_v11 = vpop.f32.mrf.mxu3 }
 0x59b   : > { %v4644_v7 = vadd.f32 %v4643_v11, %v4595_v43 }
 0x59d   : > { %4667 = vst [vmem:[%s8843_s26 + $0x58] sm:$0xff] %v4644_v7 }
 0x5a2   : > { %v4646_v35 = vpop.f32.mrf.mxu3 }
 0x5a3   : > { %v4647_v51 = vadd.f32 %v4646_v35, %v4598_v63 }
 0x5a5   : > { %4668 = vst [vmem:[%s8843_s26 + $0x60] sm:$0xff] %v4647_v51 }
 0x5aa   : > { %v4648_v48 = vpop.f32.mrf.mxu3 }
 0x5ab   : > { %v4649_v2 = vadd.f32 %v4648_v48, %v4600_v22 }
 0x5ad   : > { %4669 = vst [vmem:[%s8843_s26 + $0x68] sm:$0xff] %v4649_v2 }
 0x5b2   : > { %v4651_v32 = vpop.f32.mrf.mxu3 }
 0x5b3   : > { %v4652_v59 = vadd.f32 %v4651_v32, %v4603_v39 }
 0x5b5   : > { %4670 = vst [vmem:[%s8843_s26 + $0x70] sm:$0xff] %v4652_v59 }
 0x5ba   : > { %v4653_v13 = vpop.f32.mrf.mxu3 }
 0x5bb   : > { %v4654_v56 = vadd.f32 %v4653_v13, %v4605_v4 }
 0x5bd   : > { %4671 = vst [vmem:[%s8843_s26 + $0x78] sm:$0xff] %v4654_v56 }
 0x5be PF: > { %s19_s30 = sadd.s32 1, %s6216_s30  }
 0x5bf   : > { %p16_p4 = scmp.ge.s32.totalorder %s19_s30, 4  }
 0x5c1   :  { %18 = sbr.rel (!%p16_p4) target bundleno = 1 (0x1), region = 86 }

</bundles_post_ra>
